<compile_context>
chip_gen: v5e
topology: v5e:2x2
jax: 0.10.0
libtpu: 0.0.40
codegen_flags: <defaults>
</compile_context>

<pallas_src>
import functools

import jax
import jax.numpy as jnp
from jax.experimental import pallas as pl
from jax.experimental.pallas import tpu as pltpu

LEAKY_SLOPE = 0.01                 # nn.LeakyReLU() default negative_slope
COMPUTE_DTYPE = jnp.bfloat16       # MXU operand dtype (f32 accumulation).
                                   # Flip to jnp.float32 for bit-closer math.


# ------------------------------ fused kernel --------------------------------
def _fused_kernel(x_ref, w0_ref, b0_ref, wm_ref, bm_ref, wl_ref, bl_ref,
                  ftw_ref, ftb_ref, o_ref, *, H, W, n_mid, compute_dtype):
    """Whole network for ONE batch element, fully resident in VMEM/vregs."""
    f32 = jnp.float32
    cd = compute_dtype

    def band_lhs(a):
        # a: (H, WC) f32 -> (H, 3*WC) compute dtype:
        #   [ rows y-1 (dy=0 taps) | rows y (dy=1) | rows y+1 (dy=2) ]
        zero = jnp.zeros((1, a.shape[1]), a.dtype)
        up = jnp.concatenate([zero, a[:-1, :]], axis=0)   # row y <- row y-1
        dn = jnp.concatenate([a[1:, :], zero], axis=0)    # row y <- row y+1
        return jnp.concatenate([up, a, dn], axis=1).astype(cd)

    def conv3x3(a, w, b, residual=None):
        # One MXU matmul per 3x3 'same' conv: dx taps + channel mix live in the
        # block-banded weight, dy taps in the row-shifted lhs blocks.
        acc = jnp.dot(band_lhs(a), w, preferred_element_type=f32) + b
        out = jnp.where(acc >= 0, acc, LEAKY_SLOPE * acc)       # LeakyReLU
        if residual is not None:
            out = out + residual                                # x += res (post-relu)
        return out

    a = x_ref[0].astype(f32)                                    # (H, W*Cin)

    # conv0
    a = conv3x3(a, w0_ref[...], b0_ref[...])
    saved = {0: a}                                              # res0
    save_after = {1: 1, 3: 2, 5: 3}                             # mid idx -> res slot
    add_to = {7: 3, 9: 2, 11: 1, 13: 0}                         # mid idx -> res slot

    # conv1..conv7, conv_transpose0..conv_transpose6 (all hidden-width layers)
    for li in range(n_mid):                                     # static unroll (14)
        res = saved[add_to[li]] if li in add_to else None
        a = conv3x3(a, wm_ref[li], bm_ref[li], residual=res)
        if li in save_after:
            saved[save_after[li]] = a

    # conv_transpose7: hidden -> 1 channel, then LeakyReLU.  a: (H, W)
    a = conv3x3(a, wl_ref[...], bl_ref[...])

    # self.ft : Linear(H*W, H*W) on the row-major flatten of a.
    #   out[j] = sum_{y,x} a[y, x] * ftw[y*W + x, j] + ftb[j]
    acc = ftb_ref[...]                                          # (1, HW) f32
    for y in range(H):                                          # static unroll
        acc = acc + jnp.dot(a[y:y + 1, :].astype(cd),
                            ftw_ref[y * W:(y + 1) * W, :],
                            preferred_element_type=f32)
    o_ref[0] = acc.astype(o_ref.dtype)                          # (1, HW) lane-dense


# --------------------------- weight preparation ------------------------------
def _banded_conv_weight(w_hwio, width):
    """(3,3,Cin,Cout) HWIO conv kernel -> (3*W*Cin, W*Cout) block-banded matrix
    (dy-major row blocks) implementing the dx taps + channel mix as a single
    matmul in the (rows=H, lanes=W*C) layout.  'same' zero padding along x
    falls out of the band structure."""
    kh, kw, cin, cout = w_hwio.shape
    assert (kh, kw) == (3, 3)
    # shift[dx, x_in, x_out] = 1  iff  x_in == x_out + dx - 1
    shift = jnp.stack([jnp.eye(width, k=1 - d, dtype=w_hwio.dtype)
                       for d in range(kw)])
    band = jnp.einsum("dio,ydcf->yicof", shift, w_hwio)        # (3, W, Cin, W, Cout)
    return band.reshape(kh * width * cin, width * cout)


def _tiled_bias(b, width):
    # lane = x*Cout + co  -> value b[co]
    return jnp.tile(b, width).reshape(1, width * b.shape[0]).astype(jnp.float32)


_MID_LAYER_NAMES = tuple([f"conv{i}" for i in range(1, 8)]
                         + [f"convt{i}" for i in range(0, 7)])


def pack_params(params, height, width, compute_dtype=COMPUTE_DTYPE):
    """One-time conversion of per-layer HWIO conv weights + ft Linear into the
    packed, banded, lane-dense form the fused kernel consumes."""
    del height
    w0, b0 = params["conv0"]
    wl, bl = params["convt7"]
    wft, bft = params["ft"]                       # torch Linear: (out,in), (out,)

    wm = jnp.stack([_banded_conv_weight(params[n][0], width)
                    for n in _MID_LAYER_NAMES])                  # (14, 3*W*hid, W*hid)
    bm = jnp.stack([_tiled_bias(params[n][1], width) for n in _MID_LAYER_NAMES])

    return dict(
        w0=_banded_conv_weight(w0, width).astype(compute_dtype),  # (3*W*Cin, W*hid)
        b0=_tiled_bias(b0, width),
        wm=wm.astype(compute_dtype),
        bm=bm,                                    # (14, 1, W*hid) f32
        wl=_banded_conv_weight(wl, width).astype(compute_dtype),  # (3*W*hid, W)
        bl=_tiled_bias(bl, width),
        ftw=jnp.transpose(wft).astype(compute_dtype),   # (in=H*W, out=H*W)
        ftb=bft.reshape(1, -1).astype(jnp.float32),
    )


# --------------------------------- forward -----------------------------------
def noise_matrix_predictor_v2(x_nchw, packed, *, out_channels=1):
    N, cin, H, W = x_nchw.shape
    HW = H * W
    wc = packed["wm"].shape[-1]                   # W * hidden (128 here)
    n_mid = packed["bm"].shape[0]

    # NCHW -> (N, H, W*Cin): rows = image rows, lanes = (x, channel).
    x = jnp.transpose(x_nchw, (0, 2, 3, 1)).reshape(N, H, W * cin)
    x = x.astype(jnp.float32)

    kernel = functools.partial(_fused_kernel, H=H, W=W, n_mid=n_mid,
                               compute_dtype=packed["wm"].dtype)
    out = pl.pallas_call(
        kernel,
        out_shape=jax.ShapeDtypeStruct((N, 1, HW), jnp.float32),
        grid_spec=pltpu.PrefetchScalarGridSpec(
            num_scalar_prefetch=0,
            grid=(N,),                                            # one program / batch element
            in_specs=[
                pl.BlockSpec((1, H, W * cin), lambda b: (b, 0, 0)),      # x
                pl.BlockSpec((3 * W * cin, wc), lambda b: (0, 0)),       # conv0 W (banded)
                pl.BlockSpec((1, wc), lambda b: (0, 0)),                 # conv0 b
                pl.BlockSpec((n_mid, 3 * wc, wc), lambda b: (0, 0, 0)),  # mid Ws (banded)
                pl.BlockSpec((n_mid, 1, wc), lambda b: (0, 0, 0)),       # mid biases
                pl.BlockSpec((3 * wc, W), lambda b: (0, 0)),             # convt7 W (banded)
                pl.BlockSpec((1, W), lambda b: (0, 0)),                  # convt7 b
                pl.BlockSpec((HW, HW), lambda b: (0, 0)),                # ft weight^T
                pl.BlockSpec((1, HW), lambda b: (0, 0)),                 # ft bias
            ],
            out_specs=pl.BlockSpec((1, 1, HW), lambda b: (b, 0, 0)),
        ),
        compiler_params=pltpu.CompilerParams(
            # batch axis is independent -> v7x megacore can split it over 2 TCs
            dimension_semantics=("parallel",)),
    )(x, packed["w0"], packed["b0"], packed["wm"], packed["bm"],
      packed["wl"], packed["bl"], packed["ftw"], packed["ftb"])

    return out.reshape(N, out_channels, H, W)     # x.view(bs, out_c, H, W)


# ------------------------------ parameters -----------------------------------
def init_params(key, in_channels, hidden, height, width):
    params = {}

    def conv_param(k, cin, cout):
        k1, k2 = jax.random.split(k)
        scale = 1.0 / jnp.sqrt(9.0 * cin)
        w = jax.random.normal(k1, (3, 3, cin, cout), jnp.float32) * scale
        b = jax.random.normal(k2, (cout,), jnp.float32) * scale
        return w, b

    keys = jax.random.split(key, 17)
    enc = [(in_channels, hidden)] + [(hidden, hidden)] * 7       # conv0..conv7
    for i, (ci, co) in enumerate(enc):
        params[f"conv{i}"] = conv_param(keys[i], ci, co)
    dec = [(hidden, hidden)] * 7 + [(hidden, 1)]                 # convt0..convt7
    for i, (ci, co) in enumerate(dec):
        params[f"convt{i}"] = conv_param(keys[8 + i], ci, co)

    orig = height * width                                        # self.ft Linear
    k1, k2 = jax.random.split(keys[16])
    s = 1.0 / jnp.sqrt(float(orig))
    params["ft"] = (jax.random.normal(k1, (orig, orig), jnp.float32) * s,
                    jax.random.normal(k2, (orig,), jnp.float32) * s)
    return params


# ------------------------- pure-JAX f32 reference ----------------------------
def reference_forward(x_nchw, params, *, out_channels=1):
    hi = jax.lax.Precision.HIGHEST
    x = jnp.transpose(x_nchw, (0, 2, 3, 1)).astype(jnp.float32)  # NHWC
    N, H, W, _ = x.shape

    def conv(name, xin, residual=None):
        w, b = params[name]
        y = jax.lax.conv_general_dilated(
            xin, w, (1, 1), "SAME",
            dimension_numbers=("NHWC", "HWIO", "NHWC"), precision=hi) + b
        y = jnp.where(y >= 0, y, LEAKY_SLOPE * y)
        return y if residual is None else y + residual

    x = conv("conv0", x);  res0 = x
    x = conv("conv1", x)
    x = conv("conv2", x);  res1 = x
    x = conv("conv3", x)
    x = conv("conv4", x);  res2 = x
    x = conv("conv5", x)
    x = conv("conv6", x);  res3 = x
    x = conv("conv7", x)
    x = conv("convt0", x, res3)
    x = conv("convt1", x)
    x = conv("convt2", x, res2)
    x = conv("convt3", x)
    x = conv("convt4", x, res1)
    x = conv("convt5", x)
    x = conv("convt6", x, res0)
    x = conv("convt7", x)                                        # (N, H, W, 1)

    flat = x[..., 0].reshape(N, H * W)
    wft, bft = params["ft"]
    out = jnp.dot(flat, wft.T, precision=hi) + bft
    return out.reshape(N, out_channels, H, W)


# ----------------------------------- main ------------------------------------
if __name__ == "__main__":
    in_channels, out_channels = 4, 1
    height = width = 16
    hidden_size = 8            # width * hidden_size = 128 -> lane-dense hidden layers
    batch = 2

    key = jax.random.PRNGKey(0)
    kx, kp = jax.random.split(key)
    x = jax.random.normal(kx, (batch, in_channels, height, width), jnp.float32)
    params = init_params(kp, in_channels, hidden_size, height, width)
    packed = pack_params(params, height, width, compute_dtype=COMPUTE_DTYPE)

    fwd = jax.jit(functools.partial(noise_matrix_predictor_v2,
                                    out_channels=out_channels))
    out = fwd(x, packed)
    jax.block_until_ready(out)
    assert out.shape == (batch, out_channels, height, width), out.shape
    assert out.dtype == jnp.float32
    assert bool(jnp.all(jnp.isfinite(out)))

    # Numerical check against a pure-JAX f32 reference (loose tolerance because
    # the kernel uses bf16 MXU operands with f32 accumulation).
    ref = reference_forward(x, params, out_channels=out_channels)
    rel = float(jnp.linalg.norm(out - ref) / (jnp.linalg.norm(ref) + 1e-8))
    tol = 0.1 if COMPUTE_DTYPE == jnp.bfloat16 else 1e-3
    assert rel < tol, f"relative L2 error too high: {rel}"
    print("KERNEL_OK")
</pallas_src>

<mosaic_0001>
module attributes {stable_mosaic.version = 11 : i64} {
  func.func @_fused_kernel(%arg0: i32, %arg1: memref<1x16x64xf32, #tpu.memory_space<vmem>>, %arg2: memref<192x128xbf16, #tpu.memory_space<vmem>>, %arg3: memref<1x128xf32, #tpu.memory_space<vmem>>, %arg4: memref<14x384x128xbf16, #tpu.memory_space<vmem>>, %arg5: memref<14x1x128xf32, #tpu.memory_space<vmem>>, %arg6: memref<384x16xbf16, #tpu.memory_space<vmem>>, %arg7: memref<1x16xf32, #tpu.memory_space<vmem>>, %arg8: memref<256x256xbf16, #tpu.memory_space<vmem>>, %arg9: memref<1x256xf32, #tpu.memory_space<vmem>>, %arg10: memref<1x1x256xf32, #tpu.memory_space<vmem>>) attributes {dimension_semantics = [#tpu.dimension_semantics<parallel>], iteration_bounds = array<i64: 2>, scalar_prefetch = 0 : i64, scratch_operands = 0 : i64, tpu.core_type = #tpu.core_type<tc>, window_params = [{transform_indices = @transform_0, window_bounds = array<i64: 1, 16, 64>}, {pipeline_mode = #tpu.pipeline_mode<synchronous>, transform_indices = @transform_1, window_bounds = array<i64: 192, 128>}, {pipeline_mode = #tpu.pipeline_mode<synchronous>, transform_indices = @transform_2, window_bounds = array<i64: 1, 128>}, {pipeline_mode = #tpu.pipeline_mode<synchronous>, transform_indices = @transform_3, window_bounds = array<i64: 14, 384, 128>}, {pipeline_mode = #tpu.pipeline_mode<synchronous>, transform_indices = @transform_4, window_bounds = array<i64: 14, 1, 128>}, {pipeline_mode = #tpu.pipeline_mode<synchronous>, transform_indices = @transform_5, window_bounds = array<i64: 384, 16>}, {pipeline_mode = #tpu.pipeline_mode<synchronous>, transform_indices = @transform_6, window_bounds = array<i64: 1, 16>}, {pipeline_mode = #tpu.pipeline_mode<synchronous>, transform_indices = @transform_7, window_bounds = array<i64: 256, 256>}, {pipeline_mode = #tpu.pipeline_mode<synchronous>, transform_indices = @transform_8, window_bounds = array<i64: 1, 256>}, {transform_indices = @transform_9, window_bounds = array<i64: 1, 1, 256>}]} {
    %c0 = arith.constant 0 : index
    %c0_0 = arith.constant 0 : index
    %c0_1 = arith.constant 0 : index
    %0 = vector.load %arg1[%c0, %c0_0, %c0_1] : memref<1x16x64xf32, #tpu.memory_space<vmem>>, vector<1x16x64xf32>
    %1 = vector.shape_cast %0 : vector<1x16x64xf32> to vector<16x64xf32>
    %c0_2 = arith.constant 0 : index
    %c0_3 = arith.constant 0 : index
    %2 = vector.load %arg2[%c0_2, %c0_3] : memref<192x128xbf16, #tpu.memory_space<vmem>>, vector<192x128xbf16>
    %c0_4 = arith.constant 0 : index
    %c0_5 = arith.constant 0 : index
    %3 = vector.load %arg3[%c0_4, %c0_5] : memref<1x128xf32, #tpu.memory_space<vmem>>, vector<1x128xf32>
    %cst = arith.constant 0.000000e+00 : f32
    %4 = vector.broadcast %cst : f32 to vector<1x64xf32>
    %5 = vector.extract_strided_slice %1 {offsets = [0, 0], sizes = [15, 64], strides = [1, 1]} : vector<16x64xf32> to vector<15x64xf32>
    %6 = tpu.concatenate %4, %5 in 0 : vector<1x64xf32>, vector<15x64xf32> -> vector<16x64xf32>
    %7 = vector.extract_strided_slice %1 {offsets = [1, 0], sizes = [15, 64], strides = [1, 1]} : vector<16x64xf32> to vector<15x64xf32>
    %8 = tpu.concatenate %7, %4 in 0 : vector<15x64xf32>, vector<1x64xf32> -> vector<16x64xf32>
    %9 = tpu.concatenate %6, %1, %8 in 1 : vector<16x64xf32>, vector<16x64xf32>, vector<16x64xf32> -> vector<16x192xf32>
    %10 = arith.truncf %9 : vector<16x192xf32> to vector<16x192xbf16>
    %cst_6 = arith.constant dense<0.000000e+00> : vector<16x128xf32>
    %11 = tpu.matmul %10, %2, %cst_6 {dimension_numbers = #tpu.dot_dimension_numbers<[1], [0], [0], [1], [0, 0, 1, 1], [], []>} : vector<16x192xbf16>, vector<192x128xbf16>, vector<16x128xf32> -> vector<16x128xf32>
    %12 = vector.broadcast %3 : vector<1x128xf32> to vector<16x128xf32>
    %13 = arith.addf %11, %12 : vector<16x128xf32>
    %cst_7 = arith.constant 0.000000e+00 : f32
    %14 = vector.broadcast %cst_7 : f32 to vector<16x128xf32>
    %15 = arith.cmpf oge, %13, %14 : vector<16x128xf32>
    %cst_8 = arith.constant 0.00999999977 : f32
    %16 = vector.broadcast %cst_8 : f32 to vector<16x128xf32>
    %17 = arith.mulf %16, %13 : vector<16x128xf32>
    %18 = arith.select %15, %13, %17 : vector<16x128xi1>, vector<16x128xf32>
    %c0_9 = arith.constant 0 : index
    %c0_10 = arith.constant 0 : index
    %c0_11 = arith.constant 0 : index
    %19 = vector.load %arg4[%c0_9, %c0_10, %c0_11] : memref<14x384x128xbf16, #tpu.memory_space<vmem>>, vector<1x384x128xbf16>
    %20 = vector.shape_cast %19 : vector<1x384x128xbf16> to vector<384x128xbf16>
    %c0_12 = arith.constant 0 : index
    %c0_13 = arith.constant 0 : index
    %c0_14 = arith.constant 0 : index
    %21 = vector.load %arg5[%c0_12, %c0_13, %c0_14] : memref<14x1x128xf32, #tpu.memory_space<vmem>>, vector<1x1x128xf32>
    %22 = vector.shape_cast %21 : vector<1x1x128xf32> to vector<1x128xf32>
    %cst_15 = arith.constant 0.000000e+00 : f32
    %23 = vector.broadcast %cst_15 : f32 to vector<1x128xf32>
    %24 = vector.extract_strided_slice %18 {offsets = [0, 0], sizes = [15, 128], strides = [1, 1]} : vector<16x128xf32> to vector<15x128xf32>
    %25 = tpu.concatenate %23, %24 in 0 : vector<1x128xf32>, vector<15x128xf32> -> vector<16x128xf32>
    %26 = vector.extract_strided_slice %18 {offsets = [1, 0], sizes = [15, 128], strides = [1, 1]} : vector<16x128xf32> to vector<15x128xf32>
    %27 = tpu.concatenate %26, %23 in 0 : vector<15x128xf32>, vector<1x128xf32> -> vector<16x128xf32>
    %28 = tpu.concatenate %25, %18, %27 in 1 : vector<16x128xf32>, vector<16x128xf32>, vector<16x128xf32> -> vector<16x384xf32>
    %29 = arith.truncf %28 : vector<16x384xf32> to vector<16x384xbf16>
    %cst_16 = arith.constant dense<0.000000e+00> : vector<16x128xf32>
    %30 = tpu.matmul %29, %20, %cst_16 {dimension_numbers = #tpu.dot_dimension_numbers<[1], [0], [0], [1], [0, 0, 1, 1], [], []>} : vector<16x384xbf16>, vector<384x128xbf16>, vector<16x128xf32> -> vector<16x128xf32>
    %31 = vector.broadcast %22 : vector<1x128xf32> to vector<16x128xf32>
    %32 = arith.addf %30, %31 : vector<16x128xf32>
    %cst_17 = arith.constant 0.000000e+00 : f32
    %33 = vector.broadcast %cst_17 : f32 to vector<16x128xf32>
    %34 = arith.cmpf oge, %32, %33 : vector<16x128xf32>
    %cst_18 = arith.constant 0.00999999977 : f32
    %35 = vector.broadcast %cst_18 : f32 to vector<16x128xf32>
    %36 = arith.mulf %35, %32 : vector<16x128xf32>
    %37 = arith.select %34, %32, %36 : vector<16x128xi1>, vector<16x128xf32>
    %c1 = arith.constant 1 : index
    %c0_19 = arith.constant 0 : index
    %c0_20 = arith.constant 0 : index
    %38 = vector.load %arg4[%c1, %c0_19, %c0_20] : memref<14x384x128xbf16, #tpu.memory_space<vmem>>, vector<1x384x128xbf16>
    %39 = vector.shape_cast %38 : vector<1x384x128xbf16> to vector<384x128xbf16>
    %c1_21 = arith.constant 1 : index
    %c0_22 = arith.constant 0 : index
    %c0_23 = arith.constant 0 : index
    %40 = vector.load %arg5[%c1_21, %c0_22, %c0_23] : memref<14x1x128xf32, #tpu.memory_space<vmem>>, vector<1x1x128xf32>
    %41 = vector.shape_cast %40 : vector<1x1x128xf32> to vector<1x128xf32>
    %cst_24 = arith.constant 0.000000e+00 : f32
    %42 = vector.broadcast %cst_24 : f32 to vector<1x128xf32>
    %43 = vector.extract_strided_slice %37 {offsets = [0, 0], sizes = [15, 128], strides = [1, 1]} : vector<16x128xf32> to vector<15x128xf32>
    %44 = tpu.concatenate %42, %43 in 0 : vector<1x128xf32>, vector<15x128xf32> -> vector<16x128xf32>
    %45 = vector.extract_strided_slice %37 {offsets = [1, 0], sizes = [15, 128], strides = [1, 1]} : vector<16x128xf32> to vector<15x128xf32>
    %46 = tpu.concatenate %45, %42 in 0 : vector<15x128xf32>, vector<1x128xf32> -> vector<16x128xf32>
    %47 = tpu.concatenate %44, %37, %46 in 1 : vector<16x128xf32>, vector<16x128xf32>, vector<16x128xf32> -> vector<16x384xf32>
    %48 = arith.truncf %47 : vector<16x384xf32> to vector<16x384xbf16>
    %cst_25 = arith.constant dense<0.000000e+00> : vector<16x128xf32>
    %49 = tpu.matmul %48, %39, %cst_25 {dimension_numbers = #tpu.dot_dimension_numbers<[1], [0], [0], [1], [0, 0, 1, 1], [], []>} : vector<16x384xbf16>, vector<384x128xbf16>, vector<16x128xf32> -> vector<16x128xf32>
    %50 = vector.broadcast %41 : vector<1x128xf32> to vector<16x128xf32>
    %51 = arith.addf %49, %50 : vector<16x128xf32>
    %cst_26 = arith.constant 0.000000e+00 : f32
    %52 = vector.broadcast %cst_26 : f32 to vector<16x128xf32>
    %53 = arith.cmpf oge, %51, %52 : vector<16x128xf32>
    %cst_27 = arith.constant 0.00999999977 : f32
    %54 = vector.broadcast %cst_27 : f32 to vector<16x128xf32>
    %55 = arith.mulf %54, %51 : vector<16x128xf32>
    %56 = arith.select %53, %51, %55 : vector<16x128xi1>, vector<16x128xf32>
    %c2 = arith.constant 2 : index
    %c0_28 = arith.constant 0 : index
    %c0_29 = arith.constant 0 : index
    %57 = vector.load %arg4[%c2, %c0_28, %c0_29] : memref<14x384x128xbf16, #tpu.memory_space<vmem>>, vector<1x384x128xbf16>
    %58 = vector.shape_cast %57 : vector<1x384x128xbf16> to vector<384x128xbf16>
    %c2_30 = arith.constant 2 : index
    %c0_31 = arith.constant 0 : index
    %c0_32 = arith.constant 0 : index
    %59 = vector.load %arg5[%c2_30, %c0_31, %c0_32] : memref<14x1x128xf32, #tpu.memory_space<vmem>>, vector<1x1x128xf32>
    %60 = vector.shape_cast %59 : vector<1x1x128xf32> to vector<1x128xf32>
    %cst_33 = arith.constant 0.000000e+00 : f32
    %61 = vector.broadcast %cst_33 : f32 to vector<1x128xf32>
    %62 = vector.extract_strided_slice %56 {offsets = [0, 0], sizes = [15, 128], strides = [1, 1]} : vector<16x128xf32> to vector<15x128xf32>
    %63 = tpu.concatenate %61, %62 in 0 : vector<1x128xf32>, vector<15x128xf32> -> vector<16x128xf32>
    %64 = vector.extract_strided_slice %56 {offsets = [1, 0], sizes = [15, 128], strides = [1, 1]} : vector<16x128xf32> to vector<15x128xf32>
    %65 = tpu.concatenate %64, %61 in 0 : vector<15x128xf32>, vector<1x128xf32> -> vector<16x128xf32>
    %66 = tpu.concatenate %63, %56, %65 in 1 : vector<16x128xf32>, vector<16x128xf32>, vector<16x128xf32> -> vector<16x384xf32>
    %67 = arith.truncf %66 : vector<16x384xf32> to vector<16x384xbf16>
    %cst_34 = arith.constant dense<0.000000e+00> : vector<16x128xf32>
    %68 = tpu.matmul %67, %58, %cst_34 {dimension_numbers = #tpu.dot_dimension_numbers<[1], [0], [0], [1], [0, 0, 1, 1], [], []>} : vector<16x384xbf16>, vector<384x128xbf16>, vector<16x128xf32> -> vector<16x128xf32>
    %69 = vector.broadcast %60 : vector<1x128xf32> to vector<16x128xf32>
    %70 = arith.addf %68, %69 : vector<16x128xf32>
    %cst_35 = arith.constant 0.000000e+00 : f32
    %71 = vector.broadcast %cst_35 : f32 to vector<16x128xf32>
    %72 = arith.cmpf oge, %70, %71 : vector<16x128xf32>
    %cst_36 = arith.constant 0.00999999977 : f32
    %73 = vector.broadcast %cst_36 : f32 to vector<16x128xf32>
    %74 = arith.mulf %73, %70 : vector<16x128xf32>
    %75 = arith.select %72, %70, %74 : vector<16x128xi1>, vector<16x128xf32>
    %c3 = arith.constant 3 : index
    %c0_37 = arith.constant 0 : index
    %c0_38 = arith.constant 0 : index
    %76 = vector.load %arg4[%c3, %c0_37, %c0_38] : memref<14x384x128xbf16, #tpu.memory_space<vmem>>, vector<1x384x128xbf16>
    %77 = vector.shape_cast %76 : vector<1x384x128xbf16> to vector<384x128xbf16>
    %c3_39 = arith.constant 3 : index
    %c0_40 = arith.constant 0 : index
    %c0_41 = arith.constant 0 : index
    %78 = vector.load %arg5[%c3_39, %c0_40, %c0_41] : memref<14x1x128xf32, #tpu.memory_space<vmem>>, vector<1x1x128xf32>
    %79 = vector.shape_cast %78 : vector<1x1x128xf32> to vector<1x128xf32>
    %cst_42 = arith.constant 0.000000e+00 : f32
    %80 = vector.broadcast %cst_42 : f32 to vector<1x128xf32>
    %81 = vector.extract_strided_slice %75 {offsets = [0, 0], sizes = [15, 128], strides = [1, 1]} : vector<16x128xf32> to vector<15x128xf32>
    %82 = tpu.concatenate %80, %81 in 0 : vector<1x128xf32>, vector<15x128xf32> -> vector<16x128xf32>
    %83 = vector.extract_strided_slice %75 {offsets = [1, 0], sizes = [15, 128], strides = [1, 1]} : vector<16x128xf32> to vector<15x128xf32>
    %84 = tpu.concatenate %83, %80 in 0 : vector<15x128xf32>, vector<1x128xf32> -> vector<16x128xf32>
    %85 = tpu.concatenate %82, %75, %84 in 1 : vector<16x128xf32>, vector<16x128xf32>, vector<16x128xf32> -> vector<16x384xf32>
    %86 = arith.truncf %85 : vector<16x384xf32> to vector<16x384xbf16>
    %cst_43 = arith.constant dense<0.000000e+00> : vector<16x128xf32>
    %87 = tpu.matmul %86, %77, %cst_43 {dimension_numbers = #tpu.dot_dimension_numbers<[1], [0], [0], [1], [0, 0, 1, 1], [], []>} : vector<16x384xbf16>, vector<384x128xbf16>, vector<16x128xf32> -> vector<16x128xf32>
    %88 = vector.broadcast %79 : vector<1x128xf32> to vector<16x128xf32>
    %89 = arith.addf %87, %88 : vector<16x128xf32>
    %cst_44 = arith.constant 0.000000e+00 : f32
    %90 = vector.broadcast %cst_44 : f32 to vector<16x128xf32>
    %91 = arith.cmpf oge, %89, %90 : vector<16x128xf32>
    %cst_45 = arith.constant 0.00999999977 : f32
    %92 = vector.broadcast %cst_45 : f32 to vector<16x128xf32>
    %93 = arith.mulf %92, %89 : vector<16x128xf32>
    %94 = arith.select %91, %89, %93 : vector<16x128xi1>, vector<16x128xf32>
    %c4 = arith.constant 4 : index
    %c0_46 = arith.constant 0 : index
    %c0_47 = arith.constant 0 : index
    %95 = vector.load %arg4[%c4, %c0_46, %c0_47] : memref<14x384x128xbf16, #tpu.memory_space<vmem>>, vector<1x384x128xbf16>
    %96 = vector.shape_cast %95 : vector<1x384x128xbf16> to vector<384x128xbf16>
    %c4_48 = arith.constant 4 : index
    %c0_49 = arith.constant 0 : index
    %c0_50 = arith.constant 0 : index
    %97 = vector.load %arg5[%c4_48, %c0_49, %c0_50] : memref<14x1x128xf32, #tpu.memory_space<vmem>>, vector<1x1x128xf32>
    %98 = vector.shape_cast %97 : vector<1x1x128xf32> to vector<1x128xf32>
    %cst_51 = arith.constant 0.000000e+00 : f32
    %99 = vector.broadcast %cst_51 : f32 to vector<1x128xf32>
    %100 = vector.extract_strided_slice %94 {offsets = [0, 0], sizes = [15, 128], strides = [1, 1]} : vector<16x128xf32> to vector<15x128xf32>
    %101 = tpu.concatenate %99, %100 in 0 : vector<1x128xf32>, vector<15x128xf32> -> vector<16x128xf32>
    %102 = vector.extract_strided_slice %94 {offsets = [1, 0], sizes = [15, 128], strides = [1, 1]} : vector<16x128xf32> to vector<15x128xf32>
    %103 = tpu.concatenate %102, %99 in 0 : vector<15x128xf32>, vector<1x128xf32> -> vector<16x128xf32>
    %104 = tpu.concatenate %101, %94, %103 in 1 : vector<16x128xf32>, vector<16x128xf32>, vector<16x128xf32> -> vector<16x384xf32>
    %105 = arith.truncf %104 : vector<16x384xf32> to vector<16x384xbf16>
    %cst_52 = arith.constant dense<0.000000e+00> : vector<16x128xf32>
    %106 = tpu.matmul %105, %96, %cst_52 {dimension_numbers = #tpu.dot_dimension_numbers<[1], [0], [0], [1], [0, 0, 1, 1], [], []>} : vector<16x384xbf16>, vector<384x128xbf16>, vector<16x128xf32> -> vector<16x128xf32>
    %107 = vector.broadcast %98 : vector<1x128xf32> to vector<16x128xf32>
    %108 = arith.addf %106, %107 : vector<16x128xf32>
    %cst_53 = arith.constant 0.000000e+00 : f32
    %109 = vector.broadcast %cst_53 : f32 to vector<16x128xf32>
    %110 = arith.cmpf oge, %108, %109 : vector<16x128xf32>
    %cst_54 = arith.constant 0.00999999977 : f32
    %111 = vector.broadcast %cst_54 : f32 to vector<16x128xf32>
    %112 = arith.mulf %111, %108 : vector<16x128xf32>
    %113 = arith.select %110, %108, %112 : vector<16x128xi1>, vector<16x128xf32>
    %c5 = arith.constant 5 : index
    %c0_55 = arith.constant 0 : index
    %c0_56 = arith.constant 0 : index
    %114 = vector.load %arg4[%c5, %c0_55, %c0_56] : memref<14x384x128xbf16, #tpu.memory_space<vmem>>, vector<1x384x128xbf16>
    %115 = vector.shape_cast %114 : vector<1x384x128xbf16> to vector<384x128xbf16>
    %c5_57 = arith.constant 5 : index
    %c0_58 = arith.constant 0 : index
    %c0_59 = arith.constant 0 : index
    %116 = vector.load %arg5[%c5_57, %c0_58, %c0_59] : memref<14x1x128xf32, #tpu.memory_space<vmem>>, vector<1x1x128xf32>
    %117 = vector.shape_cast %116 : vector<1x1x128xf32> to vector<1x128xf32>
    %cst_60 = arith.constant 0.000000e+00 : f32
    %118 = vector.broadcast %cst_60 : f32 to vector<1x128xf32>
    %119 = vector.extract_strided_slice %113 {offsets = [0, 0], sizes = [15, 128], strides = [1, 1]} : vector<16x128xf32> to vector<15x128xf32>
    %120 = tpu.concatenate %118, %119 in 0 : vector<1x128xf32>, vector<15x128xf32> -> vector<16x128xf32>
    %121 = vector.extract_strided_slice %113 {offsets = [1, 0], sizes = [15, 128], strides = [1, 1]} : vector<16x128xf32> to vector<15x128xf32>
    %122 = tpu.concatenate %121, %118 in 0 : vector<15x128xf32>, vector<1x128xf32> -> vector<16x128xf32>
    %123 = tpu.concatenate %120, %113, %122 in 1 : vector<16x128xf32>, vector<16x128xf32>, vector<16x128xf32> -> vector<16x384xf32>
    %124 = arith.truncf %123 : vector<16x384xf32> to vector<16x384xbf16>
    %cst_61 = arith.constant dense<0.000000e+00> : vector<16x128xf32>
    %125 = tpu.matmul %124, %115, %cst_61 {dimension_numbers = #tpu.dot_dimension_numbers<[1], [0], [0], [1], [0, 0, 1, 1], [], []>} : vector<16x384xbf16>, vector<384x128xbf16>, vector<16x128xf32> -> vector<16x128xf32>
    %126 = vector.broadcast %117 : vector<1x128xf32> to vector<16x128xf32>
    %127 = arith.addf %125, %126 : vector<16x128xf32>
    %cst_62 = arith.constant 0.000000e+00 : f32
    %128 = vector.broadcast %cst_62 : f32 to vector<16x128xf32>
    %129 = arith.cmpf oge, %127, %128 : vector<16x128xf32>
    %cst_63 = arith.constant 0.00999999977 : f32
    %130 = vector.broadcast %cst_63 : f32 to vector<16x128xf32>
    %131 = arith.mulf %130, %127 : vector<16x128xf32>
    %132 = arith.select %129, %127, %131 : vector<16x128xi1>, vector<16x128xf32>
    %c6 = arith.constant 6 : index
    %c0_64 = arith.constant 0 : index
    %c0_65 = arith.constant 0 : index
    %133 = vector.load %arg4[%c6, %c0_64, %c0_65] : memref<14x384x128xbf16, #tpu.memory_space<vmem>>, vector<1x384x128xbf16>
    %134 = vector.shape_cast %133 : vector<1x384x128xbf16> to vector<384x128xbf16>
    %c6_66 = arith.constant 6 : index
    %c0_67 = arith.constant 0 : index
    %c0_68 = arith.constant 0 : index
    %135 = vector.load %arg5[%c6_66, %c0_67, %c0_68] : memref<14x1x128xf32, #tpu.memory_space<vmem>>, vector<1x1x128xf32>
    %136 = vector.shape_cast %135 : vector<1x1x128xf32> to vector<1x128xf32>
    %cst_69 = arith.constant 0.000000e+00 : f32
    %137 = vector.broadcast %cst_69 : f32 to vector<1x128xf32>
    %138 = vector.extract_strided_slice %132 {offsets = [0, 0], sizes = [15, 128], strides = [1, 1]} : vector<16x128xf32> to vector<15x128xf32>
    %139 = tpu.concatenate %137, %138 in 0 : vector<1x128xf32>, vector<15x128xf32> -> vector<16x128xf32>
    %140 = vector.extract_strided_slice %132 {offsets = [1, 0], sizes = [15, 128], strides = [1, 1]} : vector<16x128xf32> to vector<15x128xf32>
    %141 = tpu.concatenate %140, %137 in 0 : vector<15x128xf32>, vector<1x128xf32> -> vector<16x128xf32>
    %142 = tpu.concatenate %139, %132, %141 in 1 : vector<16x128xf32>, vector<16x128xf32>, vector<16x128xf32> -> vector<16x384xf32>
    %143 = arith.truncf %142 : vector<16x384xf32> to vector<16x384xbf16>
    %cst_70 = arith.constant dense<0.000000e+00> : vector<16x128xf32>
    %144 = tpu.matmul %143, %134, %cst_70 {dimension_numbers = #tpu.dot_dimension_numbers<[1], [0], [0], [1], [0, 0, 1, 1], [], []>} : vector<16x384xbf16>, vector<384x128xbf16>, vector<16x128xf32> -> vector<16x128xf32>
    %145 = vector.broadcast %136 : vector<1x128xf32> to vector<16x128xf32>
    %146 = arith.addf %144, %145 : vector<16x128xf32>
    %cst_71 = arith.constant 0.000000e+00 : f32
    %147 = vector.broadcast %cst_71 : f32 to vector<16x128xf32>
    %148 = arith.cmpf oge, %146, %147 : vector<16x128xf32>
    %cst_72 = arith.constant 0.00999999977 : f32
    %149 = vector.broadcast %cst_72 : f32 to vector<16x128xf32>
    %150 = arith.mulf %149, %146 : vector<16x128xf32>
    %151 = arith.select %148, %146, %150 : vector<16x128xi1>, vector<16x128xf32>
    %c7 = arith.constant 7 : index
    %c0_73 = arith.constant 0 : index
    %c0_74 = arith.constant 0 : index
    %152 = vector.load %arg4[%c7, %c0_73, %c0_74] : memref<14x384x128xbf16, #tpu.memory_space<vmem>>, vector<1x384x128xbf16>
    %153 = vector.shape_cast %152 : vector<1x384x128xbf16> to vector<384x128xbf16>
    %c7_75 = arith.constant 7 : index
    %c0_76 = arith.constant 0 : index
    %c0_77 = arith.constant 0 : index
    %154 = vector.load %arg5[%c7_75, %c0_76, %c0_77] : memref<14x1x128xf32, #tpu.memory_space<vmem>>, vector<1x1x128xf32>
    %155 = vector.shape_cast %154 : vector<1x1x128xf32> to vector<1x128xf32>
    %cst_78 = arith.constant 0.000000e+00 : f32
    %156 = vector.broadcast %cst_78 : f32 to vector<1x128xf32>
    %157 = vector.extract_strided_slice %151 {offsets = [0, 0], sizes = [15, 128], strides = [1, 1]} : vector<16x128xf32> to vector<15x128xf32>
    %158 = tpu.concatenate %156, %157 in 0 : vector<1x128xf32>, vector<15x128xf32> -> vector<16x128xf32>
    %159 = vector.extract_strided_slice %151 {offsets = [1, 0], sizes = [15, 128], strides = [1, 1]} : vector<16x128xf32> to vector<15x128xf32>
    %160 = tpu.concatenate %159, %156 in 0 : vector<15x128xf32>, vector<1x128xf32> -> vector<16x128xf32>
    %161 = tpu.concatenate %158, %151, %160 in 1 : vector<16x128xf32>, vector<16x128xf32>, vector<16x128xf32> -> vector<16x384xf32>
    %162 = arith.truncf %161 : vector<16x384xf32> to vector<16x384xbf16>
    %cst_79 = arith.constant dense<0.000000e+00> : vector<16x128xf32>
    %163 = tpu.matmul %162, %153, %cst_79 {dimension_numbers = #tpu.dot_dimension_numbers<[1], [0], [0], [1], [0, 0, 1, 1], [], []>} : vector<16x384xbf16>, vector<384x128xbf16>, vector<16x128xf32> -> vector<16x128xf32>
    %164 = vector.broadcast %155 : vector<1x128xf32> to vector<16x128xf32>
    %165 = arith.addf %163, %164 : vector<16x128xf32>
    %cst_80 = arith.constant 0.000000e+00 : f32
    %166 = vector.broadcast %cst_80 : f32 to vector<16x128xf32>
    %167 = arith.cmpf oge, %165, %166 : vector<16x128xf32>
    %cst_81 = arith.constant 0.00999999977 : f32
    %168 = vector.broadcast %cst_81 : f32 to vector<16x128xf32>
    %169 = arith.mulf %168, %165 : vector<16x128xf32>
    %170 = arith.select %167, %165, %169 : vector<16x128xi1>, vector<16x128xf32>
    %171 = arith.addf %170, %132 : vector<16x128xf32>
    %c8 = arith.constant 8 : index
    %c0_82 = arith.constant 0 : index
    %c0_83 = arith.constant 0 : index
    %172 = vector.load %arg4[%c8, %c0_82, %c0_83] : memref<14x384x128xbf16, #tpu.memory_space<vmem>>, vector<1x384x128xbf16>
    %173 = vector.shape_cast %172 : vector<1x384x128xbf16> to vector<384x128xbf16>
    %c8_84 = arith.constant 8 : index
    %c0_85 = arith.constant 0 : index
    %c0_86 = arith.constant 0 : index
    %174 = vector.load %arg5[%c8_84, %c0_85, %c0_86] : memref<14x1x128xf32, #tpu.memory_space<vmem>>, vector<1x1x128xf32>
    %175 = vector.shape_cast %174 : vector<1x1x128xf32> to vector<1x128xf32>
    %cst_87 = arith.constant 0.000000e+00 : f32
    %176 = vector.broadcast %cst_87 : f32 to vector<1x128xf32>
    %177 = vector.extract_strided_slice %171 {offsets = [0, 0], sizes = [15, 128], strides = [1, 1]} : vector<16x128xf32> to vector<15x128xf32>
    %178 = tpu.concatenate %176, %177 in 0 : vector<1x128xf32>, vector<15x128xf32> -> vector<16x128xf32>
    %179 = vector.extract_strided_slice %171 {offsets = [1, 0], sizes = [15, 128], strides = [1, 1]} : vector<16x128xf32> to vector<15x128xf32>
    %180 = tpu.concatenate %179, %176 in 0 : vector<15x128xf32>, vector<1x128xf32> -> vector<16x128xf32>
    %181 = tpu.concatenate %178, %171, %180 in 1 : vector<16x128xf32>, vector<16x128xf32>, vector<16x128xf32> -> vector<16x384xf32>
    %182 = arith.truncf %181 : vector<16x384xf32> to vector<16x384xbf16>
    %cst_88 = arith.constant dense<0.000000e+00> : vector<16x128xf32>
    %183 = tpu.matmul %182, %173, %cst_88 {dimension_numbers = #tpu.dot_dimension_numbers<[1], [0], [0], [1], [0, 0, 1, 1], [], []>} : vector<16x384xbf16>, vector<384x128xbf16>, vector<16x128xf32> -> vector<16x128xf32>
    %184 = vector.broadcast %175 : vector<1x128xf32> to vector<16x128xf32>
    %185 = arith.addf %183, %184 : vector<16x128xf32>
    %cst_89 = arith.constant 0.000000e+00 : f32
    %186 = vector.broadcast %cst_89 : f32 to vector<16x128xf32>
    %187 = arith.cmpf oge, %185, %186 : vector<16x128xf32>
    %cst_90 = arith.constant 0.00999999977 : f32
    %188 = vector.broadcast %cst_90 : f32 to vector<16x128xf32>
    %189 = arith.mulf %188, %185 : vector<16x128xf32>
    %190 = arith.select %187, %185, %189 : vector<16x128xi1>, vector<16x128xf32>
    %c9 = arith.constant 9 : index
    %c0_91 = arith.constant 0 : index
    %c0_92 = arith.constant 0 : index
    %191 = vector.load %arg4[%c9, %c0_91, %c0_92] : memref<14x384x128xbf16, #tpu.memory_space<vmem>>, vector<1x384x128xbf16>
    %192 = vector.shape_cast %191 : vector<1x384x128xbf16> to vector<384x128xbf16>
    %c9_93 = arith.constant 9 : index
    %c0_94 = arith.constant 0 : index
    %c0_95 = arith.constant 0 : index
    %193 = vector.load %arg5[%c9_93, %c0_94, %c0_95] : memref<14x1x128xf32, #tpu.memory_space<vmem>>, vector<1x1x128xf32>
    %194 = vector.shape_cast %193 : vector<1x1x128xf32> to vector<1x128xf32>
    %cst_96 = arith.constant 0.000000e+00 : f32
    %195 = vector.broadcast %cst_96 : f32 to vector<1x128xf32>
    %196 = vector.extract_strided_slice %190 {offsets = [0, 0], sizes = [15, 128], strides = [1, 1]} : vector<16x128xf32> to vector<15x128xf32>
    %197 = tpu.concatenate %195, %196 in 0 : vector<1x128xf32>, vector<15x128xf32> -> vector<16x128xf32>
    %198 = vector.extract_strided_slice %190 {offsets = [1, 0], sizes = [15, 128], strides = [1, 1]} : vector<16x128xf32> to vector<15x128xf32>
    %199 = tpu.concatenate %198, %195 in 0 : vector<15x128xf32>, vector<1x128xf32> -> vector<16x128xf32>
    %200 = tpu.concatenate %197, %190, %199 in 1 : vector<16x128xf32>, vector<16x128xf32>, vector<16x128xf32> -> vector<16x384xf32>
    %201 = arith.truncf %200 : vector<16x384xf32> to vector<16x384xbf16>
    %cst_97 = arith.constant dense<0.000000e+00> : vector<16x128xf32>
    %202 = tpu.matmul %201, %192, %cst_97 {dimension_numbers = #tpu.dot_dimension_numbers<[1], [0], [0], [1], [0, 0, 1, 1], [], []>} : vector<16x384xbf16>, vector<384x128xbf16>, vector<16x128xf32> -> vector<16x128xf32>
    %203 = vector.broadcast %194 : vector<1x128xf32> to vector<16x128xf32>
    %204 = arith.addf %202, %203 : vector<16x128xf32>
    %cst_98 = arith.constant 0.000000e+00 : f32
    %205 = vector.broadcast %cst_98 : f32 to vector<16x128xf32>
    %206 = arith.cmpf oge, %204, %205 : vector<16x128xf32>
    %cst_99 = arith.constant 0.00999999977 : f32
    %207 = vector.broadcast %cst_99 : f32 to vector<16x128xf32>
    %208 = arith.mulf %207, %204 : vector<16x128xf32>
    %209 = arith.select %206, %204, %208 : vector<16x128xi1>, vector<16x128xf32>
    %210 = arith.addf %209, %94 : vector<16x128xf32>
    %c10 = arith.constant 10 : index
    %c0_100 = arith.constant 0 : index
    %c0_101 = arith.constant 0 : index
    %211 = vector.load %arg4[%c10, %c0_100, %c0_101] : memref<14x384x128xbf16, #tpu.memory_space<vmem>>, vector<1x384x128xbf16>
    %212 = vector.shape_cast %211 : vector<1x384x128xbf16> to vector<384x128xbf16>
    %c10_102 = arith.constant 10 : index
    %c0_103 = arith.constant 0 : index
    %c0_104 = arith.constant 0 : index
    %213 = vector.load %arg5[%c10_102, %c0_103, %c0_104] : memref<14x1x128xf32, #tpu.memory_space<vmem>>, vector<1x1x128xf32>
    %214 = vector.shape_cast %213 : vector<1x1x128xf32> to vector<1x128xf32>
    %cst_105 = arith.constant 0.000000e+00 : f32
    %215 = vector.broadcast %cst_105 : f32 to vector<1x128xf32>
    %216 = vector.extract_strided_slice %210 {offsets = [0, 0], sizes = [15, 128], strides = [1, 1]} : vector<16x128xf32> to vector<15x128xf32>
    %217 = tpu.concatenate %215, %216 in 0 : vector<1x128xf32>, vector<15x128xf32> -> vector<16x128xf32>
    %218 = vector.extract_strided_slice %210 {offsets = [1, 0], sizes = [15, 128], strides = [1, 1]} : vector<16x128xf32> to vector<15x128xf32>
    %219 = tpu.concatenate %218, %215 in 0 : vector<15x128xf32>, vector<1x128xf32> -> vector<16x128xf32>
    %220 = tpu.concatenate %217, %210, %219 in 1 : vector<16x128xf32>, vector<16x128xf32>, vector<16x128xf32> -> vector<16x384xf32>
    %221 = arith.truncf %220 : vector<16x384xf32> to vector<16x384xbf16>
    %cst_106 = arith.constant dense<0.000000e+00> : vector<16x128xf32>
    %222 = tpu.matmul %221, %212, %cst_106 {dimension_numbers = #tpu.dot_dimension_numbers<[1], [0], [0], [1], [0, 0, 1, 1], [], []>} : vector<16x384xbf16>, vector<384x128xbf16>, vector<16x128xf32> -> vector<16x128xf32>
    %223 = vector.broadcast %214 : vector<1x128xf32> to vector<16x128xf32>
    %224 = arith.addf %222, %223 : vector<16x128xf32>
    %cst_107 = arith.constant 0.000000e+00 : f32
    %225 = vector.broadcast %cst_107 : f32 to vector<16x128xf32>
    %226 = arith.cmpf oge, %224, %225 : vector<16x128xf32>
    %cst_108 = arith.constant 0.00999999977 : f32
    %227 = vector.broadcast %cst_108 : f32 to vector<16x128xf32>
    %228 = arith.mulf %227, %224 : vector<16x128xf32>
    %229 = arith.select %226, %224, %228 : vector<16x128xi1>, vector<16x128xf32>
    %c11 = arith.constant 11 : index
    %c0_109 = arith.constant 0 : index
    %c0_110 = arith.constant 0 : index
    %230 = vector.load %arg4[%c11, %c0_109, %c0_110] : memref<14x384x128xbf16, #tpu.memory_space<vmem>>, vector<1x384x128xbf16>
    %231 = vector.shape_cast %230 : vector<1x384x128xbf16> to vector<384x128xbf16>
    %c11_111 = arith.constant 11 : index
    %c0_112 = arith.constant 0 : index
    %c0_113 = arith.constant 0 : index
    %232 = vector.load %arg5[%c11_111, %c0_112, %c0_113] : memref<14x1x128xf32, #tpu.memory_space<vmem>>, vector<1x1x128xf32>
    %233 = vector.shape_cast %232 : vector<1x1x128xf32> to vector<1x128xf32>
    %cst_114 = arith.constant 0.000000e+00 : f32
    %234 = vector.broadcast %cst_114 : f32 to vector<1x128xf32>
    %235 = vector.extract_strided_slice %229 {offsets = [0, 0], sizes = [15, 128], strides = [1, 1]} : vector<16x128xf32> to vector<15x128xf32>
    %236 = tpu.concatenate %234, %235 in 0 : vector<1x128xf32>, vector<15x128xf32> -> vector<16x128xf32>
    %237 = vector.extract_strided_slice %229 {offsets = [1, 0], sizes = [15, 128], strides = [1, 1]} : vector<16x128xf32> to vector<15x128xf32>
    %238 = tpu.concatenate %237, %234 in 0 : vector<15x128xf32>, vector<1x128xf32> -> vector<16x128xf32>
    %239 = tpu.concatenate %236, %229, %238 in 1 : vector<16x128xf32>, vector<16x128xf32>, vector<16x128xf32> -> vector<16x384xf32>
    %240 = arith.truncf %239 : vector<16x384xf32> to vector<16x384xbf16>
    %cst_115 = arith.constant dense<0.000000e+00> : vector<16x128xf32>
    %241 = tpu.matmul %240, %231, %cst_115 {dimension_numbers = #tpu.dot_dimension_numbers<[1], [0], [0], [1], [0, 0, 1, 1], [], []>} : vector<16x384xbf16>, vector<384x128xbf16>, vector<16x128xf32> -> vector<16x128xf32>
    %242 = vector.broadcast %233 : vector<1x128xf32> to vector<16x128xf32>
    %243 = arith.addf %241, %242 : vector<16x128xf32>
    %cst_116 = arith.constant 0.000000e+00 : f32
    %244 = vector.broadcast %cst_116 : f32 to vector<16x128xf32>
    %245 = arith.cmpf oge, %243, %244 : vector<16x128xf32>
    %cst_117 = arith.constant 0.00999999977 : f32
    %246 = vector.broadcast %cst_117 : f32 to vector<16x128xf32>
    %247 = arith.mulf %246, %243 : vector<16x128xf32>
    %248 = arith.select %245, %243, %247 : vector<16x128xi1>, vector<16x128xf32>
    %249 = arith.addf %248, %56 : vector<16x128xf32>
    %c12 = arith.constant 12 : index
    %c0_118 = arith.constant 0 : index
    %c0_119 = arith.constant 0 : index
    %250 = vector.load %arg4[%c12, %c0_118, %c0_119] : memref<14x384x128xbf16, #tpu.memory_space<vmem>>, vector<1x384x128xbf16>
    %251 = vector.shape_cast %250 : vector<1x384x128xbf16> to vector<384x128xbf16>
    %c12_120 = arith.constant 12 : index
    %c0_121 = arith.constant 0 : index
    %c0_122 = arith.constant 0 : index
    %252 = vector.load %arg5[%c12_120, %c0_121, %c0_122] : memref<14x1x128xf32, #tpu.memory_space<vmem>>, vector<1x1x128xf32>
    %253 = vector.shape_cast %252 : vector<1x1x128xf32> to vector<1x128xf32>
    %cst_123 = arith.constant 0.000000e+00 : f32
    %254 = vector.broadcast %cst_123 : f32 to vector<1x128xf32>
    %255 = vector.extract_strided_slice %249 {offsets = [0, 0], sizes = [15, 128], strides = [1, 1]} : vector<16x128xf32> to vector<15x128xf32>
    %256 = tpu.concatenate %254, %255 in 0 : vector<1x128xf32>, vector<15x128xf32> -> vector<16x128xf32>
    %257 = vector.extract_strided_slice %249 {offsets = [1, 0], sizes = [15, 128], strides = [1, 1]} : vector<16x128xf32> to vector<15x128xf32>
    %258 = tpu.concatenate %257, %254 in 0 : vector<15x128xf32>, vector<1x128xf32> -> vector<16x128xf32>
    %259 = tpu.concatenate %256, %249, %258 in 1 : vector<16x128xf32>, vector<16x128xf32>, vector<16x128xf32> -> vector<16x384xf32>
    %260 = arith.truncf %259 : vector<16x384xf32> to vector<16x384xbf16>
    %cst_124 = arith.constant dense<0.000000e+00> : vector<16x128xf32>
    %261 = tpu.matmul %260, %251, %cst_124 {dimension_numbers = #tpu.dot_dimension_numbers<[1], [0], [0], [1], [0, 0, 1, 1], [], []>} : vector<16x384xbf16>, vector<384x128xbf16>, vector<16x128xf32> -> vector<16x128xf32>
    %262 = vector.broadcast %253 : vector<1x128xf32> to vector<16x128xf32>
    %263 = arith.addf %261, %262 : vector<16x128xf32>
    %cst_125 = arith.constant 0.000000e+00 : f32
    %264 = vector.broadcast %cst_125 : f32 to vector<16x128xf32>
    %265 = arith.cmpf oge, %263, %264 : vector<16x128xf32>
    %cst_126 = arith.constant 0.00999999977 : f32
    %266 = vector.broadcast %cst_126 : f32 to vector<16x128xf32>
    %267 = arith.mulf %266, %263 : vector<16x128xf32>
    %268 = arith.select %265, %263, %267 : vector<16x128xi1>, vector<16x128xf32>
    %c13 = arith.constant 13 : index
    %c0_127 = arith.constant 0 : index
    %c0_128 = arith.constant 0 : index
    %269 = vector.load %arg4[%c13, %c0_127, %c0_128] : memref<14x384x128xbf16, #tpu.memory_space<vmem>>, vector<1x384x128xbf16>
    %270 = vector.shape_cast %269 : vector<1x384x128xbf16> to vector<384x128xbf16>
    %c13_129 = arith.constant 13 : index
    %c0_130 = arith.constant 0 : index
    %c0_131 = arith.constant 0 : index
    %271 = vector.load %arg5[%c13_129, %c0_130, %c0_131] : memref<14x1x128xf32, #tpu.memory_space<vmem>>, vector<1x1x128xf32>
    %272 = vector.shape_cast %271 : vector<1x1x128xf32> to vector<1x128xf32>
    %cst_132 = arith.constant 0.000000e+00 : f32
    %273 = vector.broadcast %cst_132 : f32 to vector<1x128xf32>
    %274 = vector.extract_strided_slice %268 {offsets = [0, 0], sizes = [15, 128], strides = [1, 1]} : vector<16x128xf32> to vector<15x128xf32>
    %275 = tpu.concatenate %273, %274 in 0 : vector<1x128xf32>, vector<15x128xf32> -> vector<16x128xf32>
    %276 = vector.extract_strided_slice %268 {offsets = [1, 0], sizes = [15, 128], strides = [1, 1]} : vector<16x128xf32> to vector<15x128xf32>
    %277 = tpu.concatenate %276, %273 in 0 : vector<15x128xf32>, vector<1x128xf32> -> vector<16x128xf32>
    %278 = tpu.concatenate %275, %268, %277 in 1 : vector<16x128xf32>, vector<16x128xf32>, vector<16x128xf32> -> vector<16x384xf32>
    %279 = arith.truncf %278 : vector<16x384xf32> to vector<16x384xbf16>
    %cst_133 = arith.constant dense<0.000000e+00> : vector<16x128xf32>
    %280 = tpu.matmul %279, %270, %cst_133 {dimension_numbers = #tpu.dot_dimension_numbers<[1], [0], [0], [1], [0, 0, 1, 1], [], []>} : vector<16x384xbf16>, vector<384x128xbf16>, vector<16x128xf32> -> vector<16x128xf32>
    %281 = vector.broadcast %272 : vector<1x128xf32> to vector<16x128xf32>
    %282 = arith.addf %280, %281 : vector<16x128xf32>
    %cst_134 = arith.constant 0.000000e+00 : f32
    %283 = vector.broadcast %cst_134 : f32 to vector<16x128xf32>
    %284 = arith.cmpf oge, %282, %283 : vector<16x128xf32>
    %cst_135 = arith.constant 0.00999999977 : f32
    %285 = vector.broadcast %cst_135 : f32 to vector<16x128xf32>
    %286 = arith.mulf %285, %282 : vector<16x128xf32>
    %287 = arith.select %284, %282, %286 : vector<16x128xi1>, vector<16x128xf32>
    %288 = arith.addf %287, %18 : vector<16x128xf32>
    %c0_136 = arith.constant 0 : index
    %c0_137 = arith.constant 0 : index
    %289 = vector.load %arg6[%c0_136, %c0_137] : memref<384x16xbf16, #tpu.memory_space<vmem>>, vector<384x16xbf16>
    %c0_138 = arith.constant 0 : index
    %c0_139 = arith.constant 0 : index
    %290 = vector.load %arg7[%c0_138, %c0_139] : memref<1x16xf32, #tpu.memory_space<vmem>>, vector<1x16xf32>
    %cst_140 = arith.constant 0.000000e+00 : f32
    %291 = vector.broadcast %cst_140 : f32 to vector<1x128xf32>
    %292 = vector.extract_strided_slice %288 {offsets = [0, 0], sizes = [15, 128], strides = [1, 1]} : vector<16x128xf32> to vector<15x128xf32>
    %293 = tpu.concatenate %291, %292 in 0 : vector<1x128xf32>, vector<15x128xf32> -> vector<16x128xf32>
    %294 = vector.extract_strided_slice %288 {offsets = [1, 0], sizes = [15, 128], strides = [1, 1]} : vector<16x128xf32> to vector<15x128xf32>
    %295 = tpu.concatenate %294, %291 in 0 : vector<15x128xf32>, vector<1x128xf32> -> vector<16x128xf32>
    %296 = tpu.concatenate %293, %288, %295 in 1 : vector<16x128xf32>, vector<16x128xf32>, vector<16x128xf32> -> vector<16x384xf32>
    %297 = arith.truncf %296 : vector<16x384xf32> to vector<16x384xbf16>
    %cst_141 = arith.constant dense<0.000000e+00> : vector<16x16xf32>
    %298 = tpu.matmul %297, %289, %cst_141 {dimension_numbers = #tpu.dot_dimension_numbers<[1], [0], [0], [1], [0, 0, 1, 1], [], []>} : vector<16x384xbf16>, vector<384x16xbf16>, vector<16x16xf32> -> vector<16x16xf32>
    %299 = vector.broadcast %290 : vector<1x16xf32> to vector<16x16xf32>
    %300 = arith.addf %298, %299 : vector<16x16xf32>
    %cst_142 = arith.constant 0.000000e+00 : f32
    %301 = vector.broadcast %cst_142 : f32 to vector<16x16xf32>
    %302 = arith.cmpf oge, %300, %301 : vector<16x16xf32>
    %cst_143 = arith.constant 0.00999999977 : f32
    %303 = vector.broadcast %cst_143 : f32 to vector<16x16xf32>
    %304 = arith.mulf %303, %300 : vector<16x16xf32>
    %305 = arith.select %302, %300, %304 : vector<16x16xi1>, vector<16x16xf32>
    %c0_144 = arith.constant 0 : index
    %c0_145 = arith.constant 0 : index
    %306 = vector.load %arg9[%c0_144, %c0_145] : memref<1x256xf32, #tpu.memory_space<vmem>>, vector<1x256xf32>
    %307 = vector.extract_strided_slice %305 {offsets = [0, 0], sizes = [1, 16], strides = [1, 1]} : vector<16x16xf32> to vector<1x16xf32>
    %308 = arith.truncf %307 : vector<1x16xf32> to vector<1x16xbf16>
    %c0_146 = arith.constant 0 : index
    %c0_147 = arith.constant 0 : index
    %309 = vector.load %arg8[%c0_146, %c0_147] : memref<256x256xbf16, #tpu.memory_space<vmem>>, vector<16x256xbf16>
    %cst_148 = arith.constant dense<0.000000e+00> : vector<1x256xf32>
    %310 = tpu.matmul %308, %309, %cst_148 {dimension_numbers = #tpu.dot_dimension_numbers<[1], [0], [0], [1], [0, 0, 1, 1], [], []>} : vector<1x16xbf16>, vector<16x256xbf16>, vector<1x256xf32> -> vector<1x256xf32>
    %311 = arith.addf %306, %310 : vector<1x256xf32>
    %312 = vector.extract_strided_slice %305 {offsets = [1, 0], sizes = [1, 16], strides = [1, 1]} : vector<16x16xf32> to vector<1x16xf32>
    %313 = arith.truncf %312 : vector<1x16xf32> to vector<1x16xbf16>
    %c16 = arith.constant 16 : index
    %c0_149 = arith.constant 0 : index
    %314 = vector.load %arg8[%c16, %c0_149] : memref<256x256xbf16, #tpu.memory_space<vmem>>, vector<16x256xbf16>
    %cst_150 = arith.constant dense<0.000000e+00> : vector<1x256xf32>
    %315 = tpu.matmul %313, %314, %cst_150 {dimension_numbers = #tpu.dot_dimension_numbers<[1], [0], [0], [1], [0, 0, 1, 1], [], []>} : vector<1x16xbf16>, vector<16x256xbf16>, vector<1x256xf32> -> vector<1x256xf32>
    %316 = arith.addf %311, %315 : vector<1x256xf32>
    %317 = vector.extract_strided_slice %305 {offsets = [2, 0], sizes = [1, 16], strides = [1, 1]} : vector<16x16xf32> to vector<1x16xf32>
    %318 = arith.truncf %317 : vector<1x16xf32> to vector<1x16xbf16>
    %c32 = arith.constant 32 : index
    %c0_151 = arith.constant 0 : index
    %319 = vector.load %arg8[%c32, %c0_151] : memref<256x256xbf16, #tpu.memory_space<vmem>>, vector<16x256xbf16>
    %cst_152 = arith.constant dense<0.000000e+00> : vector<1x256xf32>
    %320 = tpu.matmul %318, %319, %cst_152 {dimension_numbers = #tpu.dot_dimension_numbers<[1], [0], [0], [1], [0, 0, 1, 1], [], []>} : vector<1x16xbf16>, vector<16x256xbf16>, vector<1x256xf32> -> vector<1x256xf32>
    %321 = arith.addf %316, %320 : vector<1x256xf32>
    %322 = vector.extract_strided_slice %305 {offsets = [3, 0], sizes = [1, 16], strides = [1, 1]} : vector<16x16xf32> to vector<1x16xf32>
    %323 = arith.truncf %322 : vector<1x16xf32> to vector<1x16xbf16>
    %c48 = arith.constant 48 : index
    %c0_153 = arith.constant 0 : index
    %324 = vector.load %arg8[%c48, %c0_153] : memref<256x256xbf16, #tpu.memory_space<vmem>>, vector<16x256xbf16>
    %cst_154 = arith.constant dense<0.000000e+00> : vector<1x256xf32>
    %325 = tpu.matmul %323, %324, %cst_154 {dimension_numbers = #tpu.dot_dimension_numbers<[1], [0], [0], [1], [0, 0, 1, 1], [], []>} : vector<1x16xbf16>, vector<16x256xbf16>, vector<1x256xf32> -> vector<1x256xf32>
    %326 = arith.addf %321, %325 : vector<1x256xf32>
    %327 = vector.extract_strided_slice %305 {offsets = [4, 0], sizes = [1, 16], strides = [1, 1]} : vector<16x16xf32> to vector<1x16xf32>
    %328 = arith.truncf %327 : vector<1x16xf32> to vector<1x16xbf16>
    %c64 = arith.constant 64 : index
    %c0_155 = arith.constant 0 : index
    %329 = vector.load %arg8[%c64, %c0_155] : memref<256x256xbf16, #tpu.memory_space<vmem>>, vector<16x256xbf16>
    %cst_156 = arith.constant dense<0.000000e+00> : vector<1x256xf32>
    %330 = tpu.matmul %328, %329, %cst_156 {dimension_numbers = #tpu.dot_dimension_numbers<[1], [0], [0], [1], [0, 0, 1, 1], [], []>} : vector<1x16xbf16>, vector<16x256xbf16>, vector<1x256xf32> -> vector<1x256xf32>
    %331 = arith.addf %326, %330 : vector<1x256xf32>
    %332 = vector.extract_strided_slice %305 {offsets = [5, 0], sizes = [1, 16], strides = [1, 1]} : vector<16x16xf32> to vector<1x16xf32>
    %333 = arith.truncf %332 : vector<1x16xf32> to vector<1x16xbf16>
    %c80 = arith.constant 80 : index
    %c0_157 = arith.constant 0 : index
    %334 = vector.load %arg8[%c80, %c0_157] : memref<256x256xbf16, #tpu.memory_space<vmem>>, vector<16x256xbf16>
    %cst_158 = arith.constant dense<0.000000e+00> : vector<1x256xf32>
    %335 = tpu.matmul %333, %334, %cst_158 {dimension_numbers = #tpu.dot_dimension_numbers<[1], [0], [0], [1], [0, 0, 1, 1], [], []>} : vector<1x16xbf16>, vector<16x256xbf16>, vector<1x256xf32> -> vector<1x256xf32>
    %336 = arith.addf %331, %335 : vector<1x256xf32>
    %337 = vector.extract_strided_slice %305 {offsets = [6, 0], sizes = [1, 16], strides = [1, 1]} : vector<16x16xf32> to vector<1x16xf32>
    %338 = arith.truncf %337 : vector<1x16xf32> to vector<1x16xbf16>
    %c96 = arith.constant 96 : index
    %c0_159 = arith.constant 0 : index
    %339 = vector.load %arg8[%c96, %c0_159] : memref<256x256xbf16, #tpu.memory_space<vmem>>, vector<16x256xbf16>
    %cst_160 = arith.constant dense<0.000000e+00> : vector<1x256xf32>
    %340 = tpu.matmul %338, %339, %cst_160 {dimension_numbers = #tpu.dot_dimension_numbers<[1], [0], [0], [1], [0, 0, 1, 1], [], []>} : vector<1x16xbf16>, vector<16x256xbf16>, vector<1x256xf32> -> vector<1x256xf32>
    %341 = arith.addf %336, %340 : vector<1x256xf32>
    %342 = vector.extract_strided_slice %305 {offsets = [7, 0], sizes = [1, 16], strides = [1, 1]} : vector<16x16xf32> to vector<1x16xf32>
    %343 = arith.truncf %342 : vector<1x16xf32> to vector<1x16xbf16>
    %c112 = arith.constant 112 : index
    %c0_161 = arith.constant 0 : index
    %344 = vector.load %arg8[%c112, %c0_161] : memref<256x256xbf16, #tpu.memory_space<vmem>>, vector<16x256xbf16>
    %cst_162 = arith.constant dense<0.000000e+00> : vector<1x256xf32>
    %345 = tpu.matmul %343, %344, %cst_162 {dimension_numbers = #tpu.dot_dimension_numbers<[1], [0], [0], [1], [0, 0, 1, 1], [], []>} : vector<1x16xbf16>, vector<16x256xbf16>, vector<1x256xf32> -> vector<1x256xf32>
    %346 = arith.addf %341, %345 : vector<1x256xf32>
    %347 = vector.extract_strided_slice %305 {offsets = [8, 0], sizes = [1, 16], strides = [1, 1]} : vector<16x16xf32> to vector<1x16xf32>
    %348 = arith.truncf %347 : vector<1x16xf32> to vector<1x16xbf16>
    %c128 = arith.constant 128 : index
    %c0_163 = arith.constant 0 : index
    %349 = vector.load %arg8[%c128, %c0_163] : memref<256x256xbf16, #tpu.memory_space<vmem>>, vector<16x256xbf16>
    %cst_164 = arith.constant dense<0.000000e+00> : vector<1x256xf32>
    %350 = tpu.matmul %348, %349, %cst_164 {dimension_numbers = #tpu.dot_dimension_numbers<[1], [0], [0], [1], [0, 0, 1, 1], [], []>} : vector<1x16xbf16>, vector<16x256xbf16>, vector<1x256xf32> -> vector<1x256xf32>
    %351 = arith.addf %346, %350 : vector<1x256xf32>
    %352 = vector.extract_strided_slice %305 {offsets = [9, 0], sizes = [1, 16], strides = [1, 1]} : vector<16x16xf32> to vector<1x16xf32>
    %353 = arith.truncf %352 : vector<1x16xf32> to vector<1x16xbf16>
    %c144 = arith.constant 144 : index
    %c0_165 = arith.constant 0 : index
    %354 = vector.load %arg8[%c144, %c0_165] : memref<256x256xbf16, #tpu.memory_space<vmem>>, vector<16x256xbf16>
    %cst_166 = arith.constant dense<0.000000e+00> : vector<1x256xf32>
    %355 = tpu.matmul %353, %354, %cst_166 {dimension_numbers = #tpu.dot_dimension_numbers<[1], [0], [0], [1], [0, 0, 1, 1], [], []>} : vector<1x16xbf16>, vector<16x256xbf16>, vector<1x256xf32> -> vector<1x256xf32>
    %356 = arith.addf %351, %355 : vector<1x256xf32>
    %357 = vector.extract_strided_slice %305 {offsets = [10, 0], sizes = [1, 16], strides = [1, 1]} : vector<16x16xf32> to vector<1x16xf32>
    %358 = arith.truncf %357 : vector<1x16xf32> to vector<1x16xbf16>
    %c160 = arith.constant 160 : index
    %c0_167 = arith.constant 0 : index
    %359 = vector.load %arg8[%c160, %c0_167] : memref<256x256xbf16, #tpu.memory_space<vmem>>, vector<16x256xbf16>
    %cst_168 = arith.constant dense<0.000000e+00> : vector<1x256xf32>
    %360 = tpu.matmul %358, %359, %cst_168 {dimension_numbers = #tpu.dot_dimension_numbers<[1], [0], [0], [1], [0, 0, 1, 1], [], []>} : vector<1x16xbf16>, vector<16x256xbf16>, vector<1x256xf32> -> vector<1x256xf32>
    %361 = arith.addf %356, %360 : vector<1x256xf32>
    %362 = vector.extract_strided_slice %305 {offsets = [11, 0], sizes = [1, 16], strides = [1, 1]} : vector<16x16xf32> to vector<1x16xf32>
    %363 = arith.truncf %362 : vector<1x16xf32> to vector<1x16xbf16>
    %c176 = arith.constant 176 : index
    %c0_169 = arith.constant 0 : index
    %364 = vector.load %arg8[%c176, %c0_169] : memref<256x256xbf16, #tpu.memory_space<vmem>>, vector<16x256xbf16>
    %cst_170 = arith.constant dense<0.000000e+00> : vector<1x256xf32>
    %365 = tpu.matmul %363, %364, %cst_170 {dimension_numbers = #tpu.dot_dimension_numbers<[1], [0], [0], [1], [0, 0, 1, 1], [], []>} : vector<1x16xbf16>, vector<16x256xbf16>, vector<1x256xf32> -> vector<1x256xf32>
    %366 = arith.addf %361, %365 : vector<1x256xf32>
    %367 = vector.extract_strided_slice %305 {offsets = [12, 0], sizes = [1, 16], strides = [1, 1]} : vector<16x16xf32> to vector<1x16xf32>
    %368 = arith.truncf %367 : vector<1x16xf32> to vector<1x16xbf16>
    %c192 = arith.constant 192 : index
    %c0_171 = arith.constant 0 : index
    %369 = vector.load %arg8[%c192, %c0_171] : memref<256x256xbf16, #tpu.memory_space<vmem>>, vector<16x256xbf16>
    %cst_172 = arith.constant dense<0.000000e+00> : vector<1x256xf32>
    %370 = tpu.matmul %368, %369, %cst_172 {dimension_numbers = #tpu.dot_dimension_numbers<[1], [0], [0], [1], [0, 0, 1, 1], [], []>} : vector<1x16xbf16>, vector<16x256xbf16>, vector<1x256xf32> -> vector<1x256xf32>
    %371 = arith.addf %366, %370 : vector<1x256xf32>
    %372 = vector.extract_strided_slice %305 {offsets = [13, 0], sizes = [1, 16], strides = [1, 1]} : vector<16x16xf32> to vector<1x16xf32>
    %373 = arith.truncf %372 : vector<1x16xf32> to vector<1x16xbf16>
    %c208 = arith.constant 208 : index
    %c0_173 = arith.constant 0 : index
    %374 = vector.load %arg8[%c208, %c0_173] : memref<256x256xbf16, #tpu.memory_space<vmem>>, vector<16x256xbf16>
    %cst_174 = arith.constant dense<0.000000e+00> : vector<1x256xf32>
    %375 = tpu.matmul %373, %374, %cst_174 {dimension_numbers = #tpu.dot_dimension_numbers<[1], [0], [0], [1], [0, 0, 1, 1], [], []>} : vector<1x16xbf16>, vector<16x256xbf16>, vector<1x256xf32> -> vector<1x256xf32>
    %376 = arith.addf %371, %375 : vector<1x256xf32>
    %377 = vector.extract_strided_slice %305 {offsets = [14, 0], sizes = [1, 16], strides = [1, 1]} : vector<16x16xf32> to vector<1x16xf32>
    %378 = arith.truncf %377 : vector<1x16xf32> to vector<1x16xbf16>
    %c224 = arith.constant 224 : index
    %c0_175 = arith.constant 0 : index
    %379 = vector.load %arg8[%c224, %c0_175] : memref<256x256xbf16, #tpu.memory_space<vmem>>, vector<16x256xbf16>
    %cst_176 = arith.constant dense<0.000000e+00> : vector<1x256xf32>
    %380 = tpu.matmul %378, %379, %cst_176 {dimension_numbers = #tpu.dot_dimension_numbers<[1], [0], [0], [1], [0, 0, 1, 1], [], []>} : vector<1x16xbf16>, vector<16x256xbf16>, vector<1x256xf32> -> vector<1x256xf32>
    %381 = arith.addf %376, %380 : vector<1x256xf32>
    %382 = vector.extract_strided_slice %305 {offsets = [15, 0], sizes = [1, 16], strides = [1, 1]} : vector<16x16xf32> to vector<1x16xf32>
    %383 = arith.truncf %382 : vector<1x16xf32> to vector<1x16xbf16>
    %c240 = arith.constant 240 : index
    %c0_177 = arith.constant 0 : index
    %384 = vector.load %arg8[%c240, %c0_177] : memref<256x256xbf16, #tpu.memory_space<vmem>>, vector<16x256xbf16>
    %cst_178 = arith.constant dense<0.000000e+00> : vector<1x256xf32>
    %385 = tpu.matmul %383, %384, %cst_178 {dimension_numbers = #tpu.dot_dimension_numbers<[1], [0], [0], [1], [0, 0, 1, 1], [], []>} : vector<1x16xbf16>, vector<16x256xbf16>, vector<1x256xf32> -> vector<1x256xf32>
    %386 = arith.addf %381, %385 : vector<1x256xf32>
    %c0_179 = arith.constant 0 : index
    %c0_180 = arith.constant 0 : index
    %c0_181 = arith.constant 0 : index
    %387 = vector.load %arg10[%c0_179, %c0_180, %c0_181] : memref<1x1x256xf32, #tpu.memory_space<vmem>>, vector<1x1x256xf32>
    %388 = vector.shape_cast %387 : vector<1x1x256xf32> to vector<1x256xf32>
    %389 = vector.shape_cast %386 : vector<1x256xf32> to vector<1x1x256xf32>
    tpu.vector_store %arg10[%c0_179, %c0_180, %c0_181], %389 {strides = array<i32>} : memref<1x1x256xf32, #tpu.memory_space<vmem>>, vector<1x1x256xf32>,
    return
  }
  func.func @transform_0(%arg0: i32) -> (i32, i32, i32) {
    %c0_i32 = arith.constant 0 : i32
    %c0_i32_0 = arith.constant 0 : i32
    %c0_i32_1 = arith.constant 0 : i32
    return %arg0, %c0_i32, %c0_i32_0 : i32, i32, i32
  }
  func.func @transform_1(%arg0: i32) -> (i32, i32) {
    %c0_i32 = arith.constant 0 : i32
    %c0_i32_0 = arith.constant 0 : i32
    %c0_i32_1 = arith.constant 0 : i32
    return %c0_i32, %c0_i32_0 : i32, i32
  }
  func.func @transform_2(%arg0: i32) -> (i32, i32) {
    %c0_i32 = arith.constant 0 : i32
    %c0_i32_0 = arith.constant 0 : i32
    %c0_i32_1 = arith.constant 0 : i32
    return %c0_i32, %c0_i32_0 : i32, i32
  }
  func.func @transform_3(%arg0: i32) -> (i32, i32, i32) {
    %c0_i32 = arith.constant 0 : i32
    %c0_i32_0 = arith.constant 0 : i32
    %c0_i32_1 = arith.constant 0 : i32
    %c0_i32_2 = arith.constant 0 : i32
    return %c0_i32, %c0_i32_0, %c0_i32_1 : i32, i32, i32
  }
  func.func @transform_4(%arg0: i32) -> (i32, i32, i32) {
    %c0_i32 = arith.constant 0 : i32
    %c0_i32_0 = arith.constant 0 : i32
    %c0_i32_1 = arith.constant 0 : i32
    %c0_i32_2 = arith.constant 0 : i32
    return %c0_i32, %c0_i32_0, %c0_i32_1 : i32, i32, i32
  }
  func.func @transform_5(%arg0: i32) -> (i32, i32) {
    %c0_i32 = arith.constant 0 : i32
    %c0_i32_0 = arith.constant 0 : i32
    %c0_i32_1 = arith.constant 0 : i32
    return %c0_i32, %c0_i32_0 : i32, i32
  }
  func.func @transform_6(%arg0: i32) -> (i32, i32) {
    %c0_i32 = arith.constant 0 : i32
    %c0_i32_0 = arith.constant 0 : i32
    %c0_i32_1 = arith.constant 0 : i32
    return %c0_i32, %c0_i32_0 : i32, i32
  }
  func.func @transform_7(%arg0: i32) -> (i32, i32) {
    %c0_i32 = arith.constant 0 : i32
    %c0_i32_0 = arith.constant 0 : i32
    %c0_i32_1 = arith.constant 0 : i32
    return %c0_i32, %c0_i32_0 : i32, i32
  }
  func.func @transform_8(%arg0: i32) -> (i32, i32) {
    %c0_i32 = arith.constant 0 : i32
    %c0_i32_0 = arith.constant 0 : i32
    %c0_i32_1 = arith.constant 0 : i32
    return %c0_i32, %c0_i32_0 : i32, i32
  }
  func.func @transform_9(%arg0: i32) -> (i32, i32, i32) {
    %c0_i32 = arith.constant 0 : i32
    %c0_i32_0 = arith.constant 0 : i32
    %c0_i32_1 = arith.constant 0 : i32
    return %arg0, %c0_i32, %c0_i32_0 : i32, i32, i32
  }
}

</mosaic_0001>

<bundles_post_ra>
// kernel: noise_matrix_predictor_v2.1
= control target key start
LH: loop header
LB: loop body
LE: loop exit
PB: predicated region body
PF: predicated region fallthrough
CT: control target
= control target key end

     0   :  { %14 = vsyncpa [#allocation3], 0  ;;  %s8433_s0 = inlined_call_operand.vmem [shape: f32[2,16,64], index: 0, kind: input, shape index: {}]   ;;  %s8434_s1 = inlined_call_operand.hbm [shape: bf16[192,128], index: 1, kind: input, shape index: {}]   ;;  %s8435_s2 = inlined_call_operand.hbm [shape: f32[1,128], index: 2, kind: input, shape index: {}]   ;;  %s8436_s3 = inlined_call_operand.hbm [shape: bf16[14,384,128], index: 3, kind: input, shape index: {}]   ;;  %s8437_s4 = inlined_call_operand.hbm [shape: f32[14,1,128], index: 4, kind: input, shape index: {}]   ;;  %s8438_s5 = inlined_call_operand.vmem [shape: bf16[384,16], index: 5, kind: input, shape index: {}]   ;;  %s8439_s6 = inlined_call_operand.hbm [shape: f32[1,16], index: 6, kind: input, shape index: {}]   ;;  %s8440_s7 = inlined_call_operand.hbm [shape: bf16[256,256], index: 7, kind: input, shape index: {}]   ;;  %s8441_s8 = inlined_call_operand.hbm [shape: f32[1,256], index: 8, kind: input, shape index: {}]   ;;  %s8442_s9 = inlined_call_operand.vmem [shape: f32[2,1,256], index: 9, kind: output, shape index: {}]  }
   0x1   :  { %15 = vsyncpa [#allocation5], 0 }
   0x2   :  { %16 = vsyncpa [#allocation8], 0 }
   0x3   :  { %17 = vsyncpa [#allocation11], 0  ;;  %s8048_s30 = smov 0  }
   0x4 LB: > { %s274_s12 = sshll.u32 %s8435_s2, 4  ;;  %s8057_s13 = sadd.s32 4294967295, %s7981_s30   ;;  %s7981_s30 = sphi %s8048_s30, %s23_s30   ;;  %s275_s12 = int_to_ptr.hbm [resolvable:$true] %s274_s12 }
   0x5   : > { %p5460_p0 = scmp.ge.s32.totalorder %s7981_s30, 1  ;;  %p248_p1 = scmp.lt.s32.totalorder %s7981_s30, 3 }
   0x6   : > { %p7691_p2 = scmp.eq.s32.totalorder %s8057_s13, 0  ;;  %s7983_s15 = smov [#allocation4]  }
   0x7   : > { %p8062_p3 = pnand %p5460_p0, %p248_p1  ;;  %s276_s16 = sshll.u32 %s7983_s15, 4  ;;  %s277_s16 = int_to_ptr.vmem [resolvable:$true] %s276_s16 }
   0x8   : > { %s299_s19 = sshll.u32 %s8437_s4, 4  ;;  %s7984_s21 = smov [#allocation7]   ;;  %s300_s19 = int_to_ptr.hbm [resolvable:$true] %s299_s19 }
   0x9   : > { %p7669_p4 = pneg %p8062_p3  ;;  %s301_s22 = sshll.u32 %s7984_s21, 4  ;;  %s302_s22 = int_to_ptr.vmem [resolvable:$true] %s301_s22 }
   0xa   : > { %s328_s25 = sshll.u32 %s8440_s7, 4  ;;  %s7985_s26 = smov 16   ;;  %s329_s25 = int_to_ptr.hbm [resolvable:$true] %s328_s25 }
   0xb   : > { %p8073_p5 = pnand %p7691_p2, %p7669_p4  ;;  %s7986_s27 = smov 1  }
   0xc   : > { %s7987_s28 = smov [#allocation10]   ;;  %s7988_s10 = smov 128  }
   0xd   : > { %7675 = dma.hbm_to_vmem [thread:$0]  (!%p8073_p5), %s275_s12, 16, %s277_s16, [#allocation5]  }
   0xe   : > { %7681 = dma.hbm_to_vmem [thread:$0]  (!%p8073_p5), %s300_s19, 224, %s302_s22, [#allocation8], %s7985_s26, %s7985_s26, %s7986_s27  }
   0xf   : > { %s330_s29 = sshll.u32 %s7987_s28, 4  ;;  %s7989_s11 = smov 8   ;;  %s331_s29 = int_to_ptr.vmem [resolvable:$true] %s330_s29 }
  0x10   : > { %7687 = dma.hbm_to_vmem [thread:$0]  (!%p8073_p5), %s329_s25, 4096, %s331_s29, [#allocation11], %s7988_s10, %s7988_s10, %s7989_s11  }
  0x11   : > { %s259_s18 = sshll.u32 %s8434_s1, 4  ;;  %s7990_s12 = smov [#allocation2]   ;;  %s260_s18 = int_to_ptr.hbm [resolvable:$true] %s259_s18 }
  0x12   : > { %s261_s16 = sshll.u32 %s7990_s12, 4  ;;  %s285_s22 = sshll.u32 %s8436_s3, 4  ;;  %s262_s16 = int_to_ptr.vmem [resolvable:$true] %s261_s16  ;;  %s286_s22 = int_to_ptr.hbm [resolvable:$true] %s285_s22 }
  0x13   : > { %s7991_s23 = smov 64   ;;  %s7992_s24 = smov 4  }
  0x14   : > { %7672 = dma.hbm_to_vmem [thread:$0]  (!%p8073_p5), %s260_s18, 1536, %s262_s16, [#allocation3], %s7991_s23, %s7991_s23, %s7992_s24  }
  0x15   : > { %s7993_s25 = smov [#allocation6]   ;;  %s317_s29 = sshll.u32 %s8439_s6, 4  ;;  %s318_s29 = int_to_ptr.hbm [resolvable:$true] %s317_s29 }
  0x16   : > { %s287_s26 = sshll.u32 %s7993_s25, 4  ;;  %s343_s15 = sshll.u32 %s8441_s8, 4  ;;  %s288_s26 = int_to_ptr.vmem [resolvable:$true] %s287_s26  ;;  %s344_s15 = int_to_ptr.hbm [resolvable:$true] %s343_s15 }
  0x17   : > { %7678 = dma.hbm_to_vmem [thread:$0]  (!%p8073_p5), %s286_s22, 43008, %s288_s26, [#allocation5], %s7991_s23, %s7991_s23, %s7992_s24  }
  0x18   : > { %s7994_s17 = smov [#allocation9]   ;;  %s7995_s18 = smov [#allocation12]  }
  0x19   : > { %s319_s12 = sshll.u32 %s7994_s17, 4  ;;  %s345_s16 = sshll.u32 %s7995_s18, 4  ;;  %s320_s12 = int_to_ptr.vmem [resolvable:$true] %s319_s12  ;;  %s346_s16 = int_to_ptr.vmem [resolvable:$true] %s345_s16 }
  0x1a   : > { %7684 = dma.hbm_to_vmem [thread:$0]  (!%p8073_p5), %s318_s29, 16, %s320_s12, [#allocation8]  }
  0x1b   : > { %7690 = dma.hbm_to_vmem [thread:$0]  (!%p8073_p5), %s344_s15, 32, %s346_s16, [#allocation11]  }
  0x1c   : > { %366 = sbr.rel (%p8062_p3) target bundleno = 2857 (0xb29), region = 56 }
  0x21   : > { %7964 = dma.done.wait (%p7691_p2), [#allocation3], 1536  }
  0x22   : > { %7966 = vsyncadd (%p7691_p2), [#allocation3], 4294965760 }
  0x23   : > { %7968 = dma.done.wait (%p7691_p2), [#allocation5], 43024  }
  0x24   : > { %7970 = vsyncadd (%p7691_p2), [#allocation5], 4294924272 }
  0x25   : > { %7972 = dma.done.wait (%p7691_p2), [#allocation8], 240  }
  0x26   : > { %7974 = vsyncadd (%p7691_p2), [#allocation8], 4294967056 }
  0x27   : > { %7976 = dma.done.wait (%p7691_p2), [#allocation11], 4128  }
  0x28   : > { %7978 = vsyncadd (%p7691_p2), [#allocation11], 4294963168  ;;  %p432_p6 = scmp.lt.s32.totalorder %s8057_s13, 1  ;;  %v7244_v2 = vld [vmem:[#allocation2 + $0x38] sm:$0xff]  ;;  %v7243_v5 = vld [vmem:[#allocation2 + $0x30] sm:$0xff]  ;;  %s7996_s22 = smov 64  }
  0x29   : > { %v7248_v4 = vld [vmem:[#allocation2 + $0x58] sm:$0xff]  ;;  %574 = vmatpush.bf16.msra.mxu0 %v7244_v2  ;;  %v7247_v6 = vld [vmem:[#allocation2 + $0x50] sm:$0xff]  ;;  %v7242_v7 = vld [vmem:[#allocation2 + $0x28] sm:$0xff]  ;;  %vm478_vm0 = vcmask 1046528   ;;  %vm491_vm1 = vcmask 523264   ;;  %vm471_vm2 = vcmask 1040384  }
  0x2a   : > { %s8450_s13 = smov (!%p432_p6, %s8057_s13), 1  ;;  %592 = vmatpush.bf16.msra.mxu1 %v7248_v4  ;;  %v7246_v8 = vld [vmem:[#allocation2 + $0x48] sm:$0xff]  ;;  %v7241_v9 = vld [vmem:[#allocation2 + $0x20] sm:$0xff]  ;;  %v7240_v11 = vld [vmem:[#allocation2 + $0x18] sm:$0xff]  ;;  %vm7997_vm6 = vmmov 1  }
  0x2b   : > { %s7236_s14 = sshll.u32 %s8450_s13, 4  ;;  %v7245_v10 = vld [vmem:[#allocation2 + $0x40] sm:$0xff]  ;;  %v7239_v12 = vld [vmem:[#allocation2 + $0x10] sm:$0xff]  ;;  %v7238_v13 = vld [vmem:[#allocation2 + $0x8] sm:$0xff]  ;;  %s5479_s17 = sshll.u32 %s8450_s13, 1 }
  0x2c   : > { %s436_s19 = scalar_lea.vmem %s8433_s0, %s7236_s14  ;;  %v7237_v21 = vld [vmem:[#allocation2] sm:$0xff]  ;;  %v7263_v26 = vld [vmem:[#allocation6 + $0x70] sm:$0xff]  ;;  %v7262_v36 = vld [vmem:[#allocation6 + $0x68] sm:$0xff]  ;;  %s440_s16 = scalar_lea.vmem %s8442_s9, %s5479_s17 }
  0x2d   : > { %v442_v0 = vld [vmem:[%s436_s19] sm:$0xff]  ;;  %v443_v1 = vld [vmem:[%s436_s19 + $0x8] sm:$0xff]  ;;  %575 = vmatpush.bf16.msra.mxu0 %v7243_v5  ;;  %v7255_v34 = vld [vmem:[#allocation6 + $0x30] sm:$0xff] }
  0x2e   : > { %v7728_v3 = vpack.i.bf16 %v443_v1, %v442_v0  ;;  %593 = vmatpush.bf16.msra.mxu1 %v7247_v6  ;;  %v480_v14 = vrot.slane %v443_v1, 1  ;;  %v479_v15 = vrot.slane %v442_v0, 1  ;;  %v473_v18 = vrot.slane %v443_v1, 7  ;;  %v7264_v23 = vld [vmem:[#allocation6 + $0x78] sm:$0xff]  ;;  %v7271_v35 = vld [vmem:[#allocation6 + $0xb0] sm:$0xff]  ;;  %v7254_v37 = vld [vmem:[#allocation6 + $0x28] sm:$0xff] }
  0x2f   : > { %v472_v19 = vrot.slane %v442_v0, 7  ;;  %v7256_v24 = vld [vmem:[#allocation6 + $0x38] sm:$0xff]  ;;  %835 = vmatpush.bf16.msra.mxu3 %v7264_v23  ;;  %v7270_v38 = vld [vmem:[#allocation6 + $0xa8] sm:$0xff]  ;;  %v7261_v39 = vld [vmem:[#allocation6 + $0x60] sm:$0xff] }
  0x30   : > { %7729 = vrot.lane.b32.xlu0 %v7728_v3, %s7996_s22  ;;  %v481_v16 = vsel %vm478_vm0, %v479_v15, %v480_v14  ;;  %v484_v17 = vsel %vm478_vm0, %v480_v14, 0.0  ;;  %v7272_v25 = vld [vmem:[#allocation6 + $0xb8] sm:$0xff]  ;;  %821 = vmatpush.bf16.msra.mxu2 %v7256_v24  ;;  %v7253_v40 = vld [vmem:[#allocation6 + $0x20] sm:$0xff]  ;;  %v7259_v45 = vld [vmem:[#allocation6 + $0x50] sm:$0xff] }
  0x31   : > { %576 = vmatpush.bf16.msra.mxu0 %v7242_v7  ;;  %v495_v20 = vpack.c.bf16 %v484_v17, %v481_v16  ;;  %v474_v22 = vsel %vm471_vm2, %v472_v19, %v473_v18  ;;  %v477_v28 = vsel %vm471_vm2, 0.0, %v472_v19  ;;  %v7269_v41 = vld [vmem:[#allocation6 + $0xa0] sm:$0xff]  ;;  %v7260_v42 = vld [vmem:[#allocation6 + $0x58] sm:$0xff]  ;;  %v7251_v46 = vld [vmem:[#allocation6 + $0x10] sm:$0xff] }
  0x32   : > { %594 = vmatpush.bf16.msra.mxu1 %v7246_v8  ;;  %v7252_v43 = vld [vmem:[#allocation6 + $0x18] sm:$0xff]  ;;  %v7267_v47 = vld [vmem:[#allocation6 + $0x90] sm:$0xff]  ;;  %v7258_v48 = vld [vmem:[#allocation6 + $0x48] sm:$0xff] }
  0x33   : > { %836 = vmatpush.bf16.msra.mxu3 %v7263_v26  ;;  %v7268_v44 = vld [vmem:[#allocation6 + $0x98] sm:$0xff]  ;;  %v7250_v49 = vld [vmem:[#allocation6 + $0x8] sm:$0xff]  ;;  %v7257_v51 = vld [vmem:[#allocation6 + $0x40] sm:$0xff] }
  0x34   : > { %822 = vmatpush.bf16.msra.mxu2 %v7255_v34  ;;  %v7266_v50 = vld [vmem:[#allocation6 + $0x88] sm:$0xff]  ;;  %v7249_v52 = vld [vmem:[#allocation6] sm:$0xff]  ;;  %v7288_v54 = vld [vmem:[#allocation6 + $0x138] sm:$0xff] }
  0x35   : > { %577 = vmatpush.bf16.msra.mxu0 %v7241_v9  ;;  %v7265_v53 = vld [vmem:[#allocation6 + $0x80] sm:$0xff]  ;;  %v7280_v55 = vld [vmem:[#allocation6 + $0xf8] sm:$0xff]  ;;  %v7287_v57 = vld [vmem:[#allocation6 + $0x130] sm:$0xff] }
  0x36   : > { %595 = vmatpush.bf16.msra.mxu1 %v7245_v10  ;;  %v7296_v56 = vld [vmem:[#allocation6 + $0x178] sm:$0xff]  ;;  %vm5625_vm5 = vmneg %vm471_vm2  ;;  %v7279_v18 = vld [vmem:[#allocation6 + $0xf0] sm:$0xff] }
  0x37   : > { %837 = vmatpush.bf16.msra.mxu3 %v7262_v36  ;;  %v7733_v58 = vld [vmem:[#allocation4] ss:$0 sm:$0xff]  ;;  %vm8150_vm7 = vmpackc.low %vm7997_vm6, %vm5625_vm5  ;;  %v7295_v19 = vld [vmem:[#allocation6 + $0x170] sm:$0xff] }
  0x38   : > { %823 = vmatpush.bf16.msra.mxu2 %v7254_v37  ;;  %vm8157_vm8 = vmpackc.low %vm478_vm0, %vm7997_vm6  ;;  %v7285_v23 = vld [vmem:[#allocation6 + $0x120] sm:$0xff]  ;;  %v7284_v26 = vld [vmem:[#allocation6 + $0x118] sm:$0xff] }
  0x39   : > { %578 = vmatpush.bf16.msra.mxu0 %v7240_v11  ;;  %5528 = vmatmul.msk.bf16.vlgmr.msra.gmra.mxu1 %vm491_vm1, %v495_v20  ;;  %v7286_v20 = vld [vmem:[#allocation6 + $0x128] sm:$0xff]  ;;  %v7277_v24 = vld [vmem:[#allocation6 + $0xe0] sm:$0xff]  ;;  %v7096_v15 = vld [vmem:[#allocation10 + $0x20] sm:$0xf] }
  0x3a   : > { %849 = vmatpush.bf16.msrb.mxu1 %v7272_v25  ;;  %v7293_v25 = vld [vmem:[#allocation6 + $0x160] sm:$0xff]  ;;  %v7290_v34 = vld [vmem:[#allocation6 + $0x148] sm:$0xff] }
  0x3b   : > { %838 = vmatpush.bf16.msra.mxu3 %v7261_v39  ;;  %v7273_v36 = vld [vmem:[#allocation6 + $0xc0] sm:$0xff]  ;;  %v7304_v39 = vld [vmem:[#allocation6 + $0x1b8] sm:$0xff] }
  0x3c   : > { %824 = vmatpush.bf16.msra.mxu2 %v7253_v40  ;;  %v7289_v37 = vld [vmem:[#allocation6 + $0x140] sm:$0xff]  ;;  %v7320_v40 = vld [vmem:[#allocation6 + $0x238] sm:$0xff] }
  0x3d   : > { %579 = vmatpush.bf16.msra.mxu0 %v7239_v12  ;;  %v7086_v12 = vld [vmem:[#allocation10 + $0x10] sm:$0xf] }
  0x3e   : > { %850 = vmatpush.bf16.msrb.mxu1 %v7271_v35  ;;  %v7281_v35 = vld [vmem:[#allocation6 + $0x100] sm:$0xff] }
  0x3f   : > { %839 = vmatpush.bf16.msra.mxu3 %v7260_v42  ;;  %v7303_v42 = vld [vmem:[#allocation6 + $0x1b0] sm:$0xff] }
  0x40   : > { %825 = vmatpush.bf16.msra.mxu2 %v7252_v43  ;;  %v7319_v43 = vld [vmem:[#allocation6 + $0x230] sm:$0xff] }
  0x41   : > { %580 = vmatpush.bf16.msra.mxu0 %v7238_v13 }
  0x42   : > { %851 = vmatpush.bf16.msrb.mxu1 %v7270_v38  ;;  %v7312_v38 = vld [vmem:[#allocation6 + $0x1f8] sm:$0xff] }
  0x43   : > { %840 = vmatpush.bf16.msra.mxu3 %v7259_v45  ;;  %v7310_v45 = vld [vmem:[#allocation6 + $0x1e8] sm:$0xff] }
  0x44   : > { %826 = vmatpush.bf16.msra.mxu2 %v7251_v46 }
  0x45   : > { %581 = vmatpush.bf16.msra.mxu0 %v7237_v21  ;;  %v7278_v21 = vld [vmem:[#allocation6 + $0xe8] sm:$0xff] }
  0x46   : > { %852 = vmatpush.bf16.msrb.mxu1 %v7269_v41  ;;  %v7311_v41 = vld [vmem:[#allocation6 + $0x1f0] sm:$0xff] }
  0x47   : > { %841 = vmatpush.bf16.msra.mxu3 %v7258_v48 }
  0x48   : > { %827 = vmatpush.bf16.msra.mxu2 %v7250_v49 }
  0x49   : > { %1084 = vmatpush.bf16.msrb.mxu0 %v7280_v55 }
  0x4a   : > { %853 = vmatpush.bf16.msrb.mxu1 %v7268_v44  ;;  %v7734_v44 = vld [vmem:[#allocation7] ss:$0 sm:$0xff] }
  0x4b   : > { %842 = vmatpush.bf16.msra.mxu3 %v7257_v51 }
  0x4c   : > { %828 = vmatpush.bf16.msra.mxu2 %v7249_v52 }
  0x4d   : > { %1085 = vmatpush.bf16.msrb.mxu0 %v7279_v18  ;;  %v7316_v18 = vld [vmem:[#allocation6 + $0x218] sm:$0xff] }
  0x4e   : > { %854 = vmatpush.bf16.msrb.mxu1 %v7267_v47 }
  0x4f   : > { %1112 = vmatpush.bf16.msrb.mxu3 %v7296_v56 }
  0x50   : > { %1098 = vmatpush.bf16.msrb.mxu2 %v7288_v54 }
  0x51   : > { %1086 = vmatpush.bf16.msrb.mxu0 %v7278_v21  ;;  %v7315_v21 = vld [vmem:[#allocation6 + $0x210] sm:$0xff] }
  0x52   : > { %855 = vmatpush.bf16.msrb.mxu1 %v7266_v50 }
  0x53   : > { %1113 = vmatpush.bf16.msrb.mxu3 %v7295_v19  ;;  %v7307_v19 = vld [vmem:[#allocation6 + $0x1d0] sm:$0xff] }
  0x54   : > { %1099 = vmatpush.bf16.msrb.mxu2 %v7287_v57 }
  0x55   : > { %1087 = vmatpush.bf16.msrb.mxu0 %v7277_v24  ;;  %v7314_v24 = vld [vmem:[#allocation6 + $0x208] sm:$0xff] }
  0x56   : > { %856 = vmatpush.bf16.msrb.mxu1 %v7265_v53 }
  0x58   : > { %1100 = vmatpush.bf16.msrb.mxu2 %v7286_v20  ;;  %v7299_v20 = vld [vmem:[#allocation6 + $0x190] sm:$0xff] }
  0x5a   : > { %1347 = vmatpush.bf16.msra.mxu1 %v7304_v39 }
  0x5c   : > { %1101 = vmatpush.bf16.msrb.mxu2 %v7285_v23  ;;  %v7298_v23 = vld [vmem:[#allocation6 + $0x188] sm:$0xff] }
  0x5e   : > { %1348 = vmatpush.bf16.msra.mxu1 %v7303_v42 }
  0x60   : > { %1102 = vmatpush.bf16.msrb.mxu2 %v7284_v26  ;;  %v7297_v26 = vld [vmem:[#allocation6 + $0x180] sm:$0xff] }
  0xa2   : > { %v7730_v27 = vpop.permute.xlu0 %7729 }
  0xa3   : > { %v7732_v29 = vunpack.i.h.bf16 %v7730_v27  ;;  %v7731_v30 = vunpack.i.l.bf16 %v7730_v27  ;;  %v7276_v27 = vld [vmem:[#allocation6 + $0xd8] sm:$0xff] }
  0xa4   : > { %1088 = vmatpush.bf16.msrb.mxu0 %v7276_v27  ;;  %v7313_v27 = vld [vmem:[#allocation6 + $0x200] sm:$0xff] }
  0xa5   : > { %v492_v31 = vsel %vm491_vm1, %v477_v28, %v7731_v30  ;;  %v493_v32 = vsel %vm491_vm1, %v474_v22, %v7732_v29  ;;  %v7294_v22 = vld [vmem:[#allocation6 + $0x168] sm:$0xff]  ;;  %v7292_v28 = vld [vmem:[#allocation6 + $0x158] sm:$0xff]  ;;  %v7283_v29 = vld [vmem:[#allocation6 + $0x110] sm:$0xff] }
  0xa6   : > { %v494_v33 = vpack.c.bf16 %v493_v32, %v492_v31  ;;  %1114 = vmatpush.bf16.msrb.mxu3 %v7294_v22  ;;  %1103 = vmatpush.bf16.msrb.mxu2 %v7283_v29  ;;  %v7275_v30 = vld [vmem:[#allocation6 + $0xd0] sm:$0xff]  ;;  %v7282_v32 = vld [vmem:[#allocation6 + $0x108] sm:$0xff]  ;;  %v7328_v29 = vld [vmem:[#allocation6 + $0x278] sm:$0xff] }
  0xa7   : > { %v7291_v31 = vld [vmem:[#allocation6 + $0x150] sm:$0xff]  ;;  %v7306_v22 = vld [vmem:[#allocation6 + $0x1c8] sm:$0xff] }
  0xa8   : > { %582 = vmatmul.bf16.vlgmr.msra.gmra.mxu0 %v494_v33  ;;  %v7274_v33 = vld [vmem:[#allocation6 + $0xc8] sm:$0xff] }
  0xa9   : > { %1089 = vmatpush.bf16.msrb.mxu0 %v7275_v30  ;;  %v7344_v30 = vld [vmem:[#allocation6 + $0x2f8] sm:$0xff] }
  0xaa   : > { %1115 = vmatpush.bf16.msrb.mxu3 %v7293_v25  ;;  %1104 = vmatpush.bf16.msrb.mxu2 %v7282_v32  ;;  %v7305_v25 = vld [vmem:[#allocation6 + $0x1c0] sm:$0xff] }
  0xab   : > { %v7735_v32 = vld [vmem:[#allocation7 + $0x1] ss:$0 sm:$0xff] }
  0xad   : > { %1090 = vmatpush.bf16.msrb.mxu0 %v7274_v33 }
  0xae   : > { %1116 = vmatpush.bf16.msrb.mxu3 %v7292_v28  ;;  %1105 = vmatpush.bf16.msrb.mxu2 %v7281_v35  ;;  %v7336_v28 = vld [vmem:[#allocation6 + $0x2b8] sm:$0xff] }
  0xb1   : > { %1091 = vmatpush.bf16.msrb.mxu0 %v7273_v36 }
  0xb2   : > { %1117 = vmatpush.bf16.msrb.mxu3 %v7291_v31  ;;  %v7335_v31 = vld [vmem:[#allocation6 + $0x2b0] sm:$0xff] }
  0xb5   : > { %1361 = vmatpush.bf16.msra.mxu0 %v7312_v38 }
  0xb6   : > { %v597_v59 = vpop.f32.mrf.mxu1  ;;  %1118 = vmatpush.bf16.msrb.mxu3 %v7290_v34 }
  0xb9   : > { %1362 = vmatpush.bf16.msra.mxu0 %v7311_v41 }
  0xba   : > { %1119 = vmatpush.bf16.msrb.mxu3 %v7289_v37 }
  0xbd   : > { %1363 = vmatpush.bf16.msra.mxu0 %v7310_v45 }
  0xbe   : > { %v599_v2 = vpop.f32.mrf.mxu1 }
 0x125   : > { %v583_v60 = vpop.f32.mrf.mxu0 }
 0x126   : > { %v584_v61 = vadd.f32 %v7733_v58, %v583_v60 }
 0x128   : > { %v598_v62 = vadd.f32 %v597_v59, %v584_v61 }
 0x12a   : > { %v604_v63 = vmul.f32 0.01, %v598_v62  ;;  %vm602_vm3 = vcmp.ge.f32.partialorder %v598_v62, 0.0 }
 0x12c   : > { %v8139_v4 = vsel %vm602_vm3, %v598_v62, %v604_v63 }
 0x12d   : > { %v585_v0 = vpop.f32.mrf.mxu0  ;;  %v665_v7 = vrot.slane %v8139_v4, 1  ;;  %v659_v9 = vrot.slane %v8139_v4, 7 }
 0x12e   : > { %v586_v1 = vadd.f32 %v7733_v58, %v585_v0 }
 0x130   : > { %v600_v3 = vadd.f32 %v599_v2, %v586_v1 }
 0x132   : > { %v605_v5 = vmul.f32 0.01, %v600_v3  ;;  %vm603_vm4 = vcmp.ge.f32.partialorder %v600_v3, 0.0 }
 0x134   : > { %v8142_v6 = vsel %vm603_vm4, %v600_v3, %v605_v5 }
 0x135   : > { %v672_v8 = vpack.c.bf16 %v8142_v6, %v8139_v4  ;;  %v660_v10 = vrot.slane %v8142_v6, 7  ;;  %v666_v11 = vrot.slane %v8142_v6, 1 }
 0x137   : > { %843 = vmatmul.bf16.vlgmr.msra.gmra.mxu3 %v672_v8  ;;  %v661_v13 = vsel %vm471_vm2, %v659_v9, %v660_v10  ;;  %v667_v14 = vsel %vm478_vm0, %v665_v7, %v666_v11  ;;  %v7318_v10 = vld [vmem:[#allocation6 + $0x228] sm:$0xff] }
 0x138   : > { %v5627_v16 = vpack.c.bf16 %v661_v13, %v659_v9  ;;  %v5630_v17 = vpack.c.bf16 %v666_v11, %v667_v14  ;;  %v7302_v9 = vld [vmem:[#allocation6 + $0x1a8] sm:$0xff]  ;;  %v7309_v11 = vld [vmem:[#allocation6 + $0x1e0] sm:$0xff]  ;;  %1610 = vmatpush.bf16.msra.mxu3 %v7328_v29 }
 0x139   : > { %1349 = vmatpush.bf16.msra.mxu1 %v7302_v9  ;;  %1364 = vmatpush.bf16.msra.mxu0 %v7309_v11  ;;  %v7301_v13 = vld [vmem:[#allocation6 + $0x1a0] sm:$0xff]  ;;  %v7339_v9 = vld [vmem:[#allocation6 + $0x2d0] sm:$0xff]  ;;  %v7322_v11 = vld [vmem:[#allocation6 + $0x248] sm:$0xff] }
 0x13a   : > { %5628 = vmatmul.msk.bf16.vlgmr.msra.gmra.mxu2 %vm8150_vm7, %v5627_v16  ;;  %5631 = vmatmul.msk.bf16.vlgmr.msrb.gmra.mxu1 %vm8157_vm8, %v5630_v17  ;;  %v7317_v14 = vld [vmem:[#allocation6 + $0x220] sm:$0xff]  ;;  %v7308_v16 = vld [vmem:[#allocation6 + $0x1d8] sm:$0xff] }
 0x13b   : > { %1375 = vmatpush.bf16.msra.mxu2 %v7320_v40  ;;  %v7300_v17 = vld [vmem:[#allocation6 + $0x198] sm:$0xff] }
 0x13d   : > { %1350 = vmatpush.bf16.msra.mxu1 %v7301_v13  ;;  %1365 = vmatpush.bf16.msra.mxu0 %v7308_v16  ;;  %v7338_v13 = vld [vmem:[#allocation6 + $0x2c8] sm:$0xff]  ;;  %v7321_v16 = vld [vmem:[#allocation6 + $0x240] sm:$0xff] }
 0x13f   : > { %1376 = vmatpush.bf16.msra.mxu2 %v7319_v43 }
 0x141   : > { %1351 = vmatpush.bf16.msra.mxu1 %v7300_v17  ;;  %1366 = vmatpush.bf16.msra.mxu0 %v7307_v19  ;;  %v7337_v17 = vld [vmem:[#allocation6 + $0x2c0] sm:$0xff] }
 0x142   : > { %v7736_v19 = vld [vmem:[#allocation7 + $0x2] ss:$0 sm:$0xff] }
 0x143   : > { %1377 = vmatpush.bf16.msra.mxu2 %v7318_v10  ;;  %v7330_v10 = vld [vmem:[#allocation6 + $0x288] sm:$0xff] }
 0x145   : > { %1352 = vmatpush.bf16.msra.mxu1 %v7299_v20  ;;  %1367 = vmatpush.bf16.msra.mxu0 %v7306_v22 }
 0x147   : > { %1378 = vmatpush.bf16.msra.mxu2 %v7317_v14  ;;  %v7329_v14 = vld [vmem:[#allocation6 + $0x280] sm:$0xff] }
 0x149   : > { %1353 = vmatpush.bf16.msra.mxu1 %v7298_v23  ;;  %1368 = vmatpush.bf16.msra.mxu0 %v7305_v25 }
 0x14b   : > { %1379 = vmatpush.bf16.msra.mxu2 %v7316_v18  ;;  %v7360_v18 = vld [vmem:[#allocation6 + $0x378] sm:$0xff] }
 0x14d   : > { %1354 = vmatpush.bf16.msra.mxu1 %v7297_v26 }
 0x14f   : > { %1380 = vmatpush.bf16.msra.mxu2 %v7315_v21 }
 0x151   : > { %1624 = vmatpush.bf16.msrb.mxu1 %v7336_v28 }
 0x153   : > { %1381 = vmatpush.bf16.msra.mxu2 %v7314_v24 }
 0x155   : > { %1625 = vmatpush.bf16.msrb.mxu1 %v7335_v31 }
 0x157   : > { %1382 = vmatpush.bf16.msra.mxu2 %v7313_v27 }
 0x1b7   : > { %v858_v49 = vpop.f32.mrf.mxu1 }
 0x1ba   : > { %v844_v46 = vpop.f32.mrf.mxu3 }
 0x1bd   : > { %v830_v47 = vpop.f32.mrf.mxu2 }
 0x1be   : > { %v831_v48 = vadd.f32 %v7734_v44, %v830_v47 }
 0x1bf   : > { %v860_v57 = vpop.f32.mrf.mxu1 }
 0x1c0   : > { %v845_v50 = vadd.f32 %v844_v46, %v831_v48 }
 0x1c2   : > { %v859_v51 = vadd.f32 %v858_v49, %v845_v50  ;;  %v846_v55 = vpop.f32.mrf.mxu3 }
 0x1c4   : > { %v865_v54 = vmul.f32 0.01, %v859_v51  ;;  %vm863_vm9 = vcmp.ge.f32.partialorder %v859_v51, 0.0 }
 0x1c5   : > { %v832_v52 = vpop.f32.mrf.mxu2 }
 0x1c6   : > { %v833_v53 = vadd.f32 %v7734_v44, %v832_v52  ;;  %v867_v59 = vsel %vm863_vm9, %v859_v51, %v865_v54 }
 0x1c7   : > { %v922_v62 = vrot.slane %v867_v59, 7  ;;  %v928_v0 = vrot.slane %v867_v59, 1 }
 0x1c8   : > { %v847_v56 = vadd.f32 %v846_v55, %v833_v53 }
 0x1ca   : > { %v861_v58 = vadd.f32 %v860_v57, %v847_v56 }
 0x1cc   : > { %v866_v60 = vmul.f32 0.01, %v861_v58  ;;  %vm864_vm10 = vcmp.ge.f32.partialorder %v861_v58, 0.0 }
 0x1ce   : > { %v868_v61 = vsel %vm864_vm10, %v861_v58, %v866_v60  ;;  %v7327_v58 = vld [vmem:[#allocation6 + $0x270] sm:$0xff]  ;;  %v7334_v60 = vld [vmem:[#allocation6 + $0x2a8] sm:$0xff] }
 0x1cf   : > { %v923_v63 = vrot.slane %v868_v61, 7  ;;  %v929_v1 = vrot.slane %v868_v61, 1  ;;  %v935_v2 = vpack.c.bf16 %v868_v61, %v867_v59  ;;  %v7343_v59 = vld [vmem:[#allocation6 + $0x2f0] sm:$0xff]  ;;  %1611 = vmatpush.bf16.msra.mxu3 %v7327_v58  ;;  %1626 = vmatpush.bf16.msrb.mxu1 %v7334_v60  ;;  %v7326_v61 = vld [vmem:[#allocation6 + $0x268] sm:$0xff]  ;;  %v7356_v58 = vld [vmem:[#allocation6 + $0x358] sm:$0xff] }
 0x1d0   : > { %v7364_v60 = vld [vmem:[#allocation6 + $0x398] sm:$0xff] }
 0x1d1   : > { %1106 = vmatmul.bf16.vlgmr.msrb.gmra.mxu2 %v935_v2  ;;  %v924_v3 = vsel %vm471_vm2, %v922_v62, %v923_v63  ;;  %v930_v5 = vsel %vm478_vm0, %v928_v0, %v929_v1  ;;  %v7333_v63 = vld [vmem:[#allocation6 + $0x2a0] sm:$0xff]  ;;  %v7332_v2 = vld [vmem:[#allocation6 + $0x298] sm:$0xff] }
 0x1d2   : > { %v5730_v7 = vpack.c.bf16 %v924_v3, %v922_v62  ;;  %v5733_v8 = vpack.c.bf16 %v929_v1, %v930_v5  ;;  %v7342_v62 = vld [vmem:[#allocation6 + $0x2e8] sm:$0xff]  ;;  %v7325_v0 = vld [vmem:[#allocation6 + $0x260] sm:$0xff]  ;;  %v7324_v3 = vld [vmem:[#allocation6 + $0x258] sm:$0xff] }
 0x1d3   : > { %1612 = vmatpush.bf16.msra.mxu3 %v7326_v61  ;;  %1627 = vmatpush.bf16.msrb.mxu1 %v7333_v63  ;;  %v7341_v1 = vld [vmem:[#allocation6 + $0x2e0] sm:$0xff]  ;;  %v7340_v5 = vld [vmem:[#allocation6 + $0x2d8] sm:$0xff]  ;;  %v7355_v61 = vld [vmem:[#allocation6 + $0x350] sm:$0xff] }
 0x1d4   : > { %5731 = vmatmul.msk.bf16.vlgmr.msrb.gmra.mxu0 %vm8150_vm7, %v5730_v7  ;;  %5734 = vmatmul.msk.bf16.vlgmr.msrb.gmra.mxu3 %vm8157_vm8, %v5733_v8  ;;  %v7331_v7 = vld [vmem:[#allocation6 + $0x290] sm:$0xff] }
 0x1d5   : > { %1638 = vmatpush.bf16.msrb.mxu0 %v7344_v30  ;;  %v7323_v8 = vld [vmem:[#allocation6 + $0x250] sm:$0xff] }
 0x1d6   : > { %v7363_v63 = vld [vmem:[#allocation6 + $0x390] sm:$0xff] }
 0x1d7   : > { %1613 = vmatpush.bf16.msra.mxu3 %v7325_v0  ;;  %1628 = vmatpush.bf16.msrb.mxu1 %v7332_v2  ;;  %v7354_v0 = vld [vmem:[#allocation6 + $0x348] sm:$0xff] }
 0x1d8   : > { %v7362_v2 = vld [vmem:[#allocation6 + $0x388] sm:$0xff] }
 0x1d9   : > { %1639 = vmatpush.bf16.msrb.mxu0 %v7343_v59  ;;  %v7348_v59 = vld [vmem:[#allocation6 + $0x318] sm:$0xff] }
 0x1db   : > { %1614 = vmatpush.bf16.msra.mxu3 %v7324_v3  ;;  %1629 = vmatpush.bf16.msrb.mxu1 %v7331_v7  ;;  %v7353_v3 = vld [vmem:[#allocation6 + $0x340] sm:$0xff] }
 0x1dc   : > { %v7361_v7 = vld [vmem:[#allocation6 + $0x380] sm:$0xff] }
 0x1dd   : > { %1640 = vmatpush.bf16.msrb.mxu0 %v7342_v62  ;;  %v7347_v62 = vld [vmem:[#allocation6 + $0x310] sm:$0xff] }
 0x1df   : > { %1615 = vmatpush.bf16.msra.mxu3 %v7323_v8  ;;  %1630 = vmatpush.bf16.msrb.mxu1 %v7330_v10  ;;  %v7384_v8 = vld [vmem:[#allocation6 + $0x438] sm:$0xff] }
 0x1e0   : > { %v7392_v10 = vld [vmem:[#allocation6 + $0x478] sm:$0xff] }
 0x1e1   : > { %1641 = vmatpush.bf16.msrb.mxu0 %v7341_v1  ;;  %v7346_v1 = vld [vmem:[#allocation6 + $0x308] sm:$0xff] }
 0x1e3   : > { %1616 = vmatpush.bf16.msra.mxu3 %v7322_v11  ;;  %1631 = vmatpush.bf16.msrb.mxu1 %v7329_v14  ;;  %v7383_v11 = vld [vmem:[#allocation6 + $0x430] sm:$0xff] }
 0x1e5   : > { %1642 = vmatpush.bf16.msrb.mxu0 %v7340_v5  ;;  %v7345_v5 = vld [vmem:[#allocation6 + $0x300] sm:$0xff] }
 0x1e7   : > { %1617 = vmatpush.bf16.msra.mxu3 %v7321_v16 }
 0x1e9   : > { %1643 = vmatpush.bf16.msrb.mxu0 %v7339_v9  ;;  %v7376_v9 = vld [vmem:[#allocation6 + $0x3f8] sm:$0xff] }
 0x1eb   : > { %1887 = vmatpush.bf16.msrb.mxu3 %v7360_v18 }
 0x1ed   : > { %1644 = vmatpush.bf16.msrb.mxu0 %v7338_v13  ;;  %v7737_v13 = vld [vmem:[#allocation7 + $0x3] ss:$0 sm:$0xff] }
 0x1f1   : > { %1645 = vmatpush.bf16.msrb.mxu0 %v7337_v17 }
 0x251   : > { %v1093_v33 = vpop.f32.mrf.mxu0 }
 0x252   : > { %v1094_v34 = vadd.f32 %v7735_v32, %v1093_v33 }
 0x254   : > { %v1107_v35 = vpop.f32.mrf.mxu2 }
 0x255   : > { %v1108_v36 = vadd.f32 %v1107_v35, %v1094_v34 }
 0x257   : > { %v1121_v37 = vpop.f32.mrf.mxu3 }
 0x258   : > { %v1122_v38 = vadd.f32 %v1121_v37, %v1108_v36 }
 0x259   : > { %v1095_v39 = vpop.f32.mrf.mxu0 }
 0x25a   : > { %v1096_v40 = vadd.f32 %v7735_v32, %v1095_v39  ;;  %v1128_v42 = vmul.f32 0.01, %v1122_v38  ;;  %vm1126_vm11 = vcmp.ge.f32.partialorder %v1122_v38, 0.0 }
 0x25c   : > { %v1109_v41 = vpop.f32.mrf.mxu2  ;;  %v8171_v46 = vsel %vm1126_vm11, %v1122_v38, %v1128_v42 }
 0x25d   : > { %v1110_v43 = vadd.f32 %v1109_v41, %v1096_v40  ;;  %v1185_v48 = vrot.slane %v8171_v46, 7  ;;  %v1191_v50 = vrot.slane %v8171_v46, 1 }
 0x25f   : > { %v1123_v44 = vpop.f32.mrf.mxu3 }
 0x260   : > { %v1124_v45 = vadd.f32 %v1123_v44, %v1110_v43 }
 0x262   : > { %vm1127_vm12 = vcmp.ge.f32.partialorder %v1124_v45, 0.0  ;;  %v1129_v47 = vmul.f32 0.01, %v1124_v45 }
 0x264   : > { %v8174_v49 = vsel %vm1127_vm12, %v1124_v45, %v1129_v47  ;;  %v7352_v45 = vld [vmem:[#allocation6 + $0x338] sm:$0xff] }
 0x265   : > { %v1186_v51 = vrot.slane %v8174_v49, 7  ;;  %v1192_v52 = vrot.slane %v8174_v49, 1  ;;  %v1198_v53 = vpack.c.bf16 %v8174_v49, %v8171_v46  ;;  %v7368_v47 = vld [vmem:[#allocation6 + $0x3b8] sm:$0xff]  ;;  %1873 = vmatpush.bf16.msrb.mxu2 %v7352_v45  ;;  %v7381_v45 = vld [vmem:[#allocation6 + $0x420] sm:$0xff] }
 0x267   : > { %1369 = vmatmul.bf16.vlgmr.msra.gmra.mxu0 %v1198_v53  ;;  %v1187_v54 = vsel %vm471_vm2, %v1185_v48, %v1186_v51  ;;  %v1193_v55 = vsel %vm478_vm0, %v1191_v50, %v1192_v52  ;;  %v7351_v50 = vld [vmem:[#allocation6 + $0x330] sm:$0xff]  ;;  %v7350_v53 = vld [vmem:[#allocation6 + $0x328] sm:$0xff] }
 0x268   : > { %v5833_v56 = vpack.c.bf16 %v1187_v54, %v1185_v48  ;;  %v5836_v57 = vpack.c.bf16 %v1192_v52, %v1193_v55  ;;  %v7359_v48 = vld [vmem:[#allocation6 + $0x370] sm:$0xff]  ;;  %v7358_v52 = vld [vmem:[#allocation6 + $0x368] sm:$0xff]  ;;  %v7357_v55 = vld [vmem:[#allocation6 + $0x360] sm:$0xff]  ;;  %2136 = vmatpush.bf16.msra.mxu0 %v7376_v9 }
 0x269   : > { %1888 = vmatpush.bf16.msrb.mxu3 %v7359_v48  ;;  %v7367_v51 = vld [vmem:[#allocation6 + $0x3b0] sm:$0xff]  ;;  %1874 = vmatpush.bf16.msrb.mxu2 %v7351_v50  ;;  %v7366_v54 = vld [vmem:[#allocation6 + $0x3a8] sm:$0xff]  ;;  %v7389_v48 = vld [vmem:[#allocation6 + $0x460] sm:$0xff] }
 0x26a   : > { %5834 = vmatmul.msk.bf16.vlgmr.msra.gmra.mxu1 %vm8150_vm7, %v5833_v56  ;;  %5837 = vmatmul.msk.bf16.vlgmr.msra.gmra.mxu2 %vm8157_vm8, %v5836_v57  ;;  %v7349_v56 = vld [vmem:[#allocation6 + $0x320] sm:$0xff]  ;;  %v7380_v50 = vld [vmem:[#allocation6 + $0x418] sm:$0xff] }
 0x26b   : > { %1901 = vmatpush.bf16.msra.mxu1 %v7368_v47  ;;  %v7365_v57 = vld [vmem:[#allocation6 + $0x3a0] sm:$0xff] }
 0x26c   : > { %v7373_v47 = vld [vmem:[#allocation6 + $0x3e0] sm:$0xff] }
 0x26d   : > { %1889 = vmatpush.bf16.msrb.mxu3 %v7358_v52  ;;  %1875 = vmatpush.bf16.msrb.mxu2 %v7350_v53  ;;  %v7388_v52 = vld [vmem:[#allocation6 + $0x458] sm:$0xff]  ;;  %v7379_v53 = vld [vmem:[#allocation6 + $0x410] sm:$0xff] }
 0x26f   : > { %1902 = vmatpush.bf16.msra.mxu1 %v7367_v51  ;;  %v7372_v51 = vld [vmem:[#allocation6 + $0x3d8] sm:$0xff] }
 0x271   : > { %1890 = vmatpush.bf16.msrb.mxu3 %v7357_v55  ;;  %1876 = vmatpush.bf16.msrb.mxu2 %v7349_v56  ;;  %v7387_v55 = vld [vmem:[#allocation6 + $0x450] sm:$0xff]  ;;  %v7378_v56 = vld [vmem:[#allocation6 + $0x408] sm:$0xff] }
 0x273   : > { %1903 = vmatpush.bf16.msra.mxu1 %v7366_v54  ;;  %v7371_v54 = vld [vmem:[#allocation6 + $0x3d0] sm:$0xff] }
 0x275   : > { %1891 = vmatpush.bf16.msrb.mxu3 %v7356_v58  ;;  %1877 = vmatpush.bf16.msrb.mxu2 %v7348_v59  ;;  %v7386_v58 = vld [vmem:[#allocation6 + $0x448] sm:$0xff]  ;;  %v7377_v59 = vld [vmem:[#allocation6 + $0x400] sm:$0xff] }
 0x277   : > { %1904 = vmatpush.bf16.msra.mxu1 %v7365_v57  ;;  %v7370_v57 = vld [vmem:[#allocation6 + $0x3c8] sm:$0xff] }
 0x279   : > { %1892 = vmatpush.bf16.msrb.mxu3 %v7355_v61  ;;  %1878 = vmatpush.bf16.msrb.mxu2 %v7347_v62  ;;  %v7385_v61 = vld [vmem:[#allocation6 + $0x440] sm:$0xff]  ;;  %v7408_v62 = vld [vmem:[#allocation6 + $0x4f8] sm:$0xff] }
 0x27b   : > { %1905 = vmatpush.bf16.msra.mxu1 %v7364_v60  ;;  %v7369_v60 = vld [vmem:[#allocation6 + $0x3c0] sm:$0xff] }
 0x27d   : > { %1893 = vmatpush.bf16.msrb.mxu3 %v7354_v0  ;;  %1879 = vmatpush.bf16.msrb.mxu2 %v7346_v1  ;;  %v7416_v0 = vld [vmem:[#allocation6 + $0x538] sm:$0xff]  ;;  %v7407_v1 = vld [vmem:[#allocation6 + $0x4f0] sm:$0xff] }
 0x27f   : > { %1906 = vmatpush.bf16.msra.mxu1 %v7363_v63  ;;  %v7400_v63 = vld [vmem:[#allocation6 + $0x4b8] sm:$0xff] }
 0x281   : > { %1894 = vmatpush.bf16.msrb.mxu3 %v7353_v3  ;;  %1880 = vmatpush.bf16.msrb.mxu2 %v7345_v5  ;;  %v7415_v3 = vld [vmem:[#allocation6 + $0x530] sm:$0xff]  ;;  %v7738_v5 = vld [vmem:[#allocation7 + $0x4] ss:$0 sm:$0xff] }
 0x283   : > { %1907 = vmatpush.bf16.msra.mxu1 %v7362_v2  ;;  %v7399_v2 = vld [vmem:[#allocation6 + $0x4b0] sm:$0xff] }
 0x285   : > { %2150 = vmatpush.bf16.msra.mxu2 %v7384_v8 }
 0x287   : > { %1908 = vmatpush.bf16.msra.mxu1 %v7361_v7  ;;  %v7406_v7 = vld [vmem:[#allocation6 + $0x4e8] sm:$0xff] }
 0x289   : > { %2151 = vmatpush.bf16.msra.mxu2 %v7383_v11 }
 0x2e4   : > { %v1370_v21 = vpop.f32.mrf.mxu0 }
 0x2e7   : > { %v1356_v20 = vpop.f32.mrf.mxu1 }
 0x2e8   : > { %v1357_v22 = vadd.f32 %v7736_v19, %v1356_v20 }
 0x2ea   : > { %v1371_v23 = vadd.f32 %v1370_v21, %v1357_v22 }
 0x2ec   : > { %v1372_v28 = vpop.f32.mrf.mxu0 }
 0x2ed   : > { %v1384_v24 = vpop.f32.mrf.mxu2 }
 0x2ee   : > { %v1385_v25 = vadd.f32 %v1384_v24, %v1371_v23 }
 0x2ef   : > { %v1358_v26 = vpop.f32.mrf.mxu1 }
 0x2f0   : > { %v1359_v27 = vadd.f32 %v7736_v19, %v1358_v26  ;;  %v1391_v29 = vmul.f32 0.01, %v1385_v25  ;;  %vm1389_vm13 = vcmp.ge.f32.partialorder %v1385_v25, 0.0 }
 0x2f2   : > { %v1373_v30 = vadd.f32 %v1372_v28, %v1359_v27  ;;  %v1393_v33 = vsel %vm1389_vm13, %v1385_v25, %v1391_v29 }
 0x2f3   : > { %v1448_v35 = vrot.slane %v1393_v33, 7  ;;  %v1454_v37 = vrot.slane %v1393_v33, 1 }
 0x2f5   : > { %v1386_v31 = vpop.f32.mrf.mxu2 }
 0x2f6   : > { %v1387_v32 = vadd.f32 %v1386_v31, %v1373_v30 }
 0x2f8   : > { %vm1390_vm14 = vcmp.ge.f32.partialorder %v1387_v32, 0.0  ;;  %v1392_v34 = vmul.f32 0.01, %v1387_v32 }
 0x2fa   : > { %v1394_v36 = vsel %vm1390_vm14, %v1387_v32, %v1392_v34 }
 0x2fb   : > { %v1449_v38 = vrot.slane %v1394_v36, 7  ;;  %v1455_v39 = vrot.slane %v1394_v36, 1  ;;  %v1461_v40 = vpack.c.bf16 %v1394_v36, %v1393_v33 }
 0x2fd   : > { %v1456_v41 = vsel %vm478_vm0, %v1454_v37, %v1455_v39  ;;  %1632 = vmatmul.bf16.vlgmr.msrb.gmra.mxu1 %v1461_v40  ;;  %v1450_v42 = vsel %vm471_vm2, %v1448_v35, %v1449_v38  ;;  %v7375_v40 = vld [vmem:[#allocation6 + $0x3f0] sm:$0xff] }
 0x2fe   : > { %v5939_v43 = vpack.c.bf16 %v1455_v39, %v1456_v41  ;;  %v5936_v44 = vpack.c.bf16 %v1450_v42, %v1448_v35  ;;  %v7391_v41 = vld [vmem:[#allocation6 + $0x470] sm:$0xff]  ;;  %v7382_v42 = vld [vmem:[#allocation6 + $0x428] sm:$0xff]  ;;  %2137 = vmatpush.bf16.msra.mxu0 %v7375_v40  ;;  %2399 = vmatpush.bf16.msrb.mxu1 %v7400_v63  ;;  %v7397_v40 = vld [vmem:[#allocation6 + $0x4a0] sm:$0xff] }
 0x2ff   : > { %2152 = vmatpush.bf16.msra.mxu2 %v7382_v42  ;;  %v7404_v42 = vld [vmem:[#allocation6 + $0x4d8] sm:$0xff] }
 0x300   : > { %5937 = vmatmul.msk.bf16.vlgmr.msra.gmra.mxu3 %vm8150_vm7, %v5936_v44  ;;  %5940 = vmatmul.msk.bf16.vlgmr.msrb.gmra.mxu0 %vm8157_vm8, %v5939_v43  ;;  %v7374_v43 = vld [vmem:[#allocation6 + $0x3e8] sm:$0xff] }
 0x301   : > { %2164 = vmatpush.bf16.msra.mxu3 %v7392_v10  ;;  %v7390_v44 = vld [vmem:[#allocation6 + $0x468] sm:$0xff] }
 0x302   : > { %2138 = vmatpush.bf16.msra.mxu0 %v7374_v43  ;;  %2400 = vmatpush.bf16.msrb.mxu1 %v7399_v2  ;;  %v7396_v43 = vld [vmem:[#allocation6 + $0x498] sm:$0xff] }
 0x303   : > { %2153 = vmatpush.bf16.msra.mxu2 %v7381_v45  ;;  %v7403_v45 = vld [vmem:[#allocation6 + $0x4d0] sm:$0xff] }
 0x305   : > { %2165 = vmatpush.bf16.msra.mxu3 %v7391_v41  ;;  %v7413_v41 = vld [vmem:[#allocation6 + $0x520] sm:$0xff] }
 0x306   : > { %2139 = vmatpush.bf16.msra.mxu0 %v7373_v47  ;;  %v7395_v47 = vld [vmem:[#allocation6 + $0x490] sm:$0xff] }
 0x307   : > { %2154 = vmatpush.bf16.msra.mxu2 %v7380_v50  ;;  %v7402_v50 = vld [vmem:[#allocation6 + $0x4c8] sm:$0xff] }
 0x309   : > { %2166 = vmatpush.bf16.msra.mxu3 %v7390_v44  ;;  %v7412_v44 = vld [vmem:[#allocation6 + $0x518] sm:$0xff] }
 0x30a   : > { %2140 = vmatpush.bf16.msra.mxu0 %v7372_v51  ;;  %v7394_v51 = vld [vmem:[#allocation6 + $0x488] sm:$0xff] }
 0x30b   : > { %2155 = vmatpush.bf16.msra.mxu2 %v7379_v53  ;;  %v7401_v53 = vld [vmem:[#allocation6 + $0x4c0] sm:$0xff] }
 0x30d   : > { %2167 = vmatpush.bf16.msra.mxu3 %v7389_v48  ;;  %v7411_v48 = vld [vmem:[#allocation6 + $0x510] sm:$0xff] }
 0x30e   : > { %2141 = vmatpush.bf16.msra.mxu0 %v7371_v54  ;;  %v7393_v54 = vld [vmem:[#allocation6 + $0x480] sm:$0xff] }
 0x30f   : > { %2156 = vmatpush.bf16.msra.mxu2 %v7378_v56  ;;  %v7432_v56 = vld [vmem:[#allocation6 + $0x5b8] sm:$0xff] }
 0x311   : > { %2168 = vmatpush.bf16.msra.mxu3 %v7388_v52  ;;  %v7410_v52 = vld [vmem:[#allocation6 + $0x508] sm:$0xff] }
 0x312   : > { %2142 = vmatpush.bf16.msra.mxu0 %v7370_v57  ;;  %v7424_v57 = vld [vmem:[#allocation6 + $0x578] sm:$0xff] }
 0x313   : > { %2157 = vmatpush.bf16.msra.mxu2 %v7377_v59  ;;  %v7431_v59 = vld [vmem:[#allocation6 + $0x5b0] sm:$0xff] }
 0x315   : > { %2169 = vmatpush.bf16.msra.mxu3 %v7387_v55  ;;  %v7409_v55 = vld [vmem:[#allocation6 + $0x500] sm:$0xff] }
 0x316   : > { %2143 = vmatpush.bf16.msra.mxu0 %v7369_v60  ;;  %v7739_v60 = vld [vmem:[#allocation7 + $0x5] ss:$0 sm:$0xff] }
 0x319   : > { %2170 = vmatpush.bf16.msra.mxu3 %v7386_v58  ;;  %v7440_v58 = vld [vmem:[#allocation6 + $0x5f8] sm:$0xff] }
 0x31a   : > { %2413 = vmatpush.bf16.msrb.mxu0 %v7408_v62 }
 0x31d   : > { %2171 = vmatpush.bf16.msra.mxu3 %v7385_v61 }
 0x31e   : > { %2414 = vmatpush.bf16.msrb.mxu0 %v7407_v1 }
 0x322   : > { %2415 = vmatpush.bf16.msrb.mxu0 %v7406_v7 }
 0x37a   : > { %v1633_v14 = vpop.f32.mrf.mxu1 }
 0x37d   : > { %v1647_v18 = vpop.f32.mrf.mxu0 }
 0x382   : > { %v1635_v23 = vpop.f32.mrf.mxu1 }
 0x383   : > { %v1619_v16 = vpop.f32.mrf.mxu3 }
 0x384   : > { %v1620_v17 = vadd.f32 %v7737_v13, %v1619_v16 }
 0x385   : > { %v1649_v26 = vpop.f32.mrf.mxu0 }
 0x386   : > { %v1634_v19 = vadd.f32 %v1633_v14, %v1620_v17 }
 0x388   : > { %v1648_v20 = vadd.f32 %v1647_v18, %v1634_v19 }
 0x38a   : > { %v1654_v24 = vmul.f32 0.01, %v1648_v20  ;;  %vm1652_vm15 = vcmp.ge.f32.partialorder %v1648_v20, 0.0 }
 0x38b   : > { %v1621_v21 = vpop.f32.mrf.mxu3 }
 0x38c   : > { %v1622_v22 = vadd.f32 %v7737_v13, %v1621_v21  ;;  %v8193_v28 = vsel %vm1652_vm15, %v1648_v20, %v1654_v24 }
 0x38d   : > { %v1711_v30 = vrot.slane %v8193_v28, 7  ;;  %v1717_v32 = vrot.slane %v8193_v28, 1 }
 0x38e   : > { %v1636_v25 = vadd.f32 %v1635_v23, %v1622_v22 }
 0x390   : > { %v1650_v27 = vadd.f32 %v1649_v26, %v1636_v25 }
 0x392   : > { %vm1653_vm1 = vcmp.ge.f32.partialorder %v1650_v27, 0.0  ;;  %v1655_v29 = vmul.f32 0.01, %v1650_v27 }
 0x394   : > { %v8196_v31 = vsel %vm1653_vm1, %v1650_v27, %v1655_v29 }
 0x395   : > { %v1712_v33 = vrot.slane %v8196_v31, 7  ;;  %v1724_v34 = vpack.c.bf16 %v8196_v31, %v8193_v28  ;;  %v1718_v35 = vrot.slane %v8196_v31, 1 }
 0x397   : > { %1895 = vmatmul.bf16.vlgmr.msrb.gmra.mxu3 %v1724_v34  ;;  %v1713_v36 = vsel %vm471_vm2, %v1711_v30, %v1712_v33  ;;  %v1719_v37 = vsel %vm478_vm0, %v1717_v32, %v1718_v35 }
 0x398   : > { %v6039_v38 = vpack.c.bf16 %v1713_v36, %v1711_v30  ;;  %v6042_v39 = vpack.c.bf16 %v1718_v35, %v1719_v37  ;;  %v7398_v37 = vld [vmem:[#allocation6 + $0x4a8] sm:$0xff]  ;;  %2662 = vmatpush.bf16.msrb.mxu3 %v7424_v57 }
 0x399   : > { %2401 = vmatpush.bf16.msrb.mxu1 %v7398_v37  ;;  %v7420_v37 = vld [vmem:[#allocation6 + $0x558] sm:$0xff] }
 0x39a   : > { %6040 = vmatmul.msk.bf16.vlgmr.msrb.gmra.mxu2 %vm8150_vm7, %v6039_v38  ;;  %6043 = vmatmul.msk.bf16.vlgmr.msra.gmra.mxu1 %vm8157_vm8, %v6042_v39  ;;  %v7414_v38 = vld [vmem:[#allocation6 + $0x528] sm:$0xff]  ;;  %v7405_v39 = vld [vmem:[#allocation6 + $0x4e0] sm:$0xff] }
 0x39b   : > { %2427 = vmatpush.bf16.msrb.mxu2 %v7416_v0  ;;  %2416 = vmatpush.bf16.msrb.mxu0 %v7405_v39  ;;  %v7427_v39 = vld [vmem:[#allocation6 + $0x590] sm:$0xff] }
 0x39d   : > { %2402 = vmatpush.bf16.msrb.mxu1 %v7397_v40  ;;  %v7419_v40 = vld [vmem:[#allocation6 + $0x550] sm:$0xff] }
 0x39f   : > { %2428 = vmatpush.bf16.msrb.mxu2 %v7415_v3  ;;  %2417 = vmatpush.bf16.msrb.mxu0 %v7404_v42  ;;  %v7426_v42 = vld [vmem:[#allocation6 + $0x588] sm:$0xff] }
 0x3a1   : > { %2403 = vmatpush.bf16.msrb.mxu1 %v7396_v43  ;;  %v7418_v43 = vld [vmem:[#allocation6 + $0x548] sm:$0xff] }
 0x3a3   : > { %2429 = vmatpush.bf16.msrb.mxu2 %v7414_v38  ;;  %2418 = vmatpush.bf16.msrb.mxu0 %v7403_v45  ;;  %v7436_v38 = vld [vmem:[#allocation6 + $0x5d8] sm:$0xff]  ;;  %v7425_v45 = vld [vmem:[#allocation6 + $0x580] sm:$0xff] }
 0x3a5   : > { %2404 = vmatpush.bf16.msrb.mxu1 %v7395_v47  ;;  %v7417_v47 = vld [vmem:[#allocation6 + $0x540] sm:$0xff] }
 0x3a7   : > { %2430 = vmatpush.bf16.msrb.mxu2 %v7413_v41  ;;  %2419 = vmatpush.bf16.msrb.mxu0 %v7402_v50  ;;  %v7435_v41 = vld [vmem:[#allocation6 + $0x5d0] sm:$0xff]  ;;  %v7740_v50 = vld [vmem:[#allocation7 + $0x6] ss:$0 sm:$0xff] }
 0x3a9   : > { %2405 = vmatpush.bf16.msrb.mxu1 %v7394_v51 }
 0x3ab   : > { %2431 = vmatpush.bf16.msrb.mxu2 %v7412_v44  ;;  %2420 = vmatpush.bf16.msrb.mxu0 %v7401_v53  ;;  %v7434_v44 = vld [vmem:[#allocation6 + $0x5c8] sm:$0xff] }
 0x3ad   : > { %2406 = vmatpush.bf16.msrb.mxu1 %v7393_v54 }
 0x3af   : > { %2432 = vmatpush.bf16.msrb.mxu2 %v7411_v48  ;;  %v7433_v48 = vld [vmem:[#allocation6 + $0x5c0] sm:$0xff] }
 0x3b1   : > { %2676 = vmatpush.bf16.msra.mxu1 %v7432_v56 }
 0x3b3   : > { %2433 = vmatpush.bf16.msrb.mxu2 %v7410_v52 }
 0x3b5   : > { %2677 = vmatpush.bf16.msra.mxu1 %v7431_v59 }
 0x3b7   : > { %2434 = vmatpush.bf16.msrb.mxu2 %v7409_v55 }
 0x417   : > { %v1910_v11 = vpop.f32.mrf.mxu1 }
 0x41a   : > { %v1896_v8 = vpop.f32.mrf.mxu3 }
 0x41d   : > { %v1882_v9 = vpop.f32.mrf.mxu2 }
 0x41e   : > { %v1883_v10 = vadd.f32 %v7738_v5, %v1882_v9 }
 0x41f   : > { %v1912_v21 = vpop.f32.mrf.mxu1 }
 0x420   : > { %v1897_v13 = vadd.f32 %v1896_v8, %v1883_v10 }
 0x422   : > { %v1911_v14 = vadd.f32 %v1910_v11, %v1897_v13  ;;  %v1898_v19 = vpop.f32.mrf.mxu3 }
 0x424   : > { %v1917_v18 = vmul.f32 0.01, %v1911_v14  ;;  %vm1915_vm3 = vcmp.ge.f32.partialorder %v1911_v14, 0.0 }
 0x425   : > { %v1884_v16 = vpop.f32.mrf.mxu2 }
 0x426   : > { %v1885_v17 = vadd.f32 %v7738_v5, %v1884_v16  ;;  %v1919_v23 = vsel %vm1915_vm3, %v1911_v14, %v1917_v18 }
 0x427   : > { %v1974_v25 = vrot.slane %v1919_v23, 7  ;;  %v1980_v27 = vrot.slane %v1919_v23, 1 }
 0x428   : > { %v1899_v20 = vadd.f32 %v1898_v19, %v1885_v17 }
 0x42a   : > { %v1913_v22 = vadd.f32 %v1912_v21, %v1899_v20 }
 0x42c   : > { %vm1916_vm4 = vcmp.ge.f32.partialorder %v1913_v22, 0.0  ;;  %v1918_v24 = vmul.f32 0.01, %v1913_v22 }
 0x42e   : > { %v1920_v26 = vsel %vm1916_vm4, %v1913_v22, %v1918_v24 }
 0x42f   : > { %v1975_v29 = vrot.slane %v1920_v26, 7  ;;  %v1981_v30 = vrot.slane %v1920_v26, 1  ;;  %v1987_v32 = vpack.c.bf16 %v1920_v26, %v1919_v23  ;;  %v7423_v26 = vld [vmem:[#allocation6 + $0x570] sm:$0xff] }
 0x430   : > { %2663 = vmatpush.bf16.msrb.mxu3 %v7423_v26  ;;  %v7462_v26 = vld [vmem:[#allocation6 + $0x6a8] sm:$0xff] }
 0x431   : > { %2158 = vmatmul.bf16.vlgmr.msra.gmra.mxu2 %v1987_v32  ;;  %v1976_v33 = vsel %vm471_vm2, %v1974_v25, %v1975_v29  ;;  %v1982_v34 = vsel %vm478_vm0, %v1980_v27, %v1981_v30  ;;  %v7439_v27 = vld [vmem:[#allocation6 + $0x5f0] sm:$0xff]  ;;  %v7430_v29 = vld [vmem:[#allocation6 + $0x5a8] sm:$0xff] }
 0x432   : > { %v6142_v35 = vpack.c.bf16 %v1976_v33, %v1974_v25  ;;  %v6145_v36 = vpack.c.bf16 %v1981_v30, %v1982_v34  ;;  %2678 = vmatpush.bf16.msra.mxu1 %v7430_v29  ;;  %v7422_v30 = vld [vmem:[#allocation6 + $0x568] sm:$0xff]  ;;  %v7429_v33 = vld [vmem:[#allocation6 + $0x5a0] sm:$0xff] }
 0x433   : > { %v7438_v32 = vld [vmem:[#allocation6 + $0x5e8] sm:$0xff]  ;;  %v7421_v34 = vld [vmem:[#allocation6 + $0x560] sm:$0xff] }
 0x434   : > { %6143 = vmatmul.msk.bf16.vlgmr.msra.gmra.mxu0 %vm8150_vm7, %v6142_v35  ;;  %6146 = vmatmul.msk.bf16.vlgmr.msra.gmra.mxu3 %vm8157_vm8, %v6145_v36  ;;  %v7437_v35 = vld [vmem:[#allocation6 + $0x5e0] sm:$0xff]  ;;  %v7428_v36 = vld [vmem:[#allocation6 + $0x598] sm:$0xff] }
 0x435   : > { %2690 = vmatpush.bf16.msra.mxu0 %v7440_v58  ;;  %2664 = vmatpush.bf16.msrb.mxu3 %v7422_v30  ;;  %v7445_v29 = vld [vmem:[#allocation6 + $0x620] sm:$0xff] }
 0x436   : > { %2679 = vmatpush.bf16.msra.mxu1 %v7429_v33  ;;  %v7461_v30 = vld [vmem:[#allocation6 + $0x6a0] sm:$0xff]  ;;  %v7444_v33 = vld [vmem:[#allocation6 + $0x618] sm:$0xff] }
 0x439   : > { %2691 = vmatpush.bf16.msra.mxu0 %v7439_v27  ;;  %2665 = vmatpush.bf16.msrb.mxu3 %v7421_v34  ;;  %v7453_v27 = vld [vmem:[#allocation6 + $0x660] sm:$0xff]  ;;  %v7460_v34 = vld [vmem:[#allocation6 + $0x698] sm:$0xff] }
 0x43a   : > { %2680 = vmatpush.bf16.msra.mxu1 %v7428_v36  ;;  %v7443_v36 = vld [vmem:[#allocation6 + $0x610] sm:$0xff] }
 0x43d   : > { %2692 = vmatpush.bf16.msra.mxu0 %v7438_v32  ;;  %2666 = vmatpush.bf16.msrb.mxu3 %v7420_v37  ;;  %v7452_v32 = vld [vmem:[#allocation6 + $0x658] sm:$0xff]  ;;  %v7459_v37 = vld [vmem:[#allocation6 + $0x690] sm:$0xff] }
 0x43e   : > { %2681 = vmatpush.bf16.msra.mxu1 %v7427_v39  ;;  %v7442_v39 = vld [vmem:[#allocation6 + $0x608] sm:$0xff] }
 0x441   : > { %2693 = vmatpush.bf16.msra.mxu0 %v7437_v35  ;;  %2667 = vmatpush.bf16.msrb.mxu3 %v7419_v40  ;;  %v7451_v35 = vld [vmem:[#allocation6 + $0x650] sm:$0xff]  ;;  %v7458_v40 = vld [vmem:[#allocation6 + $0x688] sm:$0xff] }
 0x442   : > { %2682 = vmatpush.bf16.msra.mxu1 %v7426_v42  ;;  %v7441_v42 = vld [vmem:[#allocation6 + $0x600] sm:$0xff] }
 0x445   : > { %2694 = vmatpush.bf16.msra.mxu0 %v7436_v38  ;;  %2668 = vmatpush.bf16.msrb.mxu3 %v7418_v43  ;;  %v7450_v38 = vld [vmem:[#allocation6 + $0x648] sm:$0xff]  ;;  %v7457_v43 = vld [vmem:[#allocation6 + $0x680] sm:$0xff] }
 0x446   : > { %2683 = vmatpush.bf16.msra.mxu1 %v7425_v45  ;;  %v7472_v45 = vld [vmem:[#allocation6 + $0x6f8] sm:$0xff] }
 0x449   : > { %2695 = vmatpush.bf16.msra.mxu0 %v7435_v41  ;;  %2669 = vmatpush.bf16.msrb.mxu3 %v7417_v47  ;;  %v7449_v41 = vld [vmem:[#allocation6 + $0x640] sm:$0xff]  ;;  %v7488_v47 = vld [vmem:[#allocation6 + $0x778] sm:$0xff] }
 0x44d   : > { %2696 = vmatpush.bf16.msra.mxu0 %v7434_v44  ;;  %v7480_v44 = vld [vmem:[#allocation6 + $0x738] sm:$0xff] }
 0x451   : > { %2697 = vmatpush.bf16.msra.mxu0 %v7433_v48  ;;  %v7479_v48 = vld [vmem:[#allocation6 + $0x730] sm:$0xff] }
 0x4b1   : > { %v2145_v61 = vpop.f32.mrf.mxu0 }
 0x4b2   : > { %v2146_v62 = vadd.f32 %v7739_v60, %v2145_v61 }
 0x4b4   : > { %v2159_v63 = vpop.f32.mrf.mxu2 }
 0x4b5   : > { %v2160_v0 = vadd.f32 %v2159_v63, %v2146_v62 }
 0x4b7   : > { %v2173_v1 = vpop.f32.mrf.mxu3 }
 0x4b8   : > { %v2174_v2 = vadd.f32 %v2173_v1, %v2160_v0 }
 0x4b9   : > { %v2147_v3 = vpop.f32.mrf.mxu0 }
 0x4ba   : > { %v2148_v5 = vadd.f32 %v7739_v60, %v2147_v3  ;;  %v2180_v8 = vmul.f32 0.01, %v2174_v2  ;;  %vm2178_vm5 = vcmp.ge.f32.partialorder %v2174_v2, 0.0 }
 0x4bc   : > { %v2161_v7 = vpop.f32.mrf.mxu2  ;;  %v8215_v13 = vsel %vm2178_vm5, %v2174_v2, %v2180_v8 }
 0x4bd   : > { %v2162_v9 = vadd.f32 %v2161_v7, %v2148_v5  ;;  %v2237_v16 = vrot.slane %v8215_v13, 7  ;;  %v2243_v18 = vrot.slane %v8215_v13, 1 }
 0x4bf   : > { %v2175_v10 = vpop.f32.mrf.mxu3 }
 0x4c0   : > { %v2176_v11 = vadd.f32 %v2175_v10, %v2162_v9 }
 0x4c2   : > { %vm2179_vm6 = vcmp.ge.f32.partialorder %v2176_v11, 0.0  ;;  %v2181_v14 = vmul.f32 0.01, %v2176_v11 }
 0x4c4   : > { %v8218_v17 = vsel %vm2179_vm6, %v2176_v11, %v2181_v14 }
 0x4c5   : > { %v2238_v19 = vrot.slane %v8218_v17, 7  ;;  %v2244_v20 = vrot.slane %v8218_v17, 1  ;;  %v2250_v21 = vpack.c.bf16 %v8218_v17, %v8215_v13 }
 0x4c7   : > { %2421 = vmatmul.bf16.vlgmr.msrb.gmra.mxu0 %v2250_v21  ;;  %v2239_v22 = vsel %vm471_vm2, %v2237_v16, %v2238_v19  ;;  %v2245_v23 = vsel %vm478_vm0, %v2243_v18, %v2244_v20  ;;  %v7456_v18 = vld [vmem:[#allocation6 + $0x678] sm:$0xff]  ;;  %v7455_v21 = vld [vmem:[#allocation6 + $0x670] sm:$0xff] }
 0x4c8   : > { %v6245_v24 = vpack.c.bf16 %v2239_v22, %v2237_v16  ;;  %v6248_v25 = vpack.c.bf16 %v2244_v20, %v2245_v23  ;;  %2941 = vmatpush.bf16.msra.mxu3 %v7456_v18  ;;  %v7448_v19 = vld [vmem:[#allocation6 + $0x638] sm:$0xff]  ;;  %v7447_v22 = vld [vmem:[#allocation6 + $0x630] sm:$0xff]  ;;  %3190 = vmatpush.bf16.msrb.mxu0 %v7472_v45 }
 0x4c9   : > { %v7464_v20 = vld [vmem:[#allocation6 + $0x6b8] sm:$0xff]  ;;  %2927 = vmatpush.bf16.msra.mxu2 %v7448_v19  ;;  %v7463_v23 = vld [vmem:[#allocation6 + $0x6b0] sm:$0xff] }
 0x4ca   : > { %6246 = vmatmul.msk.bf16.vlgmr.msrb.gmra.mxu1 %vm8150_vm7, %v6245_v24  ;;  %6249 = vmatmul.msk.bf16.vlgmr.msrb.gmra.mxu2 %vm8157_vm8, %v6248_v25  ;;  %v7454_v24 = vld [vmem:[#allocation6 + $0x668] sm:$0xff] }
 0x4cb   : > { %2955 = vmatpush.bf16.msrb.mxu1 %v7464_v20  ;;  %v7446_v25 = vld [vmem:[#allocation6 + $0x628] sm:$0xff] }
 0x4cc   : > { %2942 = vmatpush.bf16.msra.mxu3 %v7455_v21  ;;  %v7478_v20 = vld [vmem:[#allocation6 + $0x728] sm:$0xff] }
 0x4cd   : > { %2928 = vmatpush.bf16.msra.mxu2 %v7447_v22  ;;  %v7470_v21 = vld [vmem:[#allocation6 + $0x6e8] sm:$0xff] }
 0x4ce   : > { %v7486_v22 = vld [vmem:[#allocation6 + $0x768] sm:$0xff] }
 0x4cf   : > { %2956 = vmatpush.bf16.msrb.mxu1 %v7463_v23  ;;  %v7477_v23 = vld [vmem:[#allocation6 + $0x720] sm:$0xff] }
 0x4d0   : > { %2943 = vmatpush.bf16.msra.mxu3 %v7454_v24  ;;  %v7469_v24 = vld [vmem:[#allocation6 + $0x6e0] sm:$0xff] }
 0x4d1   : > { %2929 = vmatpush.bf16.msra.mxu2 %v7446_v25  ;;  %v7485_v25 = vld [vmem:[#allocation6 + $0x760] sm:$0xff] }
 0x4d3   : > { %2957 = vmatpush.bf16.msrb.mxu1 %v7462_v26  ;;  %v7476_v26 = vld [vmem:[#allocation6 + $0x718] sm:$0xff] }
 0x4d4   : > { %2944 = vmatpush.bf16.msra.mxu3 %v7453_v27  ;;  %v7468_v27 = vld [vmem:[#allocation6 + $0x6d8] sm:$0xff] }
 0x4d5   : > { %2930 = vmatpush.bf16.msra.mxu2 %v7445_v29  ;;  %v7484_v29 = vld [vmem:[#allocation6 + $0x758] sm:$0xff] }
 0x4d7   : > { %2958 = vmatpush.bf16.msrb.mxu1 %v7461_v30  ;;  %v7475_v30 = vld [vmem:[#allocation6 + $0x710] sm:$0xff] }
 0x4d8   : > { %2945 = vmatpush.bf16.msra.mxu3 %v7452_v32  ;;  %v7467_v32 = vld [vmem:[#allocation6 + $0x6d0] sm:$0xff] }
 0x4d9   : > { %2931 = vmatpush.bf16.msra.mxu2 %v7444_v33  ;;  %v7483_v33 = vld [vmem:[#allocation6 + $0x750] sm:$0xff] }
 0x4db   : > { %2959 = vmatpush.bf16.msrb.mxu1 %v7460_v34  ;;  %v7474_v34 = vld [vmem:[#allocation6 + $0x708] sm:$0xff] }
 0x4dc   : > { %2946 = vmatpush.bf16.msra.mxu3 %v7451_v35  ;;  %v7466_v35 = vld [vmem:[#allocation6 + $0x6c8] sm:$0xff] }
 0x4dd   : > { %2932 = vmatpush.bf16.msra.mxu2 %v7443_v36  ;;  %v7482_v36 = vld [vmem:[#allocation6 + $0x748] sm:$0xff] }
 0x4df   : > { %2960 = vmatpush.bf16.msrb.mxu1 %v7459_v37  ;;  %v7473_v37 = vld [vmem:[#allocation6 + $0x700] sm:$0xff] }
 0x4e0   : > { %2947 = vmatpush.bf16.msra.mxu3 %v7450_v38  ;;  %v7465_v38 = vld [vmem:[#allocation6 + $0x6c0] sm:$0xff] }
 0x4e1   : > { %2933 = vmatpush.bf16.msra.mxu2 %v7442_v39  ;;  %v7481_v39 = vld [vmem:[#allocation6 + $0x740] sm:$0xff] }
 0x4e3   : > { %2961 = vmatpush.bf16.msrb.mxu1 %v7458_v40  ;;  %v7504_v40 = vld [vmem:[#allocation6 + $0x7f8] sm:$0xff] }
 0x4e4   : > { %2948 = vmatpush.bf16.msra.mxu3 %v7449_v41  ;;  %v7496_v41 = vld [vmem:[#allocation6 + $0x7b8] sm:$0xff] }
 0x4e5   : > { %2934 = vmatpush.bf16.msra.mxu2 %v7441_v42  ;;  %v7512_v42 = vld [vmem:[#allocation6 + $0x838] sm:$0xff] }
 0x4e7   : > { %2962 = vmatpush.bf16.msrb.mxu1 %v7457_v43  ;;  %v7503_v43 = vld [vmem:[#allocation6 + $0x7f0] sm:$0xff] }
 0x4e9   : > { %3204 = vmatpush.bf16.msrb.mxu2 %v7480_v44  ;;  %v7742_v44 = vld [vmem:[#allocation7 + $0x8] ss:$0 sm:$0xff] }
 0x4ed   : > { %3205 = vmatpush.bf16.msrb.mxu2 %v7479_v48 }
 0x4f1   : > { %3206 = vmatpush.bf16.msrb.mxu2 %v7478_v20  ;;  %v7500_v20 = vld [vmem:[#allocation6 + $0x7d8] sm:$0xff] }
 0x4f5   : > { %3207 = vmatpush.bf16.msrb.mxu2 %v7477_v23  ;;  %v7499_v23 = vld [vmem:[#allocation6 + $0x7d0] sm:$0xff] }
 0x4f9   : > { %3208 = vmatpush.bf16.msrb.mxu2 %v7476_v26  ;;  %v7498_v26 = vld [vmem:[#allocation6 + $0x7c8] sm:$0xff] }
 0x4fd   : > { %3209 = vmatpush.bf16.msrb.mxu2 %v7475_v30  ;;  %v7497_v30 = vld [vmem:[#allocation6 + $0x7c0] sm:$0xff] }
 0x501   : > { %3210 = vmatpush.bf16.msrb.mxu2 %v7474_v34  ;;  %v7528_v34 = vld [vmem:[#allocation6 + $0x8b8] sm:$0xff] }
 0x505   : > { %3211 = vmatpush.bf16.msrb.mxu2 %v7473_v37  ;;  %v7743_v37 = vld [vmem:[#allocation7 + $0x9] ss:$0 sm:$0xff] }
 0x544   : > { %v2422_v52 = vpop.f32.mrf.mxu0 }
 0x547   : > { %v2408_v51 = vpop.f32.mrf.mxu1 }
 0x548   : > { %v2409_v53 = vadd.f32 %v7740_v50, %v2408_v51 }
 0x54a   : > { %v2423_v54 = vadd.f32 %v2422_v52, %v2409_v53 }
 0x54c   : > { %v2424_v59 = vpop.f32.mrf.mxu0 }
 0x54d   : > { %v2436_v55 = vpop.f32.mrf.mxu2 }
 0x54e   : > { %v2437_v56 = vadd.f32 %v2436_v55, %v2423_v54 }
 0x54f   : > { %v2410_v57 = vpop.f32.mrf.mxu1 }
 0x550   : > { %v2411_v58 = vadd.f32 %v7740_v50, %v2410_v57  ;;  %v2443_v60 = vmul.f32 0.01, %v2437_v56  ;;  %vm2441_vm9 = vcmp.ge.f32.partialorder %v2437_v56, 0.0  ;;  %v7741_v50 = vld [vmem:[#allocation7 + $0x7] ss:$0 sm:$0xff] }
 0x552   : > { %v2425_v61 = vadd.f32 %v2424_v59, %v2411_v58  ;;  %v2445_v0 = vsel %vm2441_vm9, %v2437_v56, %v2443_v60 }
 0x553   : > { %v2500_v2 = vrot.slane %v2445_v0, 7  ;;  %v2506_v5 = vrot.slane %v2445_v0, 1 }
 0x555   : > { %v2438_v62 = vpop.f32.mrf.mxu2 }
 0x556   : > { %v2439_v63 = vadd.f32 %v2438_v62, %v2425_v61 }
 0x558   : > { %vm2442_vm10 = vcmp.ge.f32.partialorder %v2439_v63, 0.0  ;;  %v2444_v1 = vmul.f32 0.01, %v2439_v63 }
 0x55a   : > { %v2446_v3 = vsel %vm2442_vm10, %v2439_v63, %v2444_v1 }
 0x55b   : > { %v2501_v7 = vrot.slane %v2446_v3, 7  ;;  %v2507_v8 = vrot.slane %v2446_v3, 1  ;;  %v2513_v9 = vpack.c.bf16 %v2446_v3, %v2445_v0 }
 0x55d   : > { %v2508_v10 = vsel %vm478_vm0, %v2506_v5, %v2507_v8  ;;  %2684 = vmatmul.bf16.vlgmr.msra.gmra.mxu1 %v2513_v9  ;;  %v2502_v11 = vsel %vm471_vm2, %v2500_v2, %v2501_v7 }
 0x55e   : > { %v6351_v14 = vpack.c.bf16 %v2507_v8, %v2508_v10  ;;  %v6348_v16 = vpack.c.bf16 %v2502_v11, %v2500_v2  ;;  %3455 = vmatpush.bf16.msra.mxu1 %v7496_v41 }
 0x560   : > { %6349 = vmatmul.msk.bf16.vlgmr.msrb.gmra.mxu3 %vm8150_vm7, %v6348_v16  ;;  %6352 = vmatmul.msk.bf16.vlgmr.msra.gmra.mxu0 %vm8157_vm8, %v6351_v14 }
 0x561   : > { %3218 = vmatpush.bf16.msrb.mxu3 %v7488_v47 }
 0x5da   : > { %v2685_v51 = vpop.f32.mrf.mxu1 }
 0x5dd   : > { %v2699_v54 = vpop.f32.mrf.mxu0 }
 0x5e2   : > { %v2687_v60 = vpop.f32.mrf.mxu1 }
 0x5e3   : > { %v2671_v52 = vpop.f32.mrf.mxu3 }
 0x5e4   : > { %v2672_v53 = vadd.f32 %v7741_v50, %v2671_v52 }
 0x5e5   : > { %v2701_v63 = vpop.f32.mrf.mxu0 }
 0x5e6   : > { %v2686_v55 = vadd.f32 %v2685_v51, %v2672_v53 }
 0x5e8   : > { %v2700_v56 = vadd.f32 %v2699_v54, %v2686_v55 }
 0x5ea   : > { %v2706_v57 = vmul.f32 0.01, %v2700_v56  ;;  %vm2704_vm11 = vcmp.ge.f32.partialorder %v2700_v56, 0.0 }
 0x5eb   : > { %v2673_v58 = vpop.f32.mrf.mxu3 }
 0x5ec   : > { %v2674_v59 = vadd.f32 %v7741_v50, %v2673_v58  ;;  %v2708_v62 = vsel %vm2704_vm11, %v2700_v56, %v2706_v57 }
 0x5ed   : > { %v2710_v1 = vadd.f32 %v2708_v62, %v8215_v13  ;;  %v7471_v13 = vld [vmem:[#allocation6 + $0x6f0] sm:$0xff] }
 0x5ee   : > { %v2688_v61 = vadd.f32 %v2687_v60, %v2674_v59  ;;  %3191 = vmatpush.bf16.msrb.mxu0 %v7471_v13  ;;  %v7493_v13 = vld [vmem:[#allocation6 + $0x7a0] sm:$0xff] }
 0x5ef   : > { %v2771_v7 = vrot.slane %v2710_v1, 1  ;;  %v2765_v10 = vrot.slane %v2710_v1, 7 }
 0x5f0   : > { %v2702_v0 = vadd.f32 %v2701_v63, %v2688_v61 }
 0x5f2   : > { %vm2705_vm12 = vcmp.ge.f32.partialorder %v2702_v0, 0.0  ;;  %v2707_v2 = vmul.f32 0.01, %v2702_v0  ;;  %3192 = vmatpush.bf16.msrb.mxu0 %v7470_v21  ;;  %v7492_v21 = vld [vmem:[#allocation6 + $0x798] sm:$0xff] }
 0x5f4   : > { %v2709_v3 = vsel %vm2705_vm12, %v2702_v0, %v2707_v2 }
 0x5f5   : > { %v2711_v5 = vadd.f32 %v2709_v3, %v8218_v17  ;;  %v7487_v17 = vld [vmem:[#allocation6 + $0x770] sm:$0xff] }
 0x5f6   : > { %3219 = vmatpush.bf16.msrb.mxu3 %v7487_v17  ;;  %3193 = vmatpush.bf16.msrb.mxu0 %v7469_v24  ;;  %v7509_v17 = vld [vmem:[#allocation6 + $0x820] sm:$0xff]  ;;  %v7491_v24 = vld [vmem:[#allocation6 + $0x790] sm:$0xff] }
 0x5f7   : > { %v2766_v8 = vrot.slane %v2711_v5, 7  ;;  %v2778_v9 = vpack.c.bf16 %v2711_v5, %v2710_v1  ;;  %v2772_v11 = vrot.slane %v2711_v5, 1 }
 0x5f9   : > { %2949 = vmatmul.bf16.vlgmr.msra.gmra.mxu3 %v2778_v9  ;;  %v2767_v14 = vsel %vm471_vm2, %v2765_v10, %v2766_v8  ;;  %v2773_v16 = vsel %vm478_vm0, %v2771_v7, %v2772_v11 }
 0x5fa   : > { %v6451_v18 = vpack.c.bf16 %v2767_v14, %v2765_v10  ;;  %v6454_v19 = vpack.c.bf16 %v2772_v11, %v2773_v16  ;;  %3220 = vmatpush.bf16.msrb.mxu3 %v7486_v22  ;;  %3194 = vmatpush.bf16.msrb.mxu0 %v7468_v27  ;;  %v7495_v10 = vld [vmem:[#allocation6 + $0x7b0] sm:$0xff]  ;;  %v7502_v14 = vld [vmem:[#allocation6 + $0x7e8] sm:$0xff]  ;;  %v7508_v22 = vld [vmem:[#allocation6 + $0x818] sm:$0xff] }
 0x5fb   : > { %v7511_v11 = vld [vmem:[#allocation6 + $0x830] sm:$0xff]  ;;  %3456 = vmatpush.bf16.msra.mxu1 %v7495_v10  ;;  %v7494_v16 = vld [vmem:[#allocation6 + $0x7a8] sm:$0xff]  ;;  %v7517_v10 = vld [vmem:[#allocation6 + $0x860] sm:$0xff] }
 0x5fc   : > { %6452 = vmatmul.msk.bf16.vlgmr.msra.gmra.mxu2 %vm8150_vm7, %v6451_v18  ;;  %6455 = vmatmul.msk.bf16.vlgmr.msrb.gmra.mxu1 %vm8157_vm8, %v6454_v19  ;;  %v7510_v18 = vld [vmem:[#allocation6 + $0x828] sm:$0xff]  ;;  %v7501_v19 = vld [vmem:[#allocation6 + $0x7e0] sm:$0xff] }
 0x5fd   : > { %3483 = vmatpush.bf16.msra.mxu2 %v7512_v42  ;;  %v7490_v27 = vld [vmem:[#allocation6 + $0x788] sm:$0xff] }
 0x5fe   : > { %3221 = vmatpush.bf16.msrb.mxu3 %v7485_v25  ;;  %3195 = vmatpush.bf16.msrb.mxu0 %v7467_v32  ;;  %v7507_v25 = vld [vmem:[#allocation6 + $0x810] sm:$0xff]  ;;  %v7489_v32 = vld [vmem:[#allocation6 + $0x780] sm:$0xff] }
 0x5ff   : > { %3457 = vmatpush.bf16.msra.mxu1 %v7494_v16  ;;  %v7516_v16 = vld [vmem:[#allocation6 + $0x858] sm:$0xff] }
 0x601   : > { %3484 = vmatpush.bf16.msra.mxu2 %v7511_v11  ;;  %v7533_v11 = vld [vmem:[#allocation6 + $0x8e0] sm:$0xff] }
 0x602   : > { %3222 = vmatpush.bf16.msrb.mxu3 %v7484_v29  ;;  %3196 = vmatpush.bf16.msrb.mxu0 %v7466_v35  ;;  %v7506_v29 = vld [vmem:[#allocation6 + $0x808] sm:$0xff]  ;;  %v7520_v35 = vld [vmem:[#allocation6 + $0x878] sm:$0xff] }
 0x603   : > { %3458 = vmatpush.bf16.msra.mxu1 %v7493_v13  ;;  %v7515_v13 = vld [vmem:[#allocation6 + $0x850] sm:$0xff] }
 0x605   : > { %3485 = vmatpush.bf16.msra.mxu2 %v7510_v18  ;;  %v7532_v18 = vld [vmem:[#allocation6 + $0x8d8] sm:$0xff] }
 0x606   : > { %3223 = vmatpush.bf16.msrb.mxu3 %v7483_v33  ;;  %3197 = vmatpush.bf16.msrb.mxu0 %v7465_v38  ;;  %v7505_v33 = vld [vmem:[#allocation6 + $0x800] sm:$0xff]  ;;  %v7527_v38 = vld [vmem:[#allocation6 + $0x8b0] sm:$0xff] }
 0x607   : > { %3459 = vmatpush.bf16.msra.mxu1 %v7492_v21  ;;  %v7514_v21 = vld [vmem:[#allocation6 + $0x848] sm:$0xff] }
 0x609   : > { %3486 = vmatpush.bf16.msra.mxu2 %v7509_v17  ;;  %v7531_v17 = vld [vmem:[#allocation6 + $0x8d0] sm:$0xff] }
 0x60a   : > { %3224 = vmatpush.bf16.msrb.mxu3 %v7482_v36  ;;  %3469 = vmatpush.bf16.msra.mxu0 %v7504_v40  ;;  %v7536_v36 = vld [vmem:[#allocation6 + $0x8f8] sm:$0xff] }
 0x60b   : > { %3460 = vmatpush.bf16.msra.mxu1 %v7491_v24  ;;  %v7513_v24 = vld [vmem:[#allocation6 + $0x840] sm:$0xff] }
 0x60d   : > { %3487 = vmatpush.bf16.msra.mxu2 %v7508_v22  ;;  %v7530_v22 = vld [vmem:[#allocation6 + $0x8c8] sm:$0xff] }
 0x60e   : > { %3225 = vmatpush.bf16.msrb.mxu3 %v7481_v39  ;;  %3470 = vmatpush.bf16.msra.mxu0 %v7503_v43 }
 0x60f   : > { %3461 = vmatpush.bf16.msra.mxu1 %v7490_v27 }
 0x611   : > { %3488 = vmatpush.bf16.msra.mxu2 %v7507_v25  ;;  %v7529_v25 = vld [vmem:[#allocation6 + $0x8c0] sm:$0xff] }
 0x612   : > { %3471 = vmatpush.bf16.msra.mxu0 %v7502_v14  ;;  %3718 = vmatpush.bf16.msra.mxu3 %v7520_v35  ;;  %v7524_v14 = vld [vmem:[#allocation6 + $0x898] sm:$0xff] }
 0x613   : > { %3462 = vmatpush.bf16.msra.mxu1 %v7489_v32 }
 0x615   : > { %3489 = vmatpush.bf16.msra.mxu2 %v7506_v29 }
 0x616   : > { %3472 = vmatpush.bf16.msra.mxu0 %v7501_v19  ;;  %v7523_v19 = vld [vmem:[#allocation6 + $0x890] sm:$0xff] }
 0x617   : > { %3732 = vmatpush.bf16.msrb.mxu1 %v7528_v34 }
 0x619   : > { %3490 = vmatpush.bf16.msra.mxu2 %v7505_v33 }
 0x61a   : > { %3473 = vmatpush.bf16.msra.mxu0 %v7500_v20  ;;  %v7522_v20 = vld [vmem:[#allocation6 + $0x888] sm:$0xff] }
 0x61b   : > { %3733 = vmatpush.bf16.msrb.mxu1 %v7527_v38 }
 0x61e   : > { %3474 = vmatpush.bf16.msra.mxu0 %v7499_v23  ;;  %v7521_v23 = vld [vmem:[#allocation6 + $0x880] sm:$0xff] }
 0x622   : > { %3475 = vmatpush.bf16.msra.mxu0 %v7498_v26  ;;  %v7744_v26 = vld [vmem:[#allocation7 + $0xa] ss:$0 sm:$0xff] }
 0x626   : > { %3476 = vmatpush.bf16.msra.mxu0 %v7497_v30 }
 0x679   : > { %v2964_v50 = vpop.f32.mrf.mxu1 }
 0x67c   : > { %v2950_v45 = vpop.f32.mrf.mxu3 }
 0x67f   : > { %v2936_v47 = vpop.f32.mrf.mxu2 }
 0x680   : > { %v2937_v48 = vadd.f32 %v7742_v44, %v2936_v47 }
 0x681   : > { %v2966_v58 = vpop.f32.mrf.mxu1 }
 0x682   : > { %v2951_v51 = vadd.f32 %v2950_v45, %v2937_v48 }
 0x684   : > { %v2965_v52 = vadd.f32 %v2964_v50, %v2951_v51  ;;  %v2952_v56 = vpop.f32.mrf.mxu3 }
 0x686   : > { %v2971_v55 = vmul.f32 0.01, %v2965_v52  ;;  %vm2969_vm13 = vcmp.ge.f32.partialorder %v2965_v52, 0.0 }
 0x687   : > { %v2938_v53 = vpop.f32.mrf.mxu2 }
 0x688   : > { %v2939_v54 = vadd.f32 %v7742_v44, %v2938_v53  ;;  %v2973_v60 = vsel %vm2969_vm13, %v2965_v52, %v2971_v55 }
 0x689   : > { %v3028_v62 = vrot.slane %v2973_v60, 7  ;;  %v3034_v0 = vrot.slane %v2973_v60, 1 }
 0x68a   : > { %v2953_v57 = vadd.f32 %v2952_v56, %v2939_v54 }
 0x68c   : > { %v2967_v59 = vadd.f32 %v2966_v58, %v2953_v57 }
 0x68e   : > { %vm2970_vm14 = vcmp.ge.f32.partialorder %v2967_v59, 0.0  ;;  %v2972_v61 = vmul.f32 0.01, %v2967_v59 }
 0x690   : > { %v2974_v63 = vsel %vm2970_vm14, %v2967_v59, %v2972_v61 }
 0x691   : > { %v3029_v1 = vrot.slane %v2974_v63, 7  ;;  %v3035_v2 = vrot.slane %v2974_v63, 1  ;;  %v3041_v3 = vpack.c.bf16 %v2974_v63, %v2973_v60 }
 0x693   : > { %3212 = vmatmul.bf16.vlgmr.msrb.gmra.mxu2 %v3041_v3  ;;  %v3030_v5 = vsel %vm471_vm2, %v3028_v62, %v3029_v1  ;;  %v3036_v7 = vsel %vm478_vm0, %v3034_v0, %v3035_v2 }
 0x694   : > { %v6554_v8 = vpack.c.bf16 %v3030_v5, %v3028_v62  ;;  %v6557_v9 = vpack.c.bf16 %v3035_v2, %v3036_v7  ;;  %v7526_v5 = vld [vmem:[#allocation6 + $0x8a8] sm:$0xff] }
 0x695   : > { %3734 = vmatpush.bf16.msrb.mxu1 %v7526_v5  ;;  %v7518_v7 = vld [vmem:[#allocation6 + $0x868] sm:$0xff]  ;;  %v7556_v5 = vld [vmem:[#allocation6 + $0x998] sm:$0xff] }
 0x696   : > { %6555 = vmatmul.msk.bf16.vlgmr.msrb.gmra.mxu0 %vm8150_vm7, %v6554_v8  ;;  %6558 = vmatmul.msk.bf16.vlgmr.msrb.gmra.mxu3 %vm8157_vm8, %v6557_v9  ;;  %v7534_v8 = vld [vmem:[#allocation6 + $0x8e8] sm:$0xff]  ;;  %v7525_v9 = vld [vmem:[#allocation6 + $0x8a0] sm:$0xff] }
 0x697   : > { %3746 = vmatpush.bf16.msrb.mxu0 %v7536_v36 }
 0x699   : > { %3735 = vmatpush.bf16.msrb.mxu1 %v7525_v9  ;;  %v7555_v9 = vld [vmem:[#allocation6 + $0x990] sm:$0xff] }
 0x69d   : > { %3736 = vmatpush.bf16.msrb.mxu1 %v7524_v14  ;;  %v7554_v14 = vld [vmem:[#allocation6 + $0x988] sm:$0xff] }
 0x6a1   : > { %3737 = vmatpush.bf16.msrb.mxu1 %v7523_v19  ;;  %v7553_v19 = vld [vmem:[#allocation6 + $0x980] sm:$0xff] }
 0x6a5   : > { %3738 = vmatpush.bf16.msrb.mxu1 %v7522_v20  ;;  %v7584_v20 = vld [vmem:[#allocation6 + $0xa78] sm:$0xff] }
 0x6a9   : > { %3739 = vmatpush.bf16.msrb.mxu1 %v7521_v23 }
 0x713   : > { %v3199_v39 = vpop.f32.mrf.mxu0 }
 0x714   : > { %v3200_v40 = vadd.f32 %v7743_v37, %v3199_v39 }
 0x716   : > { %v3213_v41 = vpop.f32.mrf.mxu2 }
 0x717   : > { %v3214_v42 = vadd.f32 %v3213_v41, %v3200_v40 }
 0x719   : > { %v3227_v43 = vpop.f32.mrf.mxu3 }
 0x71a   : > { %v3228_v44 = vadd.f32 %v3227_v43, %v3214_v42 }
 0x71b   : > { %v3201_v45 = vpop.f32.mrf.mxu0 }
 0x71c   : > { %v3202_v47 = vadd.f32 %v7743_v37, %v3201_v45  ;;  %v3234_v48 = vmul.f32 0.01, %v3228_v44  ;;  %vm3232_vm15 = vcmp.ge.f32.partialorder %v3228_v44, 0.0 }
 0x71e   : > { %v3215_v50 = vpop.f32.mrf.mxu2  ;;  %v3236_v52 = vsel %vm3232_vm15, %v3228_v44, %v3234_v48 }
 0x71f   : > { %v3216_v51 = vadd.f32 %v3215_v50, %v3202_v47  ;;  %v3238_v55 = vadd.f32 %v3236_v52, %v8193_v28  ;;  %v7519_v28 = vld [vmem:[#allocation6 + $0x870] sm:$0xff] }
 0x720   : > { %3719 = vmatpush.bf16.msra.mxu3 %v7519_v28  ;;  %v7548_v28 = vld [vmem:[#allocation6 + $0x958] sm:$0xff] }
 0x721   : > { %v3229_v53 = vpop.f32.mrf.mxu3  ;;  %v3293_v59 = vrot.slane %v3238_v55, 7  ;;  %v3299_v60 = vrot.slane %v3238_v55, 1 }
 0x722   : > { %v3230_v54 = vadd.f32 %v3229_v53, %v3216_v51 }
 0x724   : > { %vm3233_vm1 = vcmp.ge.f32.partialorder %v3230_v54, 0.0  ;;  %v3235_v56 = vmul.f32 0.01, %v3230_v54  ;;  %3720 = vmatpush.bf16.msra.mxu3 %v7518_v7  ;;  %v7547_v7 = vld [vmem:[#allocation6 + $0x950] sm:$0xff] }
 0x726   : > { %v3237_v57 = vsel %vm3233_vm1, %v3230_v54, %v3235_v56  ;;  %v7552_v56 = vld [vmem:[#allocation6 + $0x978] sm:$0xff] }
 0x727   : > { %v3239_v58 = vadd.f32 %v3237_v57, %v8196_v31  ;;  %v7535_v31 = vld [vmem:[#allocation6 + $0x8f0] sm:$0xff]  ;;  %v7544_v57 = vld [vmem:[#allocation6 + $0x938] sm:$0xff] }
 0x728   : > { %3747 = vmatpush.bf16.msrb.mxu0 %v7535_v31  ;;  %3721 = vmatpush.bf16.msra.mxu3 %v7517_v10  ;;  %v7540_v31 = vld [vmem:[#allocation6 + $0x918] sm:$0xff]  ;;  %v7546_v10 = vld [vmem:[#allocation6 + $0x948] sm:$0xff] }
 0x729   : > { %v3294_v61 = vrot.slane %v3239_v58, 7  ;;  %v3300_v62 = vrot.slane %v3239_v58, 1  ;;  %v3306_v63 = vpack.c.bf16 %v3239_v58, %v3238_v55  ;;  %v7560_v58 = vld [vmem:[#allocation6 + $0x9b8] sm:$0xff]  ;;  %3983 = vmatpush.bf16.msrb.mxu2 %v7544_v57  ;;  %v7573_v57 = vld [vmem:[#allocation6 + $0xa20] sm:$0xff] }
 0x72b   : > { %3477 = vmatmul.bf16.vlgmr.msra.gmra.mxu0 %v3306_v63  ;;  %v3295_v0 = vsel %vm471_vm2, %v3293_v59, %v3294_v61  ;;  %v3301_v1 = vsel %vm478_vm0, %v3299_v60, %v3300_v62  ;;  %v7543_v60 = vld [vmem:[#allocation6 + $0x930] sm:$0xff]  ;;  %v7542_v63 = vld [vmem:[#allocation6 + $0x928] sm:$0xff] }
 0x72c   : > { %v6657_v2 = vpack.c.bf16 %v3295_v0, %v3293_v59  ;;  %v6660_v3 = vpack.c.bf16 %v3300_v62, %v3301_v1  ;;  %3748 = vmatpush.bf16.msrb.mxu0 %v7534_v8  ;;  %3722 = vmatpush.bf16.msra.mxu3 %v7516_v16  ;;  %v7551_v59 = vld [vmem:[#allocation6 + $0x970] sm:$0xff]  ;;  %v7550_v62 = vld [vmem:[#allocation6 + $0x968] sm:$0xff]  ;;  %v7549_v1 = vld [vmem:[#allocation6 + $0x960] sm:$0xff] }
 0x72d   : > { %v7559_v61 = vld [vmem:[#allocation6 + $0x9b0] sm:$0xff]  ;;  %3984 = vmatpush.bf16.msrb.mxu2 %v7543_v60  ;;  %v7558_v0 = vld [vmem:[#allocation6 + $0x9a8] sm:$0xff]  ;;  %v7545_v16 = vld [vmem:[#allocation6 + $0x940] sm:$0xff] }
 0x72e   : > { %6658 = vmatmul.msk.bf16.vlgmr.msra.gmra.mxu1 %vm8150_vm7, %v6657_v2  ;;  %6661 = vmatmul.msk.bf16.vlgmr.msra.gmra.mxu2 %vm8157_vm8, %v6660_v3  ;;  %v7541_v2 = vld [vmem:[#allocation6 + $0x920] sm:$0xff]  ;;  %v7539_v8 = vld [vmem:[#allocation6 + $0x910] sm:$0xff]  ;;  %v7572_v60 = vld [vmem:[#allocation6 + $0xa18] sm:$0xff] }
 0x72f   : > { %4011 = vmatpush.bf16.msra.mxu1 %v7560_v58  ;;  %v7557_v3 = vld [vmem:[#allocation6 + $0x9a0] sm:$0xff] }
 0x730   : > { %3749 = vmatpush.bf16.msrb.mxu0 %v7533_v11  ;;  %3723 = vmatpush.bf16.msra.mxu3 %v7515_v13  ;;  %v7538_v11 = vld [vmem:[#allocation6 + $0x908] sm:$0xff]  ;;  %v7576_v13 = vld [vmem:[#allocation6 + $0xa38] sm:$0xff]  ;;  %v7565_v58 = vld [vmem:[#allocation6 + $0x9e0] sm:$0xff] }
 0x731   : > { %3985 = vmatpush.bf16.msrb.mxu2 %v7542_v63  ;;  %v7571_v63 = vld [vmem:[#allocation6 + $0xa10] sm:$0xff] }
 0x733   : > { %4012 = vmatpush.bf16.msra.mxu1 %v7559_v61  ;;  %v7564_v61 = vld [vmem:[#allocation6 + $0x9d8] sm:$0xff] }
 0x734   : > { %3750 = vmatpush.bf16.msrb.mxu0 %v7532_v18  ;;  %3724 = vmatpush.bf16.msra.mxu3 %v7514_v21  ;;  %v7537_v18 = vld [vmem:[#allocation6 + $0x900] sm:$0xff]  ;;  %v7575_v21 = vld [vmem:[#allocation6 + $0xa30] sm:$0xff] }
 0x735   : > { %3986 = vmatpush.bf16.msrb.mxu2 %v7541_v2  ;;  %v7570_v2 = vld [vmem:[#allocation6 + $0xa08] sm:$0xff] }
 0x737   : > { %4013 = vmatpush.bf16.msra.mxu1 %v7558_v0  ;;  %v7563_v0 = vld [vmem:[#allocation6 + $0x9d0] sm:$0xff] }
 0x738   : > { %3751 = vmatpush.bf16.msrb.mxu0 %v7531_v17  ;;  %3725 = vmatpush.bf16.msra.mxu3 %v7513_v24  ;;  %v7568_v17 = vld [vmem:[#allocation6 + $0x9f8] sm:$0xff] }
 0x739   : > { %3987 = vmatpush.bf16.msrb.mxu2 %v7540_v31  ;;  %v7569_v31 = vld [vmem:[#allocation6 + $0xa00] sm:$0xff] }
 0x73b   : > { %4014 = vmatpush.bf16.msra.mxu1 %v7557_v3  ;;  %v7562_v3 = vld [vmem:[#allocation6 + $0x9c8] sm:$0xff] }
 0x73c   : > { %3752 = vmatpush.bf16.msrb.mxu0 %v7530_v22  ;;  %3997 = vmatpush.bf16.msrb.mxu3 %v7552_v56  ;;  %v7745_v22 = vld [vmem:[#allocation7 + $0xb] ss:$0 sm:$0xff] }
 0x73d   : > { %3988 = vmatpush.bf16.msrb.mxu2 %v7539_v8  ;;  %v7582_v56 = vld [vmem:[#allocation6 + $0xa68] sm:$0xff]  ;;  %v7600_v8 = vld [vmem:[%s8438_s5 + $0x78] sm:$0xff] }
 0x73f   : > { %4015 = vmatpush.bf16.msra.mxu1 %v7556_v5  ;;  %v7561_v5 = vld [vmem:[#allocation6 + $0x9c0] sm:$0xff] }
 0x740   : > { %3753 = vmatpush.bf16.msrb.mxu0 %v7529_v25  ;;  %3998 = vmatpush.bf16.msrb.mxu3 %v7551_v59  ;;  %v7581_v59 = vld [vmem:[#allocation6 + $0xa60] sm:$0xff] }
 0x741   : > { %3989 = vmatpush.bf16.msrb.mxu2 %v7538_v11  ;;  %v7599_v11 = vld [vmem:[%s8438_s5 + $0x70] sm:$0xff] }
 0x743   : > { %4016 = vmatpush.bf16.msra.mxu1 %v7555_v9  ;;  %v7592_v9 = vld [vmem:[%s8438_s5 + $0x38] sm:$0xff] }
 0x744   : > { %3999 = vmatpush.bf16.msrb.mxu3 %v7550_v62  ;;  %4246 = vmatpush.bf16.msra.mxu0 %v7568_v17  ;;  %v7580_v62 = vld [vmem:[#allocation6 + $0xa58] sm:$0xff] }
 0x745   : > { %3990 = vmatpush.bf16.msrb.mxu2 %v7537_v18 }
 0x747   : > { %4017 = vmatpush.bf16.msra.mxu1 %v7554_v14  ;;  %v7746_v14 = vld [vmem:[#allocation7 + $0xc] ss:$0 sm:$0xff] }
 0x748   : > { %4000 = vmatpush.bf16.msrb.mxu3 %v7549_v1  ;;  %v7579_v1 = vld [vmem:[#allocation6 + $0xa50] sm:$0xff] }
 0x749   : > { %4260 = vmatpush.bf16.msra.mxu2 %v7576_v13 }
 0x74b   : > { %4018 = vmatpush.bf16.msra.mxu1 %v7553_v19 }
 0x74c   : > { %4001 = vmatpush.bf16.msrb.mxu3 %v7548_v28  ;;  %v7578_v28 = vld [vmem:[#allocation6 + $0xa48] sm:$0xff] }
 0x74d   : > { %4261 = vmatpush.bf16.msra.mxu2 %v7575_v21 }
 0x750   : > { %4002 = vmatpush.bf16.msrb.mxu3 %v7547_v7  ;;  %v7577_v7 = vld [vmem:[#allocation6 + $0xa40] sm:$0xff] }
 0x754   : > { %4003 = vmatpush.bf16.msrb.mxu3 %v7546_v10  ;;  %v7608_v10 = vld [vmem:[%s8438_s5 + $0xb8] sm:$0xff] }
 0x758   : > { %4004 = vmatpush.bf16.msrb.mxu3 %v7545_v16 }
 0x7a8   : > { %v3478_v29 = vpop.f32.mrf.mxu0 }
 0x7ab   : > { %v3464_v27 = vpop.f32.mrf.mxu1 }
 0x7ac   : > { %v3465_v30 = vadd.f32 %v7744_v26, %v3464_v27 }
 0x7ae   : > { %v3479_v32 = vadd.f32 %v3478_v29, %v3465_v30 }
 0x7b0   : > { %v3480_v37 = vpop.f32.mrf.mxu0 }
 0x7b1   : > { %v3492_v33 = vpop.f32.mrf.mxu2 }
 0x7b2   : > { %v3493_v34 = vadd.f32 %v3492_v33, %v3479_v32 }
 0x7b3   : > { %v3466_v35 = vpop.f32.mrf.mxu1 }
 0x7b4   : > { %v3467_v36 = vadd.f32 %v7744_v26, %v3466_v35  ;;  %v3499_v38 = vmul.f32 0.01, %v3493_v34  ;;  %vm3497_vm3 = vcmp.ge.f32.partialorder %v3493_v34, 0.0 }
 0x7b6   : > { %v3481_v39 = vadd.f32 %v3480_v37, %v3467_v36  ;;  %v3501_v42 = vsel %vm3497_vm3, %v3493_v34, %v3499_v38 }
 0x7b7   : > { %v3556_v44 = vrot.slane %v3501_v42, 7  ;;  %v3562_v47 = vrot.slane %v3501_v42, 1 }
 0x7b9   : > { %v3494_v40 = vpop.f32.mrf.mxu2 }
 0x7ba   : > { %v3495_v41 = vadd.f32 %v3494_v40, %v3481_v39 }
 0x7bc   : > { %vm3498_vm4 = vcmp.ge.f32.partialorder %v3495_v41, 0.0  ;;  %v3500_v43 = vmul.f32 0.01, %v3495_v41 }
 0x7be   : > { %v3502_v45 = vsel %vm3498_vm4, %v3495_v41, %v3500_v43 }
 0x7bf   : > { %v3557_v48 = vrot.slane %v3502_v45, 7  ;;  %v3563_v50 = vrot.slane %v3502_v45, 1  ;;  %v3569_v51 = vpack.c.bf16 %v3502_v45, %v3501_v42 }
 0x7c1   : > { %v3558_v52 = vsel %vm471_vm2, %v3556_v44, %v3557_v48  ;;  %v3564_v53 = vsel %vm478_vm0, %v3562_v47, %v3563_v50  ;;  %3740 = vmatmul.bf16.vlgmr.msrb.gmra.mxu1 %v3569_v51 }
 0x7c2   : > { %v6763_v54 = vpack.c.bf16 %v3563_v50, %v3564_v53  ;;  %v6760_v55 = vpack.c.bf16 %v3558_v52, %v3556_v44  ;;  %4509 = vmatpush.bf16.msrb.mxu1 %v7592_v9 }
 0x7c4   : > { %6761 = vmatmul.msk.bf16.vlgmr.msra.gmra.mxu3 %vm8150_vm7, %v6760_v55  ;;  %6764 = vmatmul.msk.bf16.vlgmr.msrb.gmra.mxu0 %vm8157_vm8, %v6763_v54  ;;  %v7574_v54 = vld [vmem:[#allocation6 + $0xa28] sm:$0xff] }
 0x7c5   : > { %4274 = vmatpush.bf16.msra.mxu3 %v7584_v20  ;;  %4262 = vmatpush.bf16.msra.mxu2 %v7574_v54  ;;  %v7566_v55 = vld [vmem:[#allocation6 + $0x9e8] sm:$0xff] }
 0x7c6   : > { %v7587_v54 = vld [vmem:[%s8438_s5 + $0x10] sm:$0xff] }
 0x7c9   : > { %4263 = vmatpush.bf16.msra.mxu2 %v7573_v57  ;;  %v7586_v57 = vld [vmem:[%s8438_s5 + $0x8] sm:$0xff] }
 0x7cd   : > { %4264 = vmatpush.bf16.msra.mxu2 %v7572_v60  ;;  %v7585_v60 = vld [vmem:[%s8438_s5] sm:$0xff] }
 0x7d1   : > { %4265 = vmatpush.bf16.msra.mxu2 %v7571_v63 }
 0x7d5   : > { %4266 = vmatpush.bf16.msra.mxu2 %v7570_v2 }
 0x7d9   : > { %4267 = vmatpush.bf16.msra.mxu2 %v7569_v31 }
 0x83e   : > { %v3741_v23 = vpop.f32.mrf.mxu1 }
 0x841   : > { %v3755_v26 = vpop.f32.mrf.mxu0 }
 0x846   : > { %v3743_v34 = vpop.f32.mrf.mxu1 }
 0x847   : > { %v3727_v24 = vpop.f32.mrf.mxu3 }
 0x848   : > { %v3728_v25 = vadd.f32 %v7745_v22, %v3727_v24 }
 0x849   : > { %v3757_v37 = vpop.f32.mrf.mxu0 }
 0x84a   : > { %v3742_v27 = vadd.f32 %v3741_v23, %v3728_v25 }
 0x84c   : > { %v3756_v29 = vadd.f32 %v3755_v26, %v3742_v27 }
 0x84e   : > { %v3762_v30 = vmul.f32 0.01, %v3756_v29  ;;  %vm3760_vm5 = vcmp.ge.f32.partialorder %v3756_v29, 0.0 }
 0x84f   : > { %v3729_v32 = vpop.f32.mrf.mxu3 }
 0x850   : > { %v3730_v33 = vadd.f32 %v7745_v22, %v3729_v32  ;;  %v3764_v36 = vsel %vm3760_vm5, %v3756_v29, %v3762_v30 }
 0x851   : > { %v3766_v39 = vadd.f32 %v3764_v36, %v8171_v46  ;;  %v7567_v46 = vld [vmem:[#allocation6 + $0x9f0] sm:$0xff] }
 0x852   : > { %v3744_v35 = vadd.f32 %v3743_v34, %v3730_v33  ;;  %4247 = vmatpush.bf16.msra.mxu0 %v7567_v46  ;;  %v7604_v46 = vld [vmem:[%s8438_s5 + $0x98] sm:$0xff] }
 0x853   : > { %v3827_v43 = vrot.slane %v3766_v39, 1  ;;  %v3821_v47 = vrot.slane %v3766_v39, 7 }
 0x854   : > { %v3758_v38 = vadd.f32 %v3757_v37, %v3744_v35 }
 0x856   : > { %vm3761_vm6 = vcmp.ge.f32.partialorder %v3758_v38, 0.0  ;;  %v3763_v40 = vmul.f32 0.01, %v3758_v38  ;;  %4248 = vmatpush.bf16.msra.mxu0 %v7566_v55  ;;  %v7603_v55 = vld [vmem:[%s8438_s5 + $0x90] sm:$0xff] }
 0x858   : > { %v3765_v41 = vsel %vm3761_vm6, %v3758_v38, %v3763_v40 }
 0x859   : > { %v3767_v42 = vadd.f32 %v3765_v41, %v8174_v49  ;;  %v7583_v49 = vld [vmem:[#allocation6 + $0xa70] sm:$0xff] }
 0x85a   : > { %4275 = vmatpush.bf16.msra.mxu3 %v7583_v49  ;;  %4249 = vmatpush.bf16.msra.mxu0 %v7565_v58  ;;  %v7595_v49 = vld [vmem:[%s8438_s5 + $0x50] sm:$0xff]  ;;  %v7602_v58 = vld [vmem:[%s8438_s5 + $0x88] sm:$0xff] }
 0x85b   : > { %v3822_v44 = vrot.slane %v3767_v42, 7  ;;  %v3834_v45 = vpack.c.bf16 %v3767_v42, %v3766_v39  ;;  %v3828_v48 = vrot.slane %v3767_v42, 1  ;;  %v7591_v42 = vld [vmem:[%s8438_s5 + $0x30] sm:$0xff] }
 0x85c   : > { %4510 = vmatpush.bf16.msrb.mxu1 %v7591_v42  ;;  %v7614_v42 = vld [vmem:[#allocation10 + $0x24] sm:$0xf0] }
 0x85d   : > { %4005 = vmatmul.bf16.vlgmr.msrb.gmra.mxu3 %v3834_v45  ;;  %v3823_v50 = vsel %vm471_vm2, %v3821_v47, %v3822_v44  ;;  %v3829_v51 = vsel %vm478_vm0, %v3827_v43, %v3828_v48  ;;  %v7607_v43 = vld [vmem:[%s8438_s5 + $0xb0] sm:$0xff]  ;;  %v7598_v44 = vld [vmem:[%s8438_s5 + $0x68] sm:$0xff] }
 0x85e   : > { %v6863_v52 = vpack.c.bf16 %v3823_v50, %v3821_v47  ;;  %v6866_v53 = vpack.c.bf16 %v3828_v48, %v3829_v51  ;;  %4276 = vmatpush.bf16.msra.mxu3 %v7582_v56  ;;  %4250 = vmatpush.bf16.msra.mxu0 %v7564_v61  ;;  %v7590_v45 = vld [vmem:[%s8438_s5 + $0x28] sm:$0xff]  ;;  %v7597_v48 = vld [vmem:[%s8438_s5 + $0x60] sm:$0xff] }
 0x85f   : > { %v7606_v47 = vld [vmem:[%s8438_s5 + $0xa8] sm:$0xff]  ;;  %v7589_v50 = vld [vmem:[%s8438_s5 + $0x20] sm:$0xff] }
 0x860   : > { %6864 = vmatmul.msk.bf16.vlgmr.msrb.gmra.mxu2 %vm8150_vm7, %v6863_v52  ;;  %6867 = vmatmul.msk.bf16.vlgmr.msra.gmra.mxu1 %vm8157_vm8, %v6866_v53  ;;  %v7605_v51 = vld [vmem:[%s8438_s5 + $0xa0] sm:$0xff]  ;;  %v7596_v52 = vld [vmem:[%s8438_s5 + $0x58] sm:$0xff]  ;;  %v7594_v56 = vld [vmem:[%s8438_s5 + $0x48] sm:$0xff] }
 0x861   : > { %4537 = vmatpush.bf16.msrb.mxu2 %v7608_v10  ;;  %4511 = vmatpush.bf16.msrb.mxu1 %v7590_v45  ;;  %v7588_v53 = vld [vmem:[%s8438_s5 + $0x18] sm:$0xff]  ;;  %v7601_v61 = vld [vmem:[%s8438_s5 + $0x80] sm:$0xff]  ;;  %v7097_v45 = vor.u32 %v7614_v42, %v7096_v15 }
 0x862   : > { %4277 = vmatpush.bf16.msra.mxu3 %v7581_v59  ;;  %4251 = vmatpush.bf16.msra.mxu0 %v7563_v0  ;;  %v7593_v59 = vld [vmem:[%s8438_s5 + $0x40] sm:$0xff] }
 0x865   : > { %4538 = vmatpush.bf16.msrb.mxu2 %v7607_v43  ;;  %4512 = vmatpush.bf16.msrb.mxu1 %v7589_v50  ;;  %v7615_v43 = vld [vmem:[#allocation10 + $0x34] sm:$0xf]  ;;  %v7118_v50 = vld [vmem:[#allocation10 + $0x48] sm:$0xf0] }
 0x866   : > { %4278 = vmatpush.bf16.msra.mxu3 %v7580_v62  ;;  %4252 = vmatpush.bf16.msra.mxu0 %v7562_v3  ;;  %v7747_v62 = vld [vmem:[#allocation7 + $0xd] ss:$0 sm:$0xff] }
 0x869   : > { %4539 = vmatpush.bf16.msrb.mxu2 %v7606_v47  ;;  %4513 = vmatpush.bf16.msrb.mxu1 %v7588_v53 }
 0x86a   : > { %4279 = vmatpush.bf16.msra.mxu3 %v7579_v1  ;;  %4253 = vmatpush.bf16.msra.mxu0 %v7561_v5 }
 0x86d   : > { %4540 = vmatpush.bf16.msrb.mxu2 %v7605_v51  ;;  %4514 = vmatpush.bf16.msrb.mxu1 %v7587_v54 }
 0x86e   : > { %4280 = vmatpush.bf16.msra.mxu3 %v7578_v28  ;;  %4523 = vmatpush.bf16.msrb.mxu0 %v7600_v8 }
 0x871   : > { %4541 = vmatpush.bf16.msrb.mxu2 %v7604_v46  ;;  %4515 = vmatpush.bf16.msrb.mxu1 %v7586_v57  ;;  %v7106_v57 = vld [vmem:[#allocation10 + $0x30] sm:$0xf] }
 0x872   : > { %4281 = vmatpush.bf16.msra.mxu3 %v7577_v7  ;;  %4524 = vmatpush.bf16.msrb.mxu0 %v7599_v11 }
 0x875   : > { %4542 = vmatpush.bf16.msrb.mxu2 %v7603_v55  ;;  %4516 = vmatpush.bf16.msrb.mxu1 %v7585_v60  ;;  %v7618_v60 = vld [vmem:[#allocation10 + $0x44] sm:$0xf0] }
 0x876   : > { %4525 = vmatpush.bf16.msrb.mxu0 %v7598_v44  ;;  %v7108_v44 = vld [vmem:[#allocation10 + $0x38] sm:$0xf0] }
 0x877   : > { %v7111_v47 = vor.u32 %v7615_v43, %v7108_v44 }
 0x879   : > { %4543 = vmatpush.bf16.msrb.mxu2 %v7602_v58  ;;  %v7616_v58 = vld [vmem:[#allocation10 + $0x34] sm:$0xf0] }
 0x87a   : > { %4526 = vmatpush.bf16.msrb.mxu0 %v7597_v48  ;;  %v7617_v48 = vld [vmem:[#allocation10 + $0x44] sm:$0xf] }
 0x87b   : > { %v7121_v51 = vor.u32 %v7617_v48, %v7118_v50  ;;  %v7176_v48 = vld [vmem:[#allocation10 + $0xa0] sm:$0xf]  ;;  %v7630_v50 = vld [vmem:[#allocation10 + $0xa4] sm:$0xf0] }
 0x87d   : > { %4544 = vmatpush.bf16.msrb.mxu2 %v7601_v61 }
 0x87e   : > { %4527 = vmatpush.bf16.msrb.mxu0 %v7596_v52  ;;  %v8359_v52 = vld [vmem:[#allocation9] ss:$0 sm:$0xff] }
 0x882   : > { %4528 = vmatpush.bf16.msrb.mxu0 %v7595_v49 }
 0x886   : > { %4529 = vmatpush.bf16.msrb.mxu0 %v7594_v56 }
 0x88a   : > { %4530 = vmatpush.bf16.msrb.mxu0 %v7593_v59  ;;  %v7116_v59 = vld [vmem:[#allocation10 + $0x40] sm:$0xf] }
 0x8dd   : > { %v4020_v13 = vpop.f32.mrf.mxu1 }
 0x8e0   : > { %v4006_v16 = vpop.f32.mrf.mxu3 }
 0x8e3   : > { %v3992_v18 = vpop.f32.mrf.mxu2 }
 0x8e4   : > { %v3993_v19 = vadd.f32 %v7746_v14, %v3992_v18 }
 0x8e5   : > { %v4022_v26 = vpop.f32.mrf.mxu1 }
 0x8e6   : > { %v4007_v17 = vadd.f32 %v4006_v16, %v3993_v19 }
 0x8e8   : > { %v4021_v20 = vadd.f32 %v4020_v13, %v4007_v17  ;;  %v4008_v24 = vpop.f32.mrf.mxu3 }
 0x8ea   : > { %v4027_v23 = vmul.f32 0.01, %v4021_v20  ;;  %vm4025_vm9 = vcmp.ge.f32.partialorder %v4021_v20, 0.0 }
 0x8eb   : > { %v3994_v21 = vpop.f32.mrf.mxu2 }
 0x8ec   : > { %v3995_v22 = vadd.f32 %v7746_v14, %v3994_v21  ;;  %v4029_v29 = vsel %vm4025_vm9, %v4021_v20, %v4027_v23 }
 0x8ed   : > { %v4084_v32 = vrot.slane %v4029_v29, 7  ;;  %v4090_v34 = vrot.slane %v4029_v29, 1 }
 0x8ee   : > { %v4009_v25 = vadd.f32 %v4008_v24, %v3995_v22 }
 0x8f0   : > { %v4023_v27 = vadd.f32 %v4022_v26, %v4009_v25 }
 0x8f2   : > { %vm4026_vm10 = vcmp.ge.f32.partialorder %v4023_v27, 0.0  ;;  %v4028_v30 = vmul.f32 0.01, %v4023_v27 }
 0x8f4   : > { %v4030_v33 = vsel %vm4026_vm10, %v4023_v27, %v4028_v30  ;;  %v7609_v30 = vld [vmem:[#allocation10 + $0x4] sm:$0xf] }
 0x8f5   : > { %v4085_v35 = vrot.slane %v4030_v33, 7  ;;  %v4091_v36 = vrot.slane %v4030_v33, 1  ;;  %v4097_v37 = vpack.c.bf16 %v4030_v33, %v4029_v29 }
 0x8f7   : > { %4268 = vmatmul.bf16.vlgmr.msra.gmra.mxu2 %v4097_v37  ;;  %v4086_v38 = vsel %vm471_vm2, %v4084_v32, %v4085_v35  ;;  %v4092_v39 = vsel %vm478_vm0, %v4090_v34, %v4091_v36  ;;  %v7611_v34 = vld [vmem:[#allocation10 + $0x14] sm:$0xf]  ;;  %v7088_v35 = vld [vmem:[#allocation10 + $0x18] sm:$0xf0] }
 0x8f8   : > { %v6966_v40 = vpack.c.bf16 %v4086_v38, %v4084_v32  ;;  %v6969_v41 = vpack.c.bf16 %v4091_v36, %v4092_v39  ;;  %v7078_v32 = vld [vmem:[#allocation10 + $0x8] sm:$0xf0]  ;;  %v7613_v36 = vld [vmem:[#allocation10 + $0x24] sm:$0xf]  ;;  %v7091_v37 = vor.u32 %v7611_v34, %v7088_v35 }
 0x8f9   : > { %v7081_v33 = vor.u32 %v7609_v30, %v7078_v32  ;;  %v7098_v38 = vld [vmem:[#allocation10 + $0x28] sm:$0xf0]  ;;  %v7168_v32 = vld [vmem:[#allocation10 + $0x98] sm:$0xf0] }
 0x8fa   : > { %6967 = vmatmul.msk.bf16.vlgmr.msra.gmra.mxu0 %vm8150_vm7, %v6966_v40  ;;  %6970 = vmatmul.msk.bf16.vlgmr.msra.gmra.mxu3 %vm8157_vm8, %v6969_v41  ;;  %v7101_v39 = vor.u32 %v7613_v36, %v7098_v38  ;;  %v7612_v40 = vld [vmem:[#allocation10 + $0x14] sm:$0xf0]  ;;  %v7178_v34 = vld [vmem:[#allocation10 + $0xa8] sm:$0xf0] }
 0x8fb   : > { %4595 = vmatpush.bf16.msra.mxu1 %v7081_v33  ;;  %4644 = vmatpush.bf16.msra.mxu0 %v7091_v37  ;;  %v7087_v41 = vor.u32 %v7612_v40, %v7086_v12  ;;  %v7629_v33 = vld [vmem:[#allocation10 + $0xa4] sm:$0xf] }
 0x8fc   : > { %4693 = vmatpush.bf16.msra.mxu2 %v7101_v39  ;;  %v7181_v39 = vor.u32 %v7629_v33, %v7178_v34 }
 0x977   : > { %v4255_v63 = vpop.f32.mrf.mxu0 }
 0x978   : > { %v4256_v0 = vadd.f32 %v7747_v62, %v4255_v63  ;;  %v7128_v63 = vld [vmem:[#allocation10 + $0x58] sm:$0xf0] }
 0x97a   : > { %v4269_v1 = vpop.f32.mrf.mxu2 }
 0x97b   : > { %v4270_v2 = vadd.f32 %v4269_v1, %v4256_v0  ;;  %v7621_v0 = vld [vmem:[#allocation10 + $0x64] sm:$0xf]  ;;  %v7138_v1 = vld [vmem:[#allocation10 + $0x68] sm:$0xf0] }
 0x97d   : > { %v4283_v3 = vpop.f32.mrf.mxu3 }
 0x97e   : > { %v4284_v28 = vadd.f32 %v4283_v3, %v4270_v2  ;;  %v7107_v3 = vor.u32 %v7616_v58, %v7106_v57 }
 0x97f   : > { %v4257_v31 = vpop.f32.mrf.mxu0 }
 0x980   : > { %v4258_v5 = vadd.f32 %v7747_v62, %v4257_v31  ;;  %v4290_v7 = vmul.f32 0.01, %v4284_v28  ;;  %vm4288_vm11 = vcmp.ge.f32.partialorder %v4284_v28, 0.0  ;;  %v7619_v62 = vld [vmem:[#allocation10 + $0x54] sm:$0xf] }
 0x982   : > { %v4271_v8 = vpop.f32.mrf.mxu2  ;;  %v4292_v10 = vsel %vm4288_vm11, %v4284_v28, %v4290_v7  ;;  %v7117_v28 = vor.u32 %v7618_v60, %v7116_v59  ;;  %v7141_v7 = vor.u32 %v7621_v0, %v7138_v1  ;;  %v7186_v60 = vld [vmem:[#allocation10 + $0xb0] sm:$0xf]  ;;  %v7635_v0 = vld [vmem:[#allocation10 + $0xd4] sm:$0xf]  ;;  %v7208_v1 = vld [vmem:[#allocation10 + $0xd8] sm:$0xf0] }
 0x983   : > { %v4272_v9 = vadd.f32 %v4271_v8, %v4258_v5  ;;  %v4294_v16 = vadd.f32 %v4292_v10, %v8139_v4  ;;  %v7076_v4 = vld [vmem:[#allocation10] sm:$0xf]  ;;  %v7131_v5 = vor.u32 %v7619_v62, %v7128_v63  ;;  %v7126_v10 = vld [vmem:[#allocation10 + $0x50] sm:$0xf]  ;;  %v7634_v63 = vld [vmem:[#allocation10 + $0xc4] sm:$0xf0] }
 0x984   : > { %v7196_v62 = vld [vmem:[#allocation10 + $0xc0] sm:$0xf] }
 0x985   : > { %v4285_v11 = vpop.f32.mrf.mxu3  ;;  %v4347_v17 = vrot.slane %v4294_v16, 7  ;;  %v4353_v20 = vrot.slane %v4294_v16, 1 }
 0x986   : > { %v4286_v14 = vadd.f32 %v4285_v11, %v4272_v9  ;;  %v7620_v11 = vld [vmem:[#allocation10 + $0x54] sm:$0xf0] }
 0x988   : > { %vm4289_vm12 = vcmp.ge.f32.partialorder %v4286_v14, 0.0  ;;  %v4291_v18 = vmul.f32 0.01, %v4286_v14 }
 0x98a   : > { %v4293_v19 = vsel %vm4289_vm12, %v4286_v14, %v4291_v18  ;;  %v7136_v14 = vld [vmem:[#allocation10 + $0x60] sm:$0xf]  ;;  %v7623_v18 = vld [vmem:[#allocation10 + $0x74] sm:$0xf] }
 0x98b   : > { %v4295_v13 = vadd.f32 %v4293_v19, %v8142_v6  ;;  %v7610_v6 = vld [vmem:[#allocation10 + $0x4] sm:$0xf0]  ;;  %v7148_v19 = vld [vmem:[#allocation10 + $0x78] sm:$0xf0] }
 0x98c   : > { %v7077_v29 = vor.u32 %v7610_v6, %v7076_v4  ;;  %v7156_v4 = vld [vmem:[#allocation10 + $0x80] sm:$0xf]  ;;  %v7626_v6 = vld [vmem:[#allocation10 + $0x84] sm:$0xf0] }
 0x98d   : > { %v4348_v21 = vrot.slane %v4295_v13, 7  ;;  %v4354_v22 = vrot.slane %v4295_v13, 1  ;;  %v4360_v23 = vpack.c.bf16 %v4295_v13, %v4294_v16  ;;  %v7622_v16 = vld [vmem:[#allocation10 + $0x64] sm:$0xf0]  ;;  %v7625_v13 = vld [vmem:[#allocation10 + $0x84] sm:$0xf]  ;;  %v7157_v36 = vor.u32 %v7626_v6, %v7156_v4 }
 0x98e   : > { %4582 = vmatpush.bf16.msrb.mxu3 %v7077_v29  ;;  %v7627_v29 = vld [vmem:[#allocation10 + $0x94] sm:$0xf] }
 0x98f   : > { %4531 = vmatmul.bf16.vlgmr.msrb.gmra.mxu0 %v4360_v23  ;;  %v4349_v24 = vsel %vm471_vm2, %v4347_v17, %v4348_v21  ;;  %v4355_v25 = vsel %vm478_vm0, %v4353_v20, %v4354_v22  ;;  %v7127_v20 = vor.u32 %v7620_v11, %v7126_v10  ;;  %v7137_v21 = vor.u32 %v7622_v16, %v7136_v14  ;;  %v7206_v10 = vld [vmem:[#allocation10 + $0xd0] sm:$0xf]  ;;  %v7636_v11 = vld [vmem:[#allocation10 + $0xd4] sm:$0xf0]  ;;  %v7216_v14 = vld [vmem:[#allocation10 + $0xe0] sm:$0xf] }
 0x990   : > { %v7069_v26 = vpack.c.bf16 %v4349_v24, %v4347_v17  ;;  %v7072_v27 = vpack.c.bf16 %v4354_v22, %v4355_v25  ;;  %4741 = vmatpush.bf16.msrb.mxu0 %v7111_v47  ;;  %v7158_v17 = vld [vmem:[#allocation10 + $0x88] sm:$0xf0]  ;;  %v7151_v22 = vor.u32 %v7623_v18, %v7148_v19  ;;  %v7171_v38 = vor.u32 %v7627_v29, %v7168_v32  ;;  %v7628_v47 = vld [vmem:[#allocation10 + $0x94] sm:$0xf0]  ;;  %v7638_v16 = vld [vmem:[#allocation10 + $0xe4] sm:$0xf0] }
 0x991   : > { %v7161_v23 = vor.u32 %v7625_v13, %v7158_v17  ;;  %v7639_v18 = vld [vmem:[#allocation10 + $0xf4] sm:$0xf]  ;;  %v7228_v19 = vld [vmem:[#allocation10 + $0xf8] sm:$0xf0]  ;;  %v7207_v13 = vor.u32 %v7636_v11, %v7206_v10  ;;  %v7217_v17 = vor.u32 %v7638_v16, %v7216_v14 }
 0x992   : > { %7070 = vmatmul.msk.bf16.vlgmr.msrb.gmra.mxu1 %vm8150_vm7, %v7069_v26  ;;  %7073 = vmatmul.msk.bf16.vlgmr.msrb.gmra.mxu2 %vm8157_vm8, %v7072_v27  ;;  %vm4571_vm7 = vcmask 130048   ;;  %v7146_v26 = vld [vmem:[#allocation10 + $0x70] sm:$0xf]  ;;  %v7624_v27 = vld [vmem:[#allocation10 + $0x74] sm:$0xf0] }
 0x993   : > { %4631 = vmatpush.bf16.msra.mxu3 %v7087_v41  ;;  %4680 = vmatpush.bf16.msrb.mxu1 %v7097_v45  ;;  %v7147_v35 = vor.u32 %v7624_v27, %v7146_v26  ;;  %v7166_v45 = vld [vmem:[#allocation10 + $0x90] sm:$0xf] }
 0x994   : > { %4789 = vmatpush.bf16.msrb.mxu2 %v7121_v51  ;;  %v7631_v51 = vld [vmem:[#allocation10 + $0xb4] sm:$0xf] }
 0xa0c   : > { %v4532_v49 = vpop.f32.mrf.mxu0 }
 0xa0f   : > { %v4518_v53 = vpop.f32.mrf.mxu1 }
 0xa10   : > { %v4519_v46 = vadd.f32 %v8359_v52, %v4518_v53  ;;  %v7633_v53 = vld [vmem:[#allocation10 + $0xc4] sm:$0xf] }
 0xa12   : > { %v4533_v54 = vadd.f32 %v4532_v49, %v4519_v46  ;;  %v7198_v46 = vld [vmem:[#allocation10 + $0xc8] sm:$0xf0] }
 0xa13   : > { %v7201_v57 = vor.u32 %v7633_v53, %v7198_v46 }
 0xa14   : > { %v4534_v15 = vpop.f32.mrf.mxu0 }
 0xa15   : > { %v4546_v55 = vpop.f32.mrf.mxu2 }
 0xa16   : > { %v4547_v56 = vadd.f32 %v4546_v55, %v4533_v54  ;;  %v7167_v54 = vor.u32 %v7628_v47, %v7166_v45  ;;  %v7177_v55 = vor.u32 %v7630_v50, %v7176_v48 }
 0xa17   : > { %v4520_v30 = vpop.f32.mrf.mxu1 }
 0xa18   : > { %vm4551_vm0 = vcmp.ge.f32.partialorder %v4547_v56, 0.0  ;;  %v4553_v61 = vmul.f32 0.01, %v4547_v56  ;;  %v4521_v37 = vadd.f32 %v8359_v52, %v4520_v30  ;;  %v7188_v52 = vld [vmem:[#allocation10 + $0xb8] sm:$0xf0] }
 0xa1a   : > { %v4555_v2 = vsel %vm4551_vm0, %v4547_v56, %v4553_v61  ;;  %v4535_v42 = vadd.f32 %v4534_v15, %v4521_v37  ;;  %v7191_v56 = vor.u32 %v7631_v51, %v7188_v52  ;;  %v7632_v61 = vld [vmem:[#allocation10 + $0xb4] sm:$0xf0] }
 0xa1b   : > { %v8362_v31 = vpack.c.bf16 %v4555_v2, %v4555_v2  ;;  %v7637_v2 = vld [vmem:[#allocation10 + $0xe4] sm:$0xf] }
 0xa1d   : > { %7082 = vmatmul.msk.bf16.vlgmr.msrb.gmra.mxu3 %vm4571_vm7, %v8362_v31  ;;  %7083 = vmatmul.msk.bf16.vlgmr.msra.gmra.mxu1 %vm4571_vm7, %v8362_v31  ;;  %v8369_v8 = vshrl.u32 %v8362_v31, 16  ;;  %v4659_v9 = vrot.slane %v8362_v31, 1  ;;  %v4755_v25 = vrot.slane %v8362_v31, 2  ;;  %v4851_v40 = vrot.slane %v8362_v31, 3  ;;  %v4548_v41 = vpop.f32.mrf.mxu2 }
 0xa1e   : > { %4728 = vmatpush.bf16.msrb.mxu3 %v7107_v3  ;;  %4776 = vmatpush.bf16.msra.mxu1 %v7117_v28  ;;  %v4549_v43 = vadd.f32 %v4548_v41, %v4535_v42  ;;  %v7218_v3 = vld [vmem:[#allocation10 + $0xe8] sm:$0xf0]  ;;  %v7187_v28 = vor.u32 %v7632_v61, %v7186_v60  ;;  %v7197_v31 = vor.u32 %v7634_v63, %v7196_v62  ;;  %v4557_v41 = vld [vmem:[#allocation12] sm:$0x3] }
 0xa1f   : > { %7093 = vmatmul.msk.bf16.vlgmr.msra.gmra.mxu0 %vm4571_vm7, %v8369_v8  ;;  %7103 = vmatmul.msk.bf16.vlgmr.msra.gmra.mxu2 %vm4571_vm7, %v4659_v9  ;;  %v4707_v24 = vrot.slane %v8369_v8, 1  ;;  %v4803_v12 = vrot.slane %v8369_v8, 2  ;;  %v4899_v59 = vrot.slane %v8369_v8, 3 }
 0xa20   : > { %4837 = vmatpush.bf16.msra.mxu0 %v7131_v5  ;;  %4885 = vmatpush.bf16.msra.mxu2 %v7141_v7  ;;  %vm4552_vm8 = vcmp.ge.f32.partialorder %v4549_v43, 0.0  ;;  %v4554_v44 = vmul.f32 0.01, %v4549_v43  ;;  %v7211_v5 = vor.u32 %v7635_v0, %v7208_v1  ;;  %v7221_v7 = vor.u32 %v7637_v2, %v7218_v3 }
 0xa22   : > { %v4556_v49 = vsel %vm4552_vm8, %v4549_v43, %v4554_v44 }
 0xa23   : > { %v4945_v58 = vpack.c.bf16 %v4556_v49, %v4556_v49 }
 0xa25   : > { %v5237_v27 = vrot.slane %v4945_v58, 3 }
 0xa2d   : > { %7092 = vmatmul.msk.bf16.vlgmr.msra.gmra.mxu3 %vm4571_vm7, %v8369_v8  ;;  %7102 = vmatmul.msk.bf16.vlgmr.msrb.gmra.mxu1 %vm4571_vm7, %v4659_v9  ;;  %v4995_v8 = vshrl.u32 %v4945_v58, 16  ;;  %v5045_v9 = vrot.slane %v4945_v58, 1 }
 0xa2e   : > { %4824 = vmatpush.bf16.msra.mxu3 %v7127_v20  ;;  %4872 = vmatpush.bf16.msrb.mxu1 %v7137_v21  ;;  %v7231_v20 = vor.u32 %v7639_v18, %v7228_v19 }
 0xa2f   : > { %7113 = vmatmul.msk.bf16.vlgmr.msrb.gmra.mxu0 %vm4571_vm7, %v4707_v24  ;;  %7123 = vmatmul.msk.bf16.vlgmr.msrb.gmra.mxu2 %vm4571_vm7, %v4755_v25  ;;  %v5093_v21 = vrot.slane %v4995_v8, 1  ;;  %v5189_v26 = vrot.slane %v4995_v8, 2  ;;  %v5285_v4 = vrot.slane %v4995_v8, 3 }
 0xa30   : > { %4933 = vmatpush.bf16.msrb.mxu0 %v7151_v22  ;;  %4981 = vmatpush.bf16.msrb.mxu2 %v7161_v23  ;;  %v5141_v22 = vrot.slane %v4945_v58, 2  ;;  %v7226_v23 = vld [vmem:[#allocation10 + $0xf0] sm:$0xf] }
 0xa3d   : > { %7112 = vmatmul.msk.bf16.vlgmr.msrb.gmra.mxu3 %vm4571_vm7, %v4707_v24  ;;  %7122 = vmatmul.msk.bf16.vlgmr.msra.gmra.mxu1 %vm4571_vm7, %v4755_v25  ;;  %v7640_v24 = vld [vmem:[#allocation10 + $0xf4] sm:$0xf0] }
 0xa3e   : > { %4920 = vmatpush.bf16.msrb.mxu3 %v7147_v35  ;;  %4968 = vmatpush.bf16.msra.mxu1 %v7157_v36  ;;  %v7227_v25 = vor.u32 %v7640_v24, %v7226_v23 }
 0xa3f   : > { %7133 = vmatmul.msk.bf16.vlgmr.msra.gmra.mxu0 %vm4571_vm7, %v4803_v12  ;;  %7143 = vmatmul.msk.bf16.vlgmr.msra.gmra.mxu2 %vm4571_vm7, %v4851_v40 }
 0xa40   : > { %5030 = vmatpush.bf16.msra.mxu0 %v7171_v38  ;;  %5079 = vmatpush.bf16.msra.mxu2 %v7181_v39 }
 0xa4d   : > { %7132 = vmatmul.msk.bf16.vlgmr.msra.gmra.mxu3 %vm4571_vm7, %v4803_v12  ;;  %7142 = vmatmul.msk.bf16.vlgmr.msrb.gmra.mxu1 %vm4571_vm7, %v4851_v40 }
 0xa4e   : > { %5017 = vmatpush.bf16.msra.mxu3 %v7167_v54  ;;  %5066 = vmatpush.bf16.msrb.mxu1 %v7177_v55 }
 0xa4f   : > { %7153 = vmatmul.msk.bf16.vlgmr.msrb.gmra.mxu0 %vm4571_vm7, %v4899_v59  ;;  %7163 = vmatmul.msk.bf16.vlgmr.msrb.gmra.mxu2 %vm4571_vm7, %v4945_v58 }
 0xa50   : > { %5127 = vmatpush.bf16.msrb.mxu0 %v7191_v56  ;;  %5175 = vmatpush.bf16.msrb.mxu2 %v7201_v57 }
 0xa5d   : > { %7152 = vmatmul.msk.bf16.vlgmr.msrb.gmra.mxu3 %vm4571_vm7, %v4899_v59  ;;  %7162 = vmatmul.msk.bf16.vlgmr.msra.gmra.mxu1 %vm4571_vm7, %v4945_v58 }
 0xa5e   : > { %5114 = vmatpush.bf16.msrb.mxu3 %v7187_v28  ;;  %5162 = vmatpush.bf16.msra.mxu1 %v7197_v31 }
 0xa5f   : > { %7173 = vmatmul.msk.bf16.vlgmr.msra.gmra.mxu0 %vm4571_vm7, %v4995_v8  ;;  %7183 = vmatmul.msk.bf16.vlgmr.msra.gmra.mxu2 %vm4571_vm7, %v5045_v9 }
 0xa60   : > { %5223 = vmatpush.bf16.msra.mxu0 %v7211_v5  ;;  %5271 = vmatpush.bf16.msra.mxu2 %v7221_v7 }
 0xa6d   : > { %7172 = vmatmul.msk.bf16.vlgmr.msra.gmra.mxu3 %vm4571_vm7, %v4995_v8  ;;  %7182 = vmatmul.msk.bf16.vlgmr.msrb.gmra.mxu1 %vm4571_vm7, %v5045_v9 }
 0xa6e   : > { %5210 = vmatpush.bf16.msra.mxu3 %v7207_v13  ;;  %5258 = vmatpush.bf16.msrb.mxu1 %v7217_v17 }
 0xa6f   : > { %7193 = vmatmul.msk.bf16.vlgmr.msrb.gmra.mxu0 %vm4571_vm7, %v5093_v21  ;;  %7203 = vmatmul.msk.bf16.vlgmr.msrb.gmra.mxu2 %vm4571_vm7, %v5141_v22 }
 0xa70   : > { %5319 = vmatpush.bf16.msrb.mxu0 %v7231_v20 }
 0xa7d   : > { %7192 = vmatmul.msk.bf16.vlgmr.msrb.gmra.mxu3 %vm4571_vm7, %v5093_v21  ;;  %7202 = vmatmul.msk.bf16.vlgmr.msra.gmra.mxu1 %vm4571_vm7, %v5141_v22 }
 0xa7e   : > { %5306 = vmatpush.bf16.msrb.mxu3 %v7227_v25 }
 0xa7f   : > { %7213 = vmatmul.msk.bf16.vlgmr.msra.gmra.mxu0 %vm4571_vm7, %v5189_v26  ;;  %7223 = vmatmul.msk.bf16.vlgmr.msra.gmra.mxu2 %vm4571_vm7, %v5237_v27 }
 0xa8d   : > { %7212 = vmatmul.msk.bf16.vlgmr.msra.gmra.mxu3 %vm4571_vm7, %v5189_v26  ;;  %7222 = vmatmul.msk.bf16.vlgmr.msrb.gmra.mxu1 %vm4571_vm7, %v5237_v27 }
 0xa8f   : > { %7233 = vmatmul.msk.bf16.vlgmr.msrb.gmra.mxu0 %vm4571_vm7, %v5285_v4 }
 0xa9a   : > { %v4597_v6 = vpop.f32.mrf.mxu1 }
 0xa9b   : > { %v4603_v30 = vrot.slane %v4597_v6, 7 }
 0xa9c   : > { %v4646_v29 = vpop.f32.mrf.mxu0 }
 0xa9d   : > { %7232 = vmatmul.msk.bf16.vlgmr.msrb.gmra.mxu3 %vm4571_vm7, %v5285_v4  ;;  %v4652_v42 = vrot.slane %v4646_v29, 7 }
 0xaa0   : > { %v4584_v32 = vpop.f32.mrf.mxu3 }
 0xaa1   : > { %v4604_v33 = vsel %vm471_vm2, %v4584_v32, %v4603_v30 }
 0xaa2   : > { %v4599_v34 = vpop.f32.mrf.mxu1  ;;  %v4695_v35 = vpop.f32.mrf.mxu2  ;;  %v4606_v43 = vadd.f32 %v4604_v33, %v4557_v41 }
 0xaa3   : > { %v4701_v38 = vrot.slane %v4695_v35, 7 }
 0xaa4   : > { %v4648_v36 = vpop.f32.mrf.mxu0 }
 0xaa8   : > { %v4586_v37 = vpop.f32.mrf.mxu3 }
 0xaaa   : > { %v4682_v39 = vpop.f32.mrf.mxu1  ;;  %v4697_v12 = vpop.f32.mrf.mxu2 }
 0xaab   : > { %v4702_v40 = vsel %vm471_vm2, %v4682_v39, %v4701_v38 }
 0xaac   : > { %v4743_v15 = vpop.f32.mrf.mxu0 }
 0xaad   : > { %v4749_v57 = vrot.slane %v4743_v15, 7 }
 0xab0   : > { %v4633_v44 = vpop.f32.mrf.mxu3 }
 0xab1   : > { %v4653_v45 = vsel %vm471_vm2, %v4633_v44, %v4652_v42 }
 0xab2   : > { %v4655_v47 = vadd.f32 %v4653_v45, %v4606_v43  ;;  %v4684_v48 = vpop.f32.mrf.mxu1  ;;  %v4791_v50 = vpop.f32.mrf.mxu2 }
 0xab3   : > { %v4797_v46 = vrot.slane %v4791_v50, 7 }
 0xab4   : > { %v4745_v51 = vpop.f32.mrf.mxu0  ;;  %v4704_v52 = vadd.f32 %v4702_v40, %v4655_v47 }
 0xab8   : > { %v4635_v53 = vpop.f32.mrf.mxu3 }
 0xaba   : > { %v4778_v49 = vpop.f32.mrf.mxu1  ;;  %v4793_v54 = vpop.f32.mrf.mxu2 }
 0xabb   : > { %v4798_v55 = vsel %vm471_vm2, %v4778_v49, %v4797_v46 }
 0xabc   : > { %v4839_v56 = vpop.f32.mrf.mxu0 }
 0xabd   : > { %v4845_v7 = vrot.slane %v4839_v56, 7 }
 0xac0   : > { %v4730_v58 = vpop.f32.mrf.mxu3 }
 0xac1   : > { %v4750_v59 = vsel %vm471_vm2, %v4730_v58, %v4749_v57 }
 0xac2   : > { %v4752_v60 = vadd.f32 %v4750_v59, %v4704_v52  ;;  %v4780_v61 = vpop.f32.mrf.mxu1  ;;  %v4887_v62 = vpop.f32.mrf.mxu2 }
 0xac3   : > { %v4893_v2 = vrot.slane %v4887_v62, 7 }
 0xac4   : > { %v4841_v63 = vpop.f32.mrf.mxu0  ;;  %v4800_v0 = vadd.f32 %v4798_v55, %v4752_v60 }
 0xac8   : > { %v4732_v1 = vpop.f32.mrf.mxu3 }
 0xaca   : > { %v4874_v3 = vpop.f32.mrf.mxu1  ;;  %v4889_v28 = vpop.f32.mrf.mxu2 }
 0xacb   : > { %v4894_v31 = vsel %vm471_vm2, %v4874_v3, %v4893_v2 }
 0xacc   : > { %v4935_v5 = vpop.f32.mrf.mxu0 }
 0xacd   : > { %v4941_v21 = vrot.slane %v4935_v5, 7 }
 0xad0   : > { %v4826_v8 = vpop.f32.mrf.mxu3 }
 0xad1   : > { %v4846_v9 = vsel %vm471_vm2, %v4826_v8, %v4845_v7 }
 0xad2   : > { %v4848_v10 = vadd.f32 %v4846_v9, %v4800_v0  ;;  %v4876_v11 = vpop.f32.mrf.mxu1  ;;  %v4983_v14 = vpop.f32.mrf.mxu2 }
 0xad3   : > { %v4989_v45 = vrot.slane %v4983_v14, 7 }
 0xad4   : > { %v4937_v16 = vpop.f32.mrf.mxu0  ;;  %v4896_v18 = vadd.f32 %v4894_v31, %v4848_v10  ;;  %v5331_v31 = vlaneseq }
 0xad6   : > { %vm5333_vm13 = vcmp.lt.s32.totalorder %v5331_v31, 256 }
 0xad8   : > { %v4828_v19 = vpop.f32.mrf.mxu3 }
 0xada   : > { %v4970_v13 = vpop.f32.mrf.mxu1  ;;  %v4985_v17 = vpop.f32.mrf.mxu2 }
 0xadb   : > { %v4990_v50 = vsel %vm471_vm2, %v4970_v13, %v4989_v45 }
 0xadc   : > { %v5032_v20 = vpop.f32.mrf.mxu0 }
 0xadd   : > { %v5038_v47 = vrot.slane %v5032_v20, 7 }
 0xae0   : > { %v4922_v22 = vpop.f32.mrf.mxu3 }
 0xae1   : > { %v4942_v23 = vsel %vm471_vm2, %v4922_v22, %v4941_v21 }
 0xae2   : > { %v4944_v24 = vadd.f32 %v4942_v23, %v4896_v18  ;;  %v4972_v25 = vpop.f32.mrf.mxu1  ;;  %v5081_v26 = vpop.f32.mrf.mxu2 }
 0xae3   : > { %v5087_v49 = vrot.slane %v5081_v26, 7 }
 0xae4   : > { %v5034_v27 = vpop.f32.mrf.mxu0  ;;  %v4992_v52 = vadd.f32 %v4990_v50, %v4944_v24 }
 0xae8   : > { %v4924_v4 = vpop.f32.mrf.mxu3 }
 0xaea   : > { %v5068_v6 = vpop.f32.mrf.mxu1  ;;  %v5083_v29 = vpop.f32.mrf.mxu2 }
 0xaeb   : > { %v5088_v56 = vsel %vm471_vm2, %v5068_v6, %v5087_v49 }
 0xaec   : > { %v5129_v30 = vpop.f32.mrf.mxu0 }
 0xaed   : > { %v5135_v54 = vrot.slane %v5129_v30, 7 }
 0xaf0   : > { %v5019_v32 = vpop.f32.mrf.mxu3 }
 0xaf1   : > { %v5039_v51 = vsel %vm471_vm2, %v5019_v32, %v5038_v47 }
 0xaf2   : > { %v5070_v33 = vpop.f32.mrf.mxu1  ;;  %v5177_v34 = vpop.f32.mrf.mxu2  ;;  %v5041_v53 = vadd.f32 %v5039_v51, %v4992_v52 }
 0xaf3   : > { %v5183_v61 = vrot.slane %v5177_v34, 7 }
 0xaf4   : > { %v5131_v35 = vpop.f32.mrf.mxu0  ;;  %v5090_v58 = vadd.f32 %v5088_v56, %v5041_v53 }
 0xaf8   : > { %v5021_v36 = vpop.f32.mrf.mxu3 }
 0xafa   : > { %v5164_v37 = vpop.f32.mrf.mxu1  ;;  %v5179_v38 = vpop.f32.mrf.mxu2 }
 0xafb   : > { %v5184_v0 = vsel %vm471_vm2, %v5164_v37, %v5183_v61 }
 0xafc   : > { %v5225_v39 = vpop.f32.mrf.mxu0 }
 0xafd   : > { %v5231_v62 = vrot.slane %v5225_v39, 7 }
 0xb00   : > { %v5116_v12 = vpop.f32.mrf.mxu3 }
 0xb01   : > { %v5136_v57 = vsel %vm471_vm2, %v5116_v12, %v5135_v54 }
 0xb02   : > { %v5166_v40 = vpop.f32.mrf.mxu1  ;;  %v5273_v15 = vpop.f32.mrf.mxu2  ;;  %v5138_v60 = vadd.f32 %v5136_v57, %v5090_v58 }
 0xb03   : > { %v5279_v28 = vrot.slane %v5273_v15, 7 }
 0xb04   : > { %v5227_v41 = vpop.f32.mrf.mxu0  ;;  %v5186_v2 = vadd.f32 %v5184_v0, %v5138_v60 }
 0xb08   : > { %v5118_v42 = vpop.f32.mrf.mxu3 }
 0xb0a   : > { %v5260_v43 = vpop.f32.mrf.mxu1  ;;  %v5275_v44 = vpop.f32.mrf.mxu2 }
 0xb0b   : > { %v5280_v5 = vsel %vm471_vm2, %v5260_v43, %v5279_v28 }
 0xb0c   : > { %v5321_v48 = vpop.f32.mrf.mxu0 }
 0xb0d   : > { %v5327_v7 = vrot.slane %v5321_v48, 7 }
 0xb10   : > { %v5212_v46 = vpop.f32.mrf.mxu3 }
 0xb11   : > { %v5232_v1 = vsel %vm471_vm2, %v5212_v46, %v5231_v62 }
 0xb12   : > { %v5262_v55 = vpop.f32.mrf.mxu1  ;;  %v5234_v3 = vadd.f32 %v5232_v1, %v5186_v2 }
 0xb14   : > { %v5323_v59 = vpop.f32.mrf.mxu0  ;;  %v5282_v8 = vadd.f32 %v5280_v5, %v5234_v3 }
 0xb18   : > { %v5214_v63 = vpop.f32.mrf.mxu3 }
 0xb20   : > { %v5308_v9 = vpop.f32.mrf.mxu3 }
 0xb21   : > { %v5328_v10 = vsel %vm471_vm2, %v5308_v9, %v5327_v7 }
 0xb22   : > { %v5330_v11 = vadd.f32 %v5328_v10, %v5282_v8 }
 0xb24   : > { %5335 = vst.msk [vmem:[%s440_s16] sm:$0x3] %vm5333_vm13, %v5330_v11 }
 0xb28   : > { %v5310_v14 = vpop.f32.mrf.mxu3 }
 0xb29 PF: > { %s23_s30 = sadd.s32 1, %s7981_s30  }
 0xb2a   : > { %p20_p7 = scmp.ge.s32.totalorder %s23_s30, 4  }
 0xb2c   :  { %22 = sbr.rel (!%p20_p7) target bundleno = 4 (0x4), region = 141 }
 0xb31   :  { %5355 = vsyncpa [#allocation3], 1 }
 0xb32   :  { %5357 = vsyncpa [#allocation3 + $0x1], 1 }
 0xb33   :  { %5358 = vsyncpa [#allocation5], 1 }
 0xb34   :  { %5359 = vsyncpa [#allocation8], 1 }
 0xb35   :  { %5360 = vsyncpa [#allocation11], 1 }

</bundles_post_ra>
